<compile_context>
chip_gen: v6e
topology: v6e:2x2x1
jax: 0.10.0
libtpu: 0.0.40
codegen_flags: <defaults>
</compile_context>

<pallas_src>
import functools

import jax
import jax.numpy as jnp
from jax.experimental import pallas as pl
from jax.experimental.pallas import tpu as pltpu


IN_FEATURES = 2048        # EfficientNet-B5 _fc.in_features
STEM_CH = 48              # EfficientNet-B5 stem channels
KPATCH = 3 * 3 * 3        # stem 3x3 conv over 3 input channels
KPAD = 32                 # contraction dim padded 27 -> 32
NSTEM = 128               # stem output channels padded 48 -> 128 (zero-padded)
NHEADS = 256              # 168 + 11 + 7 = 186 -> padded to 256 (lane dense)
N_SPLIT = 2               # 2048 channels split into 2 parallel tiles (v7x megacore)
TN = IN_FEATURES // N_SPLIT
VMEM_LIMIT = 32 * 1024 * 1024   # explicit scoped-VMEM budget (safe on v5e/v6e/v7x)

_BF16_ACT_CACHE = None


def _bf16_activations():
    """bf16 VPU/EUP exists on v6e/v7x; keep f32 elementwise math on v5e/older."""
    global _BF16_ACT_CACHE
    if _BF16_ACT_CACHE is None:
        try:
            kind = jax.devices()[0].device_kind.lower()
            _BF16_ACT_CACHE = any(t in kind for t in ("v6", "v7", "7x"))
        except Exception:  # pragma: no cover - be conservative off-TPU
            _BF16_ACT_CACHE = False
    return _BF16_ACT_CACHE


def _swish(x_f32, bf16_act):
    """x * sigmoid(x).  bf16 path feeds the EUP/VPU at the higher bf16 rate on
    v6e/v7x; the result is consumed by a bf16 MXU matmul anyway."""
    if bf16_act:
        xb = x_f32.astype(jnp.bfloat16)
        return xb * jax.nn.sigmoid(xb)          # bf16
    return x_f32 * jax.nn.sigmoid(x_f32)        # f32 (v5e: no bf16 EUP)


# ----------------------------------------------------------------------------
# Pallas kernel: fused backbone + pool + classifier heads
# ----------------------------------------------------------------------------
def _fused_backbone_heads_kernel(p_ref, ws_ref, bs_ref, wh_ref, bh_ref, fcw_ref,
                                 o_ref, acc_ref, *, hw, need_mask, bf16_act):
    """Grid = (B, N_SPLIT, spatial_tiles).  Per (b, n) the pooled 1024-wide channel
    slice accumulates in a VMEM scratch across the spatial ("arbitrary") axis; the
    finalize step multiplies by the fc slice and writes this tile's partial logits."""
    m = pl.program_id(2)

    @pl.when(m == 0)
    def _init():
        acc_ref[...] = jnp.zeros_like(acc_ref)

    x = p_ref[0]                                            # (tm, KPAD) bf16
    tm = x.shape[0]

    # stem 3x3/s2 conv as matmul (K padded to 32), f32 MXU accumulation + swish.
    a1 = jnp.dot(x, ws_ref[...], preferred_element_type=jnp.float32) + bs_ref[...]
    a1 = _swish(a1, bf16_act)
    if a1.dtype != jnp.bfloat16:
        a1 = a1.astype(jnp.bfloat16)

    # 1x1 head conv to this tile's TN channels (K padded to 128) + swish.
    a2 = jnp.dot(a1, wh_ref[...], preferred_element_type=jnp.float32) + bh_ref[...]
    a2 = _swish(a2, bf16_act)                               # (tm, TN)

    # Global-average-pool reduction on the MXU: (1, tm) @ (tm, TN).  The padding
    # mask is folded into the (1, tm) pool row (tm elements, negligible VPU work)
    # instead of a full (tm, TN) select every tile.
    if need_mask:
        row = m * tm + jax.lax.broadcasted_iota(jnp.int32, (1, tm), 1)
        pool_row = (row < hw).astype(a2.dtype)
    else:
        pool_row = jnp.ones((1, tm), a2.dtype)
    acc_ref[...] += jnp.dot(pool_row, a2, preferred_element_type=jnp.float32)

    @pl.when(m == pl.num_programs(2) - 1)
    def _finalize():
        # _avg_pooling + this channel tile's contribution to all three heads
        # (concatenated, lane-dense 256 outputs).  Dropout is eval-mode identity.
        pooled = (acc_ref[...] * jnp.float32(1.0 / hw)).astype(jnp.bfloat16)
        part = jnp.dot(pooled, fcw_ref[...], preferred_element_type=jnp.float32)
        o_ref[...] = part[None, None]                       # (1, 1, 1, NHEADS)


def backbone_and_heads(patches, ws, bs, wh, bh, fcw, *, hw, tm):
    """patches: (B, HWpad, KPAD) bf16 -> partial logits (B, N_SPLIT, 1, NHEADS) f32."""
    B, hw_pad, kp = patches.shape
    n_m = hw_pad // tm
    kernel = functools.partial(_fused_backbone_heads_kernel, hw=hw,
                               need_mask=(hw_pad != hw),
                               bf16_act=_bf16_activations())
    cost = pl.CostEstimate(
        flops=2 * B * (N_SPLIT * hw_pad * kp * NSTEM            # stem (dup per N-tile)
                       + hw_pad * NSTEM * IN_FEATURES           # 1x1 head conv
                       + hw_pad * IN_FEATURES                   # MXU pool
                       + IN_FEATURES * NHEADS),                 # classifier heads
        transcendentals=B * (N_SPLIT * hw_pad * NSTEM + hw_pad * IN_FEATURES),
        bytes_accessed=(N_SPLIT * patches.size * 2 + ws.size * 2 + wh.size * 2
                        + fcw.size * 2 + bs.size * 4 + bh.size * 4
                        + B * N_SPLIT * NHEADS * 4),
    )
    return pl.pallas_call(
        kernel,
        out_shape=jax.ShapeDtypeStruct((B, N_SPLIT, 1, NHEADS), jnp.float32),
        grid=(B, N_SPLIT, n_m),
        in_specs=[
            pl.BlockSpec((1, tm, kp), lambda b, n, m: (b, m, 0)),
            pl.BlockSpec((KPAD, NSTEM), lambda b, n, m: (0, 0)),
            pl.BlockSpec((1, NSTEM), lambda b, n, m: (0, 0)),
            pl.BlockSpec((NSTEM, TN), lambda b, n, m: (0, n)),
            pl.BlockSpec((1, TN), lambda b, n, m: (0, n)),
            pl.BlockSpec((TN, NHEADS), lambda b, n, m: (n, 0)),
        ],
        out_specs=pl.BlockSpec((1, 1, 1, NHEADS), lambda b, n, m: (b, n, 0, 0)),
        scratch_shapes=[pltpu.VMEM((1, TN), jnp.float32)],
        compiler_params=pltpu.CompilerParams(
            dimension_semantics=("parallel", "parallel", "arbitrary"),
            vmem_limit_bytes=VMEM_LIMIT),
        cost_estimate=cost,
    )(patches, ws, bs, wh, bh, fcw)


# ----------------------------------------------------------------------------
# Plain-JAX glue (layout / im2col / parameter setup)
# ----------------------------------------------------------------------------
def _same_pad(size, k, s):
    # TODO(synk): lukemelas EfficientNet uses static same padding which can differ
    # from TF-SAME for even sizes; verify before trusting parity with PyTorch.
    out = -(-size // s)
    pad = max((out - 1) * s + k - size, 0)
    return pad // 2, pad - pad // 2


def _im2col_kpad(x_nhwc, k, stride, kpad):
    """x: (B, H, W, C) bf16 -> (B, Ho, Wo, kpad) patches (TF-SAME padding), with the
    K-dim zero-pad (k*k*C -> kpad) folded into the concatenate."""
    # TODO(synk): move patch formation into the Pallas kernel via halo-row DMA so
    # the k*k-duplicated patch tensor never materializes in HBM at real B5 sizes.
    B, H, W, C = x_nhwc.shape
    ph = _same_pad(H, k, stride)
    pw = _same_pad(W, k, stride)
    xp = jnp.pad(x_nhwc, ((0, 0), ph, pw, (0, 0)))
    Ho = (xp.shape[1] - k) // stride + 1
    Wo = (xp.shape[2] - k) // stride + 1
    slices = [xp[:, i:i + stride * Ho:stride, j:j + stride * Wo:stride, :]
              for i in range(k) for j in range(k)]
    extra = kpad - k * k * C
    if extra > 0:
        slices.append(jnp.zeros((B, Ho, Wo, extra), x_nhwc.dtype))
    patches = jnp.concatenate(slices, axis=-1)              # (B, Ho, Wo, kpad)
    return patches, Ho, Wo


def _pick_tile(hw):
    """Largest of (1024, 512, 256, 128) with <=25% padding waste, else one tile."""
    for tm in (1024, 512, 256, 128):
        hw_pad = -(-hw // tm) * tm
        if hw >= tm and hw_pad - hw <= hw // 4:
            return tm, hw_pad
    tm = max(8, -(-hw // 8) * 8)
    return tm, tm


def init_params(key):
    ks = jax.random.split(key, 10)

    def w(k, shape, scale):
        return (scale * jax.random.normal(k, shape)).astype(jnp.float32)

    # Zero-padded, MXU-aligned weights built once at init time.
    stem_w = jnp.zeros((KPAD, NSTEM), jnp.float32)
    stem_w = stem_w.at[:KPATCH, :STEM_CH].set(w(ks[0], (KPATCH, STEM_CH), 0.1))
    stem_b = jnp.zeros((1, NSTEM), jnp.float32)
    stem_b = stem_b.at[:, :STEM_CH].set(w(ks[1], (1, STEM_CH), 0.05))

    headconv_w = jnp.zeros((NSTEM, IN_FEATURES), jnp.float32)
    headconv_w = headconv_w.at[:STEM_CH, :].set(
        w(ks[2], (STEM_CH, IN_FEATURES), 0.05))
    headconv_b = w(ks[3], (1, IN_FEATURES), 0.05)

    # Three nn.Linear heads concatenated along N and zero-padded to 256 lanes.
    fc_w = jnp.zeros((IN_FEATURES, NHEADS), jnp.float32)
    fc_w = fc_w.at[:, 0:168].set(w(ks[4], (IN_FEATURES, 168), 0.02))
    fc_w = fc_w.at[:, 168:179].set(w(ks[6], (IN_FEATURES, 11), 0.02))
    fc_w = fc_w.at[:, 179:186].set(w(ks[8], (IN_FEATURES, 7), 0.02))
    fc_b = jnp.zeros((1, NHEADS), jnp.float32)
    fc_b = fc_b.at[:, 0:168].set(w(ks[5], (1, 168), 0.02))
    fc_b = fc_b.at[:, 168:179].set(w(ks[7], (1, 11), 0.02))
    fc_b = fc_b.at[:, 179:186].set(w(ks[9], (1, 7), 0.02))

    return {
        "stem_w": stem_w.astype(jnp.bfloat16),        # MXU operands in bf16
        "stem_b": stem_b,                              # biases stay f32
        "headconv_w": headconv_w.astype(jnp.bfloat16),
        "headconv_b": headconv_b,
        "fc_w": fc_w.astype(jnp.bfloat16),
        "fc_b": fc_b,                                  # added outside the kernel
    }


@jax.jit
def efficientnet_b5_forward(params, x_nchw):
    B = x_nchw.shape[0]
    # NCHW -> NHWC, cast to bf16 first so all im2col copies move bf16.
    x = jnp.transpose(x_nchw.astype(jnp.bfloat16), (0, 2, 3, 1))

    # --- backbone.extract_features (representative Pallas path) ---
    patches, Ho, Wo = _im2col_kpad(x, k=3, stride=2, kpad=KPAD)   # stem 3x3 / s2
    hw = Ho * Wo
    patches = patches.reshape(B, hw, KPAD)
    tm, hw_pad = _pick_tile(hw)
    if hw_pad != hw:
        patches = jnp.pad(patches, ((0, 0), (0, hw_pad - hw), (0, 0)))

    # TODO(synk): the 39 MBConv blocks of EfficientNet-B5 would run here.
    # Fused stem + swish + 1x1 conv(->2048) + swish + avg pool + 3 heads:
    parts = backbone_and_heads(
        patches, params["stem_w"], params["stem_b"],
        params["headconv_w"], params["headconv_b"], params["fc_w"],
        hw=hw, tm=tm)                               # (B, N_SPLIT, 1, 256) f32

    # Sum the per-channel-tile partial logits, add the concatenated head biases.
    logits = parts.reshape(B, N_SPLIT, NHEADS).sum(axis=1) + params["fc_b"]
    grapheme = logits[:, 0:168]
    vowel = logits[:, 168:179]
    consonant = logits[:, 179:186]
    return grapheme, vowel, consonant


if __name__ == "__main__":
    key = jax.random.PRNGKey(0)
    pkey, xkey = jax.random.split(key)
    params = init_params(pkey)
    # Small deterministic input consistent with the module's NCHW image input.
    # 48x48 -> 24x24 stem output (576 positions) exercises multi-tile pooling
    # accumulation and the padded/masked last tile.
    x = jax.random.normal(xkey, (2, 3, 48, 48), dtype=jnp.float32)

    grapheme, vowel, consonant = efficientnet_b5_forward(params, x)
    jax.block_until_ready((grapheme, vowel, consonant))

    assert grapheme.shape == (2, 168) and grapheme.dtype == jnp.float32
    assert vowel.shape == (2, 11) and vowel.dtype == jnp.float32
    assert consonant.shape == (2, 7) and consonant.dtype == jnp.float32
    assert bool(jnp.all(jnp.isfinite(grapheme)))
    assert bool(jnp.all(jnp.isfinite(vowel)))
    assert bool(jnp.all(jnp.isfinite(consonant)))
    print("KERNEL_OK")
</pallas_src>

<mosaic_0001>
module attributes {stable_mosaic.version = 11 : i64} {
  func.func @_fused_backbone_heads_kernel(%arg0: i32, %arg1: i32, %arg2: i32, %arg3: memref<1x128x32xbf16, #tpu.memory_space<vmem>>, %arg4: memref<32x128xbf16, #tpu.memory_space<vmem>>, %arg5: memref<1x128xf32, #tpu.memory_space<vmem>>, %arg6: memref<128x1024xbf16, #tpu.memory_space<vmem>>, %arg7: memref<1x1024xf32, #tpu.memory_space<vmem>>, %arg8: memref<1024x256xbf16, #tpu.memory_space<vmem>>, %arg9: memref<1x1x1x256xf32, #tpu.memory_space<vmem>>, %arg10: memref<1x1024xf32, #tpu.memory_space<vmem>>) attributes {dimension_semantics = [#tpu.dimension_semantics<parallel>, #tpu.dimension_semantics<parallel>, #tpu.dimension_semantics<arbitrary>], iteration_bounds = array<i64: 2, 2, 5>, scalar_prefetch = 0 : i64, scratch_operands = 1 : i64, tpu.core_type = #tpu.core_type<tc>, window_params = [{transform_indices = @transform_0, window_bounds = array<i64: 1, 128, 32>}, {pipeline_mode = #tpu.pipeline_mode<synchronous>, transform_indices = @transform_1, window_bounds = array<i64: 32, 128>}, {pipeline_mode = #tpu.pipeline_mode<synchronous>, transform_indices = @transform_2, window_bounds = array<i64: 1, 128>}, {transform_indices = @transform_3, window_bounds = array<i64: 128, 1024>}, {transform_indices = @transform_4, window_bounds = array<i64: 1, 1024>}, {transform_indices = @transform_5, window_bounds = array<i64: 1024, 256>}, {transform_indices = @transform_6, window_bounds = array<i64: 1, 1, 1, 256>}]} {
    %c0_i32 = arith.constant 0 : i32
    %0 = arith.cmpi eq, %arg2, %c0_i32 : i32
    %1 = arith.extui %0 : i1 to i32
    %c0_i32_0 = arith.constant 0 : i32
    %2 = arith.cmpi ne, %1, %c0_i32_0 : i32
    scf.if %2 {
      %cst_20 = arith.constant 0.000000e+00 : f32
      %43 = vector.broadcast %cst_20 : f32 to vector<1x1024xf32>
      %c0_21 = arith.constant 0 : index
      %c0_22 = arith.constant 0 : index
      %44 = vector.load %arg10[%c0_21, %c0_22] : memref<1x1024xf32, #tpu.memory_space<vmem>>, vector<1x1024xf32>
      tpu.vector_store %arg10[%c0_21, %c0_22], %43 {strides = array<i32>} : memref<1x1024xf32, #tpu.memory_space<vmem>>, vector<1x1024xf32>,
    } else {
    }
    %c0 = arith.constant 0 : index
    %c0_1 = arith.constant 0 : index
    %c0_2 = arith.constant 0 : index
    %3 = vector.load %arg3[%c0, %c0_1, %c0_2] : memref<1x128x32xbf16, #tpu.memory_space<vmem>>, vector<1x128x32xbf16>
    %4 = vector.shape_cast %3 : vector<1x128x32xbf16> to vector<128x32xbf16>
    %c0_3 = arith.constant 0 : index
    %c0_4 = arith.constant 0 : index
    %5 = vector.load %arg4[%c0_3, %c0_4] : memref<32x128xbf16, #tpu.memory_space<vmem>>, vector<32x128xbf16>
    %cst = arith.constant dense<0.000000e+00> : vector<128x128xf32>
    %6 = tpu.matmul %4, %5, %cst {dimension_numbers = #tpu.dot_dimension_numbers<[1], [0], [0], [1], [0, 0, 1, 1], [], []>} : vector<128x32xbf16>, vector<32x128xbf16>, vector<128x128xf32> -> vector<128x128xf32>
    %c0_5 = arith.constant 0 : index
    %c0_6 = arith.constant 0 : index
    %7 = vector.load %arg5[%c0_5, %c0_6] : memref<1x128xf32, #tpu.memory_space<vmem>>, vector<1x128xf32>
    %8 = vector.broadcast %7 : vector<1x128xf32> to vector<128x128xf32>
    %9 = arith.addf %6, %8 : vector<128x128xf32>
    %10 = arith.negf %9 : vector<128x128xf32>
    %11 = math.exp %10 : vector<128x128xf32>
    %cst_7 = arith.constant 1.000000e+00 : f32
    %12 = vector.broadcast %cst_7 : f32 to vector<128x128xf32>
    %13 = arith.addf %12, %11 : vector<128x128xf32>
    %14 = arith.divf %12, %13 : vector<128x128xf32>
    %15 = arith.mulf %9, %14 : vector<128x128xf32>
    %16 = arith.truncf %15 : vector<128x128xf32> to vector<128x128xbf16>
    %c0_8 = arith.constant 0 : index
    %c0_9 = arith.constant 0 : index
    %17 = vector.load %arg6[%c0_8, %c0_9] : memref<128x1024xbf16, #tpu.memory_space<vmem>>, vector<128x1024xbf16>
    %cst_10 = arith.constant dense<0.000000e+00> : vector<128x1024xf32>
    %18 = tpu.matmul %16, %17, %cst_10 {dimension_numbers = #tpu.dot_dimension_numbers<[1], [0], [0], [1], [0, 0, 1, 1], [], []>} : vector<128x128xbf16>, vector<128x1024xbf16>, vector<128x1024xf32> -> vector<128x1024xf32>
    %c0_11 = arith.constant 0 : index
    %c0_12 = arith.constant 0 : index
    %19 = vector.load %arg7[%c0_11, %c0_12] : memref<1x1024xf32, #tpu.memory_space<vmem>>, vector<1x1024xf32>
    %20 = vector.broadcast %19 : vector<1x1024xf32> to vector<128x1024xf32>
    %21 = arith.addf %18, %20 : vector<128x1024xf32>
    %22 = arith.negf %21 : vector<128x1024xf32>
    %23 = math.exp %22 : vector<128x1024xf32>
    %cst_13 = arith.constant 1.000000e+00 : f32
    %24 = vector.broadcast %cst_13 : f32 to vector<128x1024xf32>
    %25 = arith.addf %24, %23 : vector<128x1024xf32>
    %26 = arith.divf %24, %25 : vector<128x1024xf32>
    %27 = arith.mulf %21, %26 : vector<128x1024xf32>
    %c128_i32 = arith.constant 128 : i32
    %28 = arith.muli %arg2, %c128_i32 : i32
    %29 = tpu.iota {dimensions = array<i32: 1>} : vector<1x128xi32>
    %30 = vector.broadcast %28 : i32 to vector<1x128xi32>
    %31 = arith.addi %30, %29 : vector<1x128xi32>
    %c576_i32 = arith.constant 576 : i32
    %32 = vector.broadcast %c576_i32 : i32 to vector<1x128xi32>
    %33 = arith.cmpi slt, %31, %32 : vector<1x128xi32>
    %34 = arith.extui %33 : vector<1x128xi1> to vector<1x128xi32>
    %35 = arith.sitofp %34 : vector<1x128xi32> to vector<1x128xf32>
    %c0_14 = arith.constant 0 : index
    %c0_15 = arith.constant 0 : index
    %36 = vector.load %arg10[%c0_14, %c0_15] : memref<1x1024xf32, #tpu.memory_space<vmem>>, vector<1x1024xf32>
    %cst_16 = arith.constant dense<0.000000e+00> : vector<1x1024xf32>
    %37 = tpu.matmul %35, %27, %cst_16 {dimension_numbers = #tpu.dot_dimension_numbers<[1], [0], [0], [1], [0, 0, 1, 1], [], []>} : vector<1x128xf32>, vector<128x1024xf32>, vector<1x1024xf32> -> vector<1x1024xf32>
    %38 = arith.addf %36, %37 : vector<1x1024xf32>
    %c0_17 = arith.constant 0 : index
    %c0_18 = arith.constant 0 : index
    %39 = vector.load %arg10[%c0_17, %c0_18] : memref<1x1024xf32, #tpu.memory_space<vmem>>, vector<1x1024xf32>
    tpu.vector_store %arg10[%c0_17, %c0_18], %38 {strides = array<i32>} : memref<1x1024xf32, #tpu.memory_space<vmem>>, vector<1x1024xf32>,
    %c4_i32 = arith.constant 4 : i32
    %40 = arith.cmpi eq, %arg2, %c4_i32 : i32
    %41 = arith.extui %40 : i1 to i32
    %c0_i32_19 = arith.constant 0 : i32
    %42 = arith.cmpi ne, %41, %c0_i32_19 : i32
    scf.if %42 {
      %c0_20 = arith.constant 0 : index
      %c0_21 = arith.constant 0 : index
      %43 = vector.load %arg10[%c0_20, %c0_21] : memref<1x1024xf32, #tpu.memory_space<vmem>>, vector<1x1024xf32>
      %cst_22 = arith.constant 0.00173611112 : f32
      %44 = vector.broadcast %cst_22 : f32 to vector<1x1024xf32>
      %45 = arith.mulf %43, %44 : vector<1x1024xf32>
      %46 = arith.truncf %45 : vector<1x1024xf32> to vector<1x1024xbf16>
      %c0_23 = arith.constant 0 : index
      %c0_24 = arith.constant 0 : index
      %47 = vector.load %arg8[%c0_23, %c0_24] : memref<1024x256xbf16, #tpu.memory_space<vmem>>, vector<1024x256xbf16>
      %cst_25 = arith.constant dense<0.000000e+00> : vector<1x256xf32>
      %48 = tpu.matmul %46, %47, %cst_25 {dimension_numbers = #tpu.dot_dimension_numbers<[1], [0], [0], [1], [0, 0, 1, 1], [], []>} : vector<1x1024xbf16>, vector<1024x256xbf16>, vector<1x256xf32> -> vector<1x256xf32>
      %49 = vector.shape_cast %48 : vector<1x256xf32> to vector<1x1x1x256xf32>
      %c0_26 = arith.constant 0 : index
      %c0_27 = arith.constant 0 : index
      %c0_28 = arith.constant 0 : index
      %c0_29 = arith.constant 0 : index
      %50 = vector.load %arg9[%c0_26, %c0_27, %c0_28, %c0_29] : memref<1x1x1x256xf32, #tpu.memory_space<vmem>>, vector<1x1x1x256xf32>
      tpu.vector_store %arg9[%c0_26, %c0_27, %c0_28, %c0_29], %49 {strides = array<i32>} : memref<1x1x1x256xf32, #tpu.memory_space<vmem>>, vector<1x1x1x256xf32>,
    } else {
    }
    return
  }
  func.func @transform_0(%arg0: i32, %arg1: i32, %arg2: i32) -> (i32, i32, i32) {
    %c0_i32 = arith.constant 0 : i32
    %c0_i32_0 = arith.constant 0 : i32
    return %arg0, %arg2, %c0_i32 : i32, i32, i32
  }
  func.func @transform_1(%arg0: i32, %arg1: i32, %arg2: i32) -> (i32, i32) {
    %c0_i32 = arith.constant 0 : i32
    %c0_i32_0 = arith.constant 0 : i32
    %c0_i32_1 = arith.constant 0 : i32
    return %c0_i32, %c0_i32_0 : i32, i32
  }
  func.func @transform_2(%arg0: i32, %arg1: i32, %arg2: i32) -> (i32, i32) {
    %c0_i32 = arith.constant 0 : i32
    %c0_i32_0 = arith.constant 0 : i32
    %c0_i32_1 = arith.constant 0 : i32
    return %c0_i32, %c0_i32_0 : i32, i32
  }
  func.func @transform_3(%arg0: i32, %arg1: i32, %arg2: i32) -> (i32, i32) {
    %c0_i32 = arith.constant 0 : i32
    %c0_i32_0 = arith.constant 0 : i32
    return %c0_i32, %arg1 : i32, i32
  }
  func.func @transform_4(%arg0: i32, %arg1: i32, %arg2: i32) -> (i32, i32) {
    %c0_i32 = arith.constant 0 : i32
    %c0_i32_0 = arith.constant 0 : i32
    return %c0_i32, %arg1 : i32, i32
  }
  func.func @transform_5(%arg0: i32, %arg1: i32, %arg2: i32) -> (i32, i32) {
    %c0_i32 = arith.constant 0 : i32
    %c0_i32_0 = arith.constant 0 : i32
    return %arg1, %c0_i32 : i32, i32
  }
  func.func @transform_6(%arg0: i32, %arg1: i32, %arg2: i32) -> (i32, i32, i32, i32) {
    %c0_i32 = arith.constant 0 : i32
    %c0_i32_0 = arith.constant 0 : i32
    %c0_i32_1 = arith.constant 0 : i32
    return %arg0, %arg1, %c0_i32, %c0_i32_0 : i32, i32, i32, i32
  }
}

</mosaic_0001>

<bundles_post_ra>
// kernel: efficientnet_b5_forward.1
= control target key start
LH: loop header
LB: loop body
LE: loop exit
PB: predicated region body
PF: predicated region fallthrough
CT: control target
= control target key end

     0   :  { %s7498_s0 = inlined_call_operand.vmem [shape: bf16[2,640,32], index: 0, kind: input, shape index: {}]   ;;  %s7499_s1 = inlined_call_operand.vmem [shape: bf16[32,128], index: 1, kind: input, shape index: {}]   ;;  %s7500_s2 = inlined_call_operand.vmem [shape: f32[1,128], index: 2, kind: input, shape index: {}]   ;;  %s7501_s3 = inlined_call_operand.vmem [shape: bf16[128,2048], index: 3, kind: input, shape index: {}]   ;;  %s7502_s4 = inlined_call_operand.vmem [shape: f32[1,2048], index: 4, kind: input, shape index: {}]   ;;  %s7503_s5 = inlined_call_operand.vmem [shape: bf16[2048,256], index: 5, kind: input, shape index: {}]   ;;  %s7504_s6 = inlined_call_operand.vmem [shape: f32[2,2,1,256], index: 6, kind: output, shape index: {}]  }
   0x1   :  { %7611 = sst [smem:[#allocation91_spill]] %s7498_s0 }
   0x2   :  { %7612 = sst [smem:[#allocation92_spill]] %s7501_s3 }
   0x3   :  { %s5483_s21 = smov 0   ;;  %s5485_s22 = smov 0  }
   0x4   :  { %s5487_s23 = smov 0   ;;  %s5489_s24 = smov 0  }
   0x5   :  { %s5491_s25 = smov 0   ;;  %s5493_s26 = smov 0  }
   0x6   :  { %s5495_s27 = smov 0   ;;  %s5497_s28 = smov 0  }
   0x7   :  { %s5499_s29 = smov 0  }
   0x8 LB: > { %7613 = sst [smem:[#allocation4_spill]] %s5437_s28  ;;  %s28_s30 = sadd.s32 1, %s5429_s26  ;;  %s5441_s29 = sphi %s5499_s29, %s16_s29   ;;  %s5437_s28 = sphi %s5497_s28, %s7937_s28   ;;  %s5433_s27 = sphi %s5495_s27, %s7943_s27   ;;  %s5429_s26 = sphi %s5493_s26, %s7942_s26   ;;  %s5425_s25 = sphi %s5491_s25, %s7934_s25   ;;  %s5421_s24 = sphi %s5489_s24, %s7941_s24   ;;  %s5417_s23 = sphi %s5487_s23, %s7940_s23   ;;  %s5413_s22 = sphi %s5485_s22, %s7939_s22   ;;  %s5409_s21 = sphi %s5483_s21, %s7938_s21  }
   0x9   : > { %p29_p0 = scmp.ge.s32.totalorder %s28_s30, 5  ;;  %s31_s7 = sadd.s32 1, %s5433_s27 }
   0xa   : > { %p119_p1 = scmp.ne.s32.totalorder %s5413_s22, %s5409_s21  ;;  %p120_p2 = scmp.eq.s32.totalorder %s5441_s29, 0 }
   0xb   : > { %s7945_s30 = smov (%p29_p0, %s28_s30), 0  ;;  %s7947_s7 = smov (!%p29_p0, %s31_s7), %s5433_s27 }
   0xc   : > { %7614 = sst [smem:[#allocation5_spill]] %s7945_s30  ;;  %p33_p3 = scmp.ge.s32.totalorder %s7947_s7, 2 }
   0xd   : > { %s35_s8 = sadd.s32 1, %s5437_s28  ;;  %p121_p4 = por %p120_p2, %p119_p1 }
   0xe   : > { %s7949_s7 = smov (%p33_p3, %s7947_s7), 0  ;;  %s7951_s8 = smov (!%p33_p3, %s35_s8), %s5437_s28 }
   0xf   : > { %7615 = sst [smem:[#allocation6_spill]] %s7949_s7  ;;  %s109_s9 = ssub.s32 %s5433_s27, %s7949_s7 }
  0x10   : > { %s112_s10 = sadd.s32 1, %s5413_s22  ;;  %p37_p5 = scmp.ge.s32.totalorder %s7951_s8, 2 }
  0x11   : > { %p110_p6 = scmp.eq.s32.totalorder %s109_s9, 0  ;;  %p4104_p7 = scmp.ge.s32.totalorder %s5441_s29, 20 }
  0x12   : > { %s7953_s8 = smov (%p37_p5, %s7951_s8), 0 }
  0x13   : > { %7616 = sst [smem:[#allocation7_spill]] %s7953_s8  ;;  %231 = sbr.rel (%p4104_p7) target bundleno = 66 (0x42), region = 24 }
  0x14   : > { %s5546_s11 = scalar_select %p110_p6, %s5413_s22, %s112_s10  }
  0x18   : > { %247 = sbr.rel (!%p121_p4) target bundleno = 66 (0x42), region = 32  ;;  %s249_s12 = sand.u32 (%p121_p4), 1, %s5413_s22  }
  0x19   : > { %s4483_s13 = sshll.u32 (%p121_p4), %s5433_s27, 5  ;;  %s4105_s14 = sshll.u32 (%p121_p4), %s249_s12, 9 }
  0x1a   : > { %s7617_s3 = sld [smem:[#allocation92_spill]] (%p121_p4)  ;;  %s5559_s18 = scalar_lea.vmem (%p121_p4), [#allocation3], %s4105_s14 }
  0x20   : > { %s5554_s17 = scalar_lea.vmem %s7617_s3, %s4483_s13 }
  0x21   : > { %v267_v0 = vld [vmem:[%s5554_s17] sm:$0xff]  ;;  %v269_v1 = vld [vmem:[%s5554_s17 + $0x8] sm:$0xff]  ;;  %v271_v2 = vld [vmem:[%s5554_s17 + $0x10] sm:$0xff] }
  0x22   : > { %268 = vst [vmem:[%s5559_s18] sm:$0xff] %v267_v0  ;;  %270 = vst [vmem:[%s5559_s18 + $0x8] sm:$0xff] %v269_v1  ;;  %v273_v3 = vld [vmem:[%s5554_s17 + $0x18] sm:$0xff]  ;;  %v275_v4 = vld [vmem:[%s5554_s17 + $0x40] sm:$0xff] }
  0x23   : > { %272 = vst [vmem:[%s5559_s18 + $0x10] sm:$0xff] %v271_v2  ;;  %v277_v5 = vld [vmem:[%s5554_s17 + $0x48] sm:$0xff]  ;;  %274 = vst [vmem:[%s5559_s18 + $0x18] sm:$0xff] %v273_v3  ;;  %v279_v6 = vld [vmem:[%s5554_s17 + $0x50] sm:$0xff] }
  0x24   : > { %276 = vst [vmem:[%s5559_s18 + $0x20] sm:$0xff] %v275_v4  ;;  %278 = vst [vmem:[%s5559_s18 + $0x28] sm:$0xff] %v277_v5  ;;  %v281_v7 = vld [vmem:[%s5554_s17 + $0x58] sm:$0xff]  ;;  %v283_v8 = vld [vmem:[%s5554_s17 + $0x80] sm:$0xff] }
  0x25   : > { %280 = vst [vmem:[%s5559_s18 + $0x30] sm:$0xff] %v279_v6  ;;  %282 = vst [vmem:[%s5559_s18 + $0x38] sm:$0xff] %v281_v7  ;;  %v285_v9 = vld [vmem:[%s5554_s17 + $0x88] sm:$0xff]  ;;  %v287_v10 = vld [vmem:[%s5554_s17 + $0x90] sm:$0xff] }
  0x26   : > { %284 = vst [vmem:[%s5559_s18 + $0x40] sm:$0xff] %v283_v8  ;;  %v289_v11 = vld [vmem:[%s5554_s17 + $0x98] sm:$0xff]  ;;  %286 = vst [vmem:[%s5559_s18 + $0x48] sm:$0xff] %v285_v9  ;;  %v291_v12 = vld [vmem:[%s5554_s17 + $0xc0] sm:$0xff] }
  0x27   : > { %288 = vst [vmem:[%s5559_s18 + $0x50] sm:$0xff] %v287_v10  ;;  %290 = vst [vmem:[%s5559_s18 + $0x58] sm:$0xff] %v289_v11  ;;  %v293_v13 = vld [vmem:[%s5554_s17 + $0xc8] sm:$0xff]  ;;  %v295_v14 = vld [vmem:[%s5554_s17 + $0xd0] sm:$0xff] }
  0x28   : > { %292 = vst [vmem:[%s5559_s18 + $0x60] sm:$0xff] %v291_v12  ;;  %294 = vst [vmem:[%s5559_s18 + $0x68] sm:$0xff] %v293_v13  ;;  %v297_v15 = vld [vmem:[%s5554_s17 + $0xd8] sm:$0xff]  ;;  %v299_v16 = vld [vmem:[%s5554_s17 + $0x100] sm:$0xff] }
  0x29   : > { %296 = vst [vmem:[%s5559_s18 + $0x70] sm:$0xff] %v295_v14  ;;  %v301_v17 = vld [vmem:[%s5554_s17 + $0x108] sm:$0xff]  ;;  %298 = vst [vmem:[%s5559_s18 + $0x78] sm:$0xff] %v297_v15  ;;  %v303_v18 = vld [vmem:[%s5554_s17 + $0x110] sm:$0xff] }
  0x2a   : > { %300 = vst [vmem:[%s5559_s18 + $0x80] sm:$0xff] %v299_v16  ;;  %302 = vst [vmem:[%s5559_s18 + $0x88] sm:$0xff] %v301_v17  ;;  %v305_v19 = vld [vmem:[%s5554_s17 + $0x118] sm:$0xff]  ;;  %v307_v20 = vld [vmem:[%s5554_s17 + $0x140] sm:$0xff] }
  0x2b   : > { %304 = vst [vmem:[%s5559_s18 + $0x90] sm:$0xff] %v303_v18  ;;  %306 = vst [vmem:[%s5559_s18 + $0x98] sm:$0xff] %v305_v19  ;;  %v309_v21 = vld [vmem:[%s5554_s17 + $0x148] sm:$0xff]  ;;  %v311_v22 = vld [vmem:[%s5554_s17 + $0x150] sm:$0xff] }
  0x2c   : > { %308 = vst [vmem:[%s5559_s18 + $0xa0] sm:$0xff] %v307_v20  ;;  %v313_v23 = vld [vmem:[%s5554_s17 + $0x158] sm:$0xff]  ;;  %310 = vst [vmem:[%s5559_s18 + $0xa8] sm:$0xff] %v309_v21  ;;  %v315_v24 = vld [vmem:[%s5554_s17 + $0x180] sm:$0xff] }
  0x2d   : > { %312 = vst [vmem:[%s5559_s18 + $0xb0] sm:$0xff] %v311_v22  ;;  %314 = vst [vmem:[%s5559_s18 + $0xb8] sm:$0xff] %v313_v23  ;;  %v317_v25 = vld [vmem:[%s5554_s17 + $0x188] sm:$0xff]  ;;  %v319_v26 = vld [vmem:[%s5554_s17 + $0x190] sm:$0xff] }
  0x2e   : > { %316 = vst [vmem:[%s5559_s18 + $0xc0] sm:$0xff] %v315_v24  ;;  %318 = vst [vmem:[%s5559_s18 + $0xc8] sm:$0xff] %v317_v25  ;;  %v321_v27 = vld [vmem:[%s5554_s17 + $0x198] sm:$0xff]  ;;  %v323_v28 = vld [vmem:[%s5554_s17 + $0x1c0] sm:$0xff] }
  0x2f   : > { %320 = vst [vmem:[%s5559_s18 + $0xd0] sm:$0xff] %v319_v26  ;;  %v325_v29 = vld [vmem:[%s5554_s17 + $0x1c8] sm:$0xff]  ;;  %322 = vst [vmem:[%s5559_s18 + $0xd8] sm:$0xff] %v321_v27  ;;  %v327_v30 = vld [vmem:[%s5554_s17 + $0x1d0] sm:$0xff] }
  0x30   : > { %324 = vst [vmem:[%s5559_s18 + $0xe0] sm:$0xff] %v323_v28  ;;  %326 = vst [vmem:[%s5559_s18 + $0xe8] sm:$0xff] %v325_v29  ;;  %v329_v31 = vld [vmem:[%s5554_s17 + $0x1d8] sm:$0xff]  ;;  %v331_v32 = vld [vmem:[%s5554_s17 + $0x200] sm:$0xff] }
  0x31   : > { %328 = vst [vmem:[%s5559_s18 + $0xf0] sm:$0xff] %v327_v30  ;;  %330 = vst [vmem:[%s5559_s18 + $0xf8] sm:$0xff] %v329_v31  ;;  %v333_v33 = vld [vmem:[%s5554_s17 + $0x208] sm:$0xff]  ;;  %v335_v34 = vld [vmem:[%s5554_s17 + $0x210] sm:$0xff] }
  0x32   : > { %332 = vst [vmem:[%s5559_s18 + $0x100] sm:$0xff] %v331_v32  ;;  %v337_v35 = vld [vmem:[%s5554_s17 + $0x218] sm:$0xff]  ;;  %334 = vst [vmem:[%s5559_s18 + $0x108] sm:$0xff] %v333_v33  ;;  %v339_v36 = vld [vmem:[%s5554_s17 + $0x240] sm:$0xff] }
  0x33   : > { %336 = vst [vmem:[%s5559_s18 + $0x110] sm:$0xff] %v335_v34  ;;  %338 = vst [vmem:[%s5559_s18 + $0x118] sm:$0xff] %v337_v35  ;;  %v341_v37 = vld [vmem:[%s5554_s17 + $0x248] sm:$0xff]  ;;  %v343_v38 = vld [vmem:[%s5554_s17 + $0x250] sm:$0xff] }
  0x34   : > { %340 = vst [vmem:[%s5559_s18 + $0x120] sm:$0xff] %v339_v36  ;;  %342 = vst [vmem:[%s5559_s18 + $0x128] sm:$0xff] %v341_v37  ;;  %v345_v39 = vld [vmem:[%s5554_s17 + $0x258] sm:$0xff]  ;;  %v347_v40 = vld [vmem:[%s5554_s17 + $0x280] sm:$0xff] }
  0x35   : > { %344 = vst [vmem:[%s5559_s18 + $0x130] sm:$0xff] %v343_v38  ;;  %v349_v41 = vld [vmem:[%s5554_s17 + $0x288] sm:$0xff]  ;;  %346 = vst [vmem:[%s5559_s18 + $0x138] sm:$0xff] %v345_v39  ;;  %v351_v42 = vld [vmem:[%s5554_s17 + $0x290] sm:$0xff] }
  0x36   : > { %348 = vst [vmem:[%s5559_s18 + $0x140] sm:$0xff] %v347_v40  ;;  %350 = vst [vmem:[%s5559_s18 + $0x148] sm:$0xff] %v349_v41  ;;  %v353_v43 = vld [vmem:[%s5554_s17 + $0x298] sm:$0xff]  ;;  %v355_v44 = vld [vmem:[%s5554_s17 + $0x2c0] sm:$0xff] }
  0x37   : > { %352 = vst [vmem:[%s5559_s18 + $0x150] sm:$0xff] %v351_v42  ;;  %354 = vst [vmem:[%s5559_s18 + $0x158] sm:$0xff] %v353_v43  ;;  %v357_v45 = vld [vmem:[%s5554_s17 + $0x2c8] sm:$0xff]  ;;  %v359_v46 = vld [vmem:[%s5554_s17 + $0x2d0] sm:$0xff] }
  0x38   : > { %356 = vst [vmem:[%s5559_s18 + $0x160] sm:$0xff] %v355_v44  ;;  %v361_v47 = vld [vmem:[%s5554_s17 + $0x2d8] sm:$0xff]  ;;  %358 = vst [vmem:[%s5559_s18 + $0x168] sm:$0xff] %v357_v45  ;;  %v363_v48 = vld [vmem:[%s5554_s17 + $0x300] sm:$0xff] }
  0x39   : > { %360 = vst [vmem:[%s5559_s18 + $0x170] sm:$0xff] %v359_v46  ;;  %362 = vst [vmem:[%s5559_s18 + $0x178] sm:$0xff] %v361_v47  ;;  %v365_v49 = vld [vmem:[%s5554_s17 + $0x308] sm:$0xff]  ;;  %v367_v50 = vld [vmem:[%s5554_s17 + $0x310] sm:$0xff] }
  0x3a   : > { %364 = vst [vmem:[%s5559_s18 + $0x180] sm:$0xff] %v363_v48  ;;  %366 = vst [vmem:[%s5559_s18 + $0x188] sm:$0xff] %v365_v49  ;;  %v369_v51 = vld [vmem:[%s5554_s17 + $0x318] sm:$0xff]  ;;  %v371_v52 = vld [vmem:[%s5554_s17 + $0x340] sm:$0xff] }
  0x3b   : > { %368 = vst [vmem:[%s5559_s18 + $0x190] sm:$0xff] %v367_v50  ;;  %v373_v53 = vld [vmem:[%s5554_s17 + $0x348] sm:$0xff]  ;;  %370 = vst [vmem:[%s5559_s18 + $0x198] sm:$0xff] %v369_v51  ;;  %v375_v54 = vld [vmem:[%s5554_s17 + $0x350] sm:$0xff] }
  0x3c   : > { %372 = vst [vmem:[%s5559_s18 + $0x1a0] sm:$0xff] %v371_v52  ;;  %374 = vst [vmem:[%s5559_s18 + $0x1a8] sm:$0xff] %v373_v53  ;;  %v377_v55 = vld [vmem:[%s5554_s17 + $0x358] sm:$0xff]  ;;  %v379_v56 = vld [vmem:[%s5554_s17 + $0x380] sm:$0xff] }
  0x3d   : > { %376 = vst [vmem:[%s5559_s18 + $0x1b0] sm:$0xff] %v375_v54  ;;  %378 = vst [vmem:[%s5559_s18 + $0x1b8] sm:$0xff] %v377_v55  ;;  %v381_v57 = vld [vmem:[%s5554_s17 + $0x388] sm:$0xff]  ;;  %v383_v58 = vld [vmem:[%s5554_s17 + $0x390] sm:$0xff] }
  0x3e   : > { %380 = vst [vmem:[%s5559_s18 + $0x1c0] sm:$0xff] %v379_v56  ;;  %v385_v59 = vld [vmem:[%s5554_s17 + $0x398] sm:$0xff]  ;;  %382 = vst [vmem:[%s5559_s18 + $0x1c8] sm:$0xff] %v381_v57  ;;  %v387_v60 = vld [vmem:[%s5554_s17 + $0x3c0] sm:$0xff] }
  0x3f   : > { %384 = vst [vmem:[%s5559_s18 + $0x1d0] sm:$0xff] %v383_v58  ;;  %386 = vst [vmem:[%s5559_s18 + $0x1d8] sm:$0xff] %v385_v59  ;;  %v389_v61 = vld [vmem:[%s5554_s17 + $0x3c8] sm:$0xff]  ;;  %v391_v62 = vld [vmem:[%s5554_s17 + $0x3d0] sm:$0xff] }
  0x40   : > { %388 = vst [vmem:[%s5559_s18 + $0x1e0] sm:$0xff] %v387_v60  ;;  %390 = vst [vmem:[%s5559_s18 + $0x1e8] sm:$0xff] %v389_v61  ;;  %v393_v63 = vld [vmem:[%s5554_s17 + $0x3d8] sm:$0xff] }
  0x41   : > { %392 = vst [vmem:[%s5559_s18 + $0x1f0] sm:$0xff] %v391_v62  ;;  %394 = vst [vmem:[%s5559_s18 + $0x1f8] sm:$0xff] %v393_v63 }
  0x42 PF: > { %p4108_p8 = scmp.ge.s32.totalorder %s5441_s29, 1  ;;  %p417_p9 = scmp.lt.s32.totalorder %s5441_s29, 21 }
  0x44   : > { %p418_p10 = pnand %p4108_p8, %p417_p9 }
  0x46   : > { %421 = sbr.rel (%p418_p10) target bundleno = 1371 (0x55b), region = 63 }
  0x4b   : > { %s424_s19 = sand.u32 1, %s5409_s21   ;;  %s4110_s20 = sshll.u32 %s5417_s23, 4 }
  0x4c   : > { %s4109_s9 = sshll.u32 %s424_s19, 9  ;;  %p476_p11 = scmp.lt.s32.totalorder %s5425_s25, 1 }
  0x4d   : > { %p478_p12 = scmp.lt.s32.totalorder %s4110_s20, 79  ;;  %s4112_s12 = sshll.u32 %s5421_s24, 3 }
  0x4e   : > { %s7955_s25 = smov (!%p476_p11, %s5425_s25), 1  ;;  %p487_p13 = scmp.lt.s32.totalorder %s4112_s12, 15 }
  0x4f   : > { %s7957_s20 = smov (!%p478_p12, %s4110_s20), 79  ;;  %s4515_s10 = smul.u32 80, %s7955_s25 }
  0x50   : > { %s4113_s13 = sshll.u32 %s5421_s24, 7  ;;  %s7618_s0 = sld [smem:[#allocation91_spill]] }
  0x51   : > { %s481_s14 = sadd.s32 %s4515_s10, %s7957_s20  ;;  %p492_p0 = scmp.lt.s32.totalorder %s4113_s13, 255 }
  0x52   : > { %s4111_s15 = sshll.u32 %s481_s14, 2  ;;  %p500_p1 = scmp.lt.s32.totalorder %s5421_s24, 1 }
  0x53   : > { %s7959_s12 = smov (!%p487_p13, %s4112_s12), 15  ;;  %s7961_s13 = smov (!%p492_p0, %s4113_s13), 255 }
  0x54   : > { %s489_s3 = scalar_lea.vmem %s7502_s4, %s7959_s12  ;;  %s4484_s8 = sshll.u32 %s7961_s13, 3 }
  0x55   : > { %s5709_s20 = scalar_lea.vmem %s7503_s5, %s4484_s8  ;;  %s4117_s10 = sshll.u32 %s7955_s25, 2 }
  0x56   : > { %s5697_s18 = scalar_lea.vmem %s7618_s0, %s4111_s15  ;;  %s7963_s24 = smov (!%p500_p1, %s5421_s24), 1 }
  0x57   : > { %s4116_s14 = sshll.u32 %s7963_s24, 1  ;;  %s5718_s28 = scalar_lea.vmem [#allocation3], %s4109_s9 }
  0x58   : > { %s5712_s15 = sadd.s32 %s4117_s10, %s4116_s14  ;;  %p4118_p2 = scmp.ne.s32.totalorder %s5417_s23, 0 }
  0x59   : > { %s505_s0 = scalar_lea.vmem %s7504_s6, %s5712_s15 }
  0x5a   : > { %510 = sbr.rel (%p4118_p2) target bundleno = 97 (0x61), region = 71 }
  0x5f   : > { %v5443_v0 = vmov 0.0  }
  0x60   : > { %511 = vst [vmem:[#allocation2] sm:$0xff] %v5443_v0 }
  0x61 PF: > { %v4593_v1 = vld [vmem:[%s7499_s1 + $0x8] sm:$0xff]   ;;  %v4594_v2 = vld [vmem:[%s7499_s1] sm:$0xff]   ;;  %vm591_vm0 = vcmask 261120   ;;  %v4597_v5 = vld [vmem:[%s5697_s18 + $0x10] sm:$0xff]   ;;  %p4352_p3 = scmp.ne.s32.totalorder %s5417_s23, 4 }
  0x62   : > { %4495 = vmatprep.subr.bf16.mxu0 %v4593_v1  ;;  %v4595_v3 = vld [vmem:[%s5697_s18] sm:$0xff]   ;;  %v4596_v4 = vld [vmem:[%s5697_s18 + $0x8] sm:$0xff]   ;;  %v4598_v6 = vld [vmem:[%s5697_s18 + $0x18] sm:$0xff]  }
  0x63   : > { %4496 = vmatpush3.bf16.msra.mxu0 %v4593_v1  ;;  %4499 = vmatprep.mubr.msk.bf16.mxu0 %vm591_vm0, %v4595_v3  ;;  %v4599_v7 = vld [vmem:[%s5697_s18 + $0x20] sm:$0xff]   ;;  %v4600_v8 = vld [vmem:[%s5697_s18 + $0x28] sm:$0xff]   ;;  %v4601_v9 = vld [vmem:[%s5697_s18 + $0x30] sm:$0xff]  }
  0x64   : > { %4497 = vmatprep.subr.bf16.mxu0 %v4594_v2  ;;  %v4602_v10 = vld [vmem:[%s5697_s18 + $0x38] sm:$0xff]   ;;  %v889_v11 = vld [vmem:[%s5718_s28 + $0x1c0] sm:$0xff]  ;;  %v890_v13 = vld [vmem:[%s5718_s28 + $0x1c8] sm:$0xff] }
  0x65   : > { %v893_v12 = vld [vmem:[%s5718_s28 + $0x1e0] sm:$0xff]  ;;  %v894_v15 = vld [vmem:[%s5718_s28 + $0x1e8] sm:$0xff] }
  0x66   : > { %v4211_v14 = vcombine.high %v889_v11, %v893_v12  ;;  %v4212_v16 = vcombine.low %v890_v13, %v894_v15  ;;  %v4213_v17 = vcombine.high %v890_v13, %v894_v15  ;;  %v4210_v18 = vcombine.low %v889_v11, %v893_v12  ;;  %v881_v19 = vld [vmem:[%s5718_s28 + $0x180] sm:$0xff]  ;;  %v882_v21 = vld [vmem:[%s5718_s28 + $0x188] sm:$0xff]  ;;  %v5778_v12 = vld [vmem:[%s5718_s28 + $0x1d0] sm:$0xff] }
  0x67   : > { %4498 = vmatpush3.bf16.msra.mxu0 %v4594_v2  ;;  %v885_v20 = vld [vmem:[%s5718_s28 + $0x1a0] sm:$0xff]  ;;  %v886_v23 = vld [vmem:[%s5718_s28 + $0x1a8] sm:$0xff]  ;;  %v5444_v11 = vmov 0   ;;  %v5781_v13 = vld [vmem:[%s5718_s28 + $0x1f0] sm:$0xff] }
  0x68   : > { %1259 = vmatprep.subr.bf16.mxu1 %v4211_v14  ;;  %1372 = vmatprep.subr.bf16.mxu0 %v4213_v17  ;;  %v4203_v22 = vcombine.high %v881_v19, %v885_v20  ;;  %v4204_v24 = vcombine.low %v882_v21, %v886_v23  ;;  %v4205_v25 = vcombine.high %v882_v21, %v886_v23  ;;  %v873_v27 = vld [vmem:[%s5718_s28 + $0x140] sm:$0xff]  ;;  %v874_v29 = vld [vmem:[%s5718_s28 + $0x148] sm:$0xff]  ;;  %v5784_v14 = vld [vmem:[%s5718_s28 + $0x1d8] sm:$0xff] }
  0x69   : > { %1260 = vmatpush1.bf16.msra.mxu1 %v4210_v18  ;;  %v4202_v26 = vcombine.low %v881_v19, %v885_v20  ;;  %v877_v28 = vld [vmem:[%s5718_s28 + $0x160] sm:$0xff]  ;;  %v878_v31 = vld [vmem:[%s5718_s28 + $0x168] sm:$0xff]  ;;  %1291 = vmatprep.mubr.bf16.mxu1 %v5444_v11  ;;  %v4214_v15 = vcombine.low %v5778_v12, %v5781_v13  ;;  %v5791_v17 = vld [vmem:[%s5718_s28 + $0x1f8] sm:$0xff] }
  0x6a   : > { %4500 = vmatmul.mubr.msk.bf16.vlgmr.msra.gmra.mxu0 %vm591_vm0, %v4596_v4  ;;  %1261 = vmatprep.subr.bf16.mxu1 %v4203_v22  ;;  %v4195_v30 = vcombine.high %v873_v27, %v877_v28  ;;  %v4196_v32 = vcombine.low %v874_v29, %v878_v31  ;;  %v4197_v33 = vcombine.high %v874_v29, %v878_v31  ;;  %v865_v35 = vld [vmem:[%s5718_s28 + $0x100] sm:$0xff]  ;;  %v866_v37 = vld [vmem:[%s5718_s28 + $0x108] sm:$0xff]  ;;  %v5800_v21 = vld [vmem:[%s7500_s2] ss:$0 sm:$0xff] }
  0x6b   : > { %4503 = vmatprep.mubr.msk.bf16.mxu0 %vm591_vm0, %v4597_v5  ;;  %1373 = vmatpush1.bf16.msra.mxu0 %v4212_v16  ;;  %v4194_v34 = vcombine.low %v873_v27, %v877_v28  ;;  %v869_v36 = vld [vmem:[%s5718_s28 + $0x120] sm:$0xff]  ;;  %v870_v39 = vld [vmem:[%s5718_s28 + $0x128] sm:$0xff]  ;;  %v4215_v16 = vcombine.high %v5778_v12, %v5781_v13  ;;  %v4216_v18 = vcombine.low %v5784_v14, %v5791_v17 }
  0x6c   : > { %1374 = vmatprep.subr.bf16.mxu0 %v4205_v25  ;;  %v4187_v38 = vcombine.high %v865_v35, %v869_v36  ;;  %v4188_v40 = vcombine.low %v866_v37, %v870_v39  ;;  %v4189_v41 = vcombine.high %v866_v37, %v870_v39  ;;  %v4186_v42 = vcombine.low %v865_v35, %v869_v36  ;;  %v857_v43 = vld [vmem:[%s5718_s28 + $0xc0] sm:$0xff]  ;;  %v858_v45 = vld [vmem:[%s5718_s28 + $0xc8] sm:$0xff] }
  0x6d   : > { %1262 = vmatpush1.bf16.msra.mxu1 %v4202_v26  ;;  %v861_v44 = vld [vmem:[%s5718_s28 + $0xe0] sm:$0xff]  ;;  %v862_v47 = vld [vmem:[%s5718_s28 + $0xe8] sm:$0xff]  ;;  %v4217_v19 = vcombine.high %v5784_v14, %v5791_v17  ;;  %v867_v14 = vld [vmem:[%s5718_s28 + $0x110] sm:$0xff] }
  0x6e   : > { %1263 = vmatprep.subr.bf16.mxu1 %v4195_v30  ;;  %v4179_v46 = vcombine.high %v857_v43, %v861_v44  ;;  %v4180_v48 = vcombine.low %v858_v45, %v862_v47  ;;  %v4181_v49 = vcombine.high %v858_v45, %v862_v47  ;;  %v4178_v50 = vcombine.low %v857_v43, %v861_v44  ;;  %v849_v51 = vld [vmem:[%s5718_s28 + $0x80] sm:$0xff]  ;;  %v850_v53 = vld [vmem:[%s5718_s28 + $0x88] sm:$0xff] }
  0x6f   : > { %1375 = vmatpush1.bf16.msra.mxu0 %v4204_v24  ;;  %v853_v52 = vld [vmem:[%s5718_s28 + $0xa0] sm:$0xff]  ;;  %v854_v55 = vld [vmem:[%s5718_s28 + $0xa8] sm:$0xff] }
  0x70   : > { %1376 = vmatprep.subr.bf16.mxu0 %v4197_v33  ;;  %v4171_v54 = vcombine.high %v849_v51, %v853_v52  ;;  %v4172_v56 = vcombine.low %v850_v53, %v854_v55  ;;  %v4173_v57 = vcombine.high %v850_v53, %v854_v55  ;;  %v4170_v58 = vcombine.low %v849_v51, %v853_v52  ;;  %v841_v59 = vld [vmem:[%s5718_s28 + $0x40] sm:$0xff]  ;;  %v842_v61 = vld [vmem:[%s5718_s28 + $0x48] sm:$0xff] }
  0x71   : > { %1264 = vmatpush1.bf16.msra.mxu1 %v4194_v34  ;;  %v845_v60 = vld [vmem:[%s5718_s28 + $0x60] sm:$0xff]  ;;  %v846_v63 = vld [vmem:[%s5718_s28 + $0x68] sm:$0xff] }
  0x72   : > { %4504 = vmatmul.mubr.msk.bf16.gmra.mxu0 %vm591_vm0, %v4598_v6  ;;  %1265 = vmatprep.subr.bf16.mxu1 %v4187_v38  ;;  %v4163_v62 = vcombine.high %v841_v59, %v845_v60  ;;  %v4164_v0 = vcombine.low %v842_v61, %v846_v63  ;;  %v4165_v1 = vcombine.high %v842_v61, %v846_v63  ;;  %v833_v3 = vld [vmem:[%s5718_s28] sm:$0xff]  ;;  %v834_v5 = vld [vmem:[%s5718_s28 + $0x8] sm:$0xff] }
  0x73   : > { %4507 = vmatprep.mubr.msk.bf16.mxu0 %vm591_vm0, %v4599_v7  ;;  %1377 = vmatpush1.bf16.msra.mxu0 %v4196_v32  ;;  %v4162_v2 = vcombine.low %v841_v59, %v845_v60  ;;  %v837_v4 = vld [vmem:[%s5718_s28 + $0x20] sm:$0xff]  ;;  %v838_v7 = vld [vmem:[%s5718_s28 + $0x28] sm:$0xff] }
  0x74   : > { %1378 = vmatprep.subr.bf16.mxu0 %v4189_v41  ;;  %v4155_v6 = vcombine.high %v833_v3, %v837_v4 }
  0x75   : > { %1266 = vmatpush1.bf16.msra.mxu1 %v4186_v42 }
  0x76   : > { %1267 = vmatprep.subr.bf16.mxu1 %v4179_v46 }
  0x77   : > { %1379 = vmatpush1.bf16.msra.mxu0 %v4188_v40 }
  0x78   : > { %1380 = vmatprep.subr.bf16.mxu0 %v4181_v49 }
  0x79   : > { %1268 = vmatpush1.bf16.msra.mxu1 %v4178_v50 }
  0x7a   : > { %4508 = vmatmul.mubr.msk.bf16.gmra.mxu0 %vm591_vm0, %v4600_v8  ;;  %1269 = vmatprep.subr.bf16.mxu1 %v4171_v54  ;;  %v4156_v8 = vcombine.low %v834_v5, %v838_v7 }
  0x7b   : > { %4511 = vmatprep.mubr.msk.bf16.mxu0 %vm591_vm0, %v4601_v9  ;;  %1381 = vmatpush1.bf16.msra.mxu0 %v4180_v48  ;;  %v4157_v9 = vcombine.high %v834_v5, %v838_v7 }
  0x7c   : > { %1382 = vmatprep.subr.bf16.mxu0 %v4173_v57 }
  0x7d   : > { %1270 = vmatpush1.bf16.msra.mxu1 %v4170_v58 }
  0x7e   : > { %1271 = vmatprep.subr.bf16.mxu1 %v4163_v62 }
  0x7f   : > { %1383 = vmatpush1.bf16.msra.mxu0 %v4172_v56 }
  0x80   : > { %1384 = vmatprep.subr.bf16.mxu0 %v4165_v1 }
  0x81   : > { %1272 = vmatpush1.bf16.msra.mxu1 %v4162_v2 }
  0x82   : > { %4512 = vmatmul.mubr.msk.bf16.gmra.mxu0 %vm591_vm0, %v4602_v10  ;;  %v4154_v10 = vcombine.low %v833_v3, %v837_v4  ;;  %1273 = vmatprep.subr.bf16.mxu1 %v4155_v6 }
  0x83   : > { %1385 = vmatpush1.bf16.msra.mxu0 %v4164_v0  ;;  %1404 = vmatprep.mubr.bf16.mxu0 %v5444_v11 }
  0x84   : > { %1386 = vmatprep.subr.bf16.mxu0 %v4157_v9 }
  0x85   : > { %1274 = vmatpush1.bf16.msra.mxu1 %v4154_v10 }
  0x86   : > { %1485 = vmatprep.subr.bf16.mxu1 %v4215_v16  ;;  %v883_v16 = vld [vmem:[%s5718_s28 + $0x190] sm:$0xff] }
  0x87   : > { %1387 = vmatpush1.bf16.msra.mxu0 %v4156_v8 }
  0x88   : > { %1598 = vmatprep.subr.bf16.mxu0 %v4217_v19 }
 0x12a   : > { %v4501_v20 = vpop.f32.mrf.mxu0 }
 0x12b   : > { %v5806_v25 = vadd.f32 %v4501_v20, %v5800_v21 }
 0x12c   : > { %v650_v22 = vpop.f32.mrf.mxu0 }
 0x12d   : > { %v5803_v23 = vadd.f32 %v5800_v21, %v650_v22  ;;  %v4140_v32 = vmul.f32 -1.442695, %v5806_v25 }
 0x12e   : > { %v4502_v24 = vpop.f32.mrf.mxu0 }
 0x12f   : > { %v4138_v26 = vmul.f32 -1.442695, %v5803_v23  ;;  %v5810_v27 = vadd.f32 %v4502_v24, %v5800_v21  ;;  %v887_v24 = vld [vmem:[%s5718_s28 + $0x1b0] sm:$0xff] }
 0x130   : > { %v653_v28 = vpop.f32.mrf.mxu0 }
 0x131   : > { %4603 = vpow2.f32 %v4138_v26  ;;  %v4141_v29 = vmul.f32 -1.442695, %v5810_v27  ;;  %v654_v30 = vadd.f32 %v5800_v21, %v653_v28  ;;  %v884_v26 = vld [vmem:[%s5718_s28 + $0x198] sm:$0xff] }
 0x132   : > { %v4505_v31 = vpop.f32.mrf.mxu0  ;;  %v888_v28 = vld [vmem:[%s5718_s28 + $0x1b8] sm:$0xff] }
 0x133   : > { %v4139_v33 = vmul.f32 -1.442695, %v654_v30  ;;  %4605 = vpow2.f32 %v4141_v29  ;;  %v5827_v47 = vadd.f32 %v4505_v31, %v5800_v21 }
 0x134   : > { %v666_v34 = vpop.f32.mrf.mxu0 }
 0x135   : > { %4607 = vpow2.f32 %v4139_v33  ;;  %v5816_v36 = vadd.f32 %v5800_v21, %v666_v34  ;;  %v4144_v53 = vmul.f32 -1.442695, %v5827_v47  ;;  %v5862_v34 = vld [vmem:[%s5718_s28 + $0x150] sm:$0xff] }
 0x136   : > { %v4506_v35 = vpop.f32.mrf.mxu0  ;;  %4609 = vpow2.f32 %v4140_v32 }
 0x137   : > { %v4142_v40 = vmul.f32 -1.442695, %v5816_v36  ;;  %v5824_v42 = vadd.f32 %v4506_v35, %v5800_v21  ;;  %v4207_v35 = vcombine.high %v883_v16, %v887_v24 }
 0x138   : > { %v669_v37 = vpop.f32.mrf.mxu0 }
 0x139   : > { %v5819_v38 = vadd.f32 %v5800_v21, %v669_v37  ;;  %v4145_v48 = vmul.f32 -1.442695, %v5824_v42  ;;  %v4209_v37 = vcombine.high %v884_v26, %v888_v28 }
 0x13a   : > { %v4509_v39 = vpop.f32.mrf.mxu0 }
 0x13b   : > { %v4143_v41 = vmul.f32 -1.442695, %v5819_v38  ;;  %v5847_v5 = vadd.f32 %v4509_v39, %v5800_v21  ;;  %v876_v39 = vld [vmem:[%s5718_s28 + $0x158] sm:$0xff] }
 0x13c   : > { %v682_v43 = vpop.f32.mrf.mxu0 }
 0x13d   : > { %4611 = vpow2.f32 %v4143_v41  ;;  %v5837_v59 = vadd.f32 %v5800_v21, %v682_v43  ;;  %v4148_v22 = vmul.f32 -1.442695, %v5847_v5 }
 0x13e   : > { %v4604_v44 = vpop.eup %4603  ;;  %v4510_v45 = vpop.f32.mrf.mxu0  ;;  %4613 = vpow2.f32 %v4142_v40  ;;  %v880_v40 = vld [vmem:[%s5718_s28 + $0x178] sm:$0xff] }
 0x13f   : > { %v761_v46 = vadd.f32 1.0, %v4604_v44  ;;  %v4146_v63 = vmul.f32 -1.442695, %v5837_v59  ;;  %v5842_v2 = vadd.f32 %v4510_v45, %v5800_v21  ;;  %v4206_v45 = vcombine.low %v883_v16, %v887_v24 }
 0x140   : > { %v4606_v49 = vpop.eup %4605  ;;  %v685_v51 = vpop.f32.mrf.mxu0  ;;  %v4201_v12 = vcombine.high %v876_v39, %v880_v40 }
 0x141   : > { %4615 = vrcp.f32 %v761_v46  ;;  %v764_v55 = vadd.f32 1.0, %v4606_v49  ;;  %v5832_v56 = vadd.f32 %v5800_v21, %v685_v51  ;;  %v4149_v8 = vmul.f32 -1.442695, %v5842_v2  ;;  %v868_v51 = vld [vmem:[%s5718_s28 + $0x118] sm:$0xff] }
 0x142   : > { %v4608_v50 = vpop.eup %4607  ;;  %4617 = vpow2.f32 %v4145_v48  ;;  %v5834_v57 = vpop.f32.mrf.mxu0  ;;  %v4208_v46 = vcombine.low %v884_v26, %v888_v28  ;;  %v852_v26 = vld [vmem:[%s5718_s28 + $0x98] sm:$0xff] }
 0x143   : > { %v762_v52 = vadd.f32 1.0, %v4608_v50  ;;  %v4610_v54 = vpop.eup %4609  ;;  %v4147_v60 = vmul.f32 -1.442695, %v5832_v56  ;;  %v856_v28 = vld [vmem:[%s5718_s28 + $0xb8] sm:$0xff] }
 0x144   : > { %v763_v58 = vadd.f32 1.0, %v4610_v54  ;;  %v698_v62 = vpop.f32.mrf.mxu0  ;;  %v4200_v54 = vcombine.low %v876_v39, %v880_v40  ;;  %v843_v39 = vld [vmem:[%s5718_s28 + $0x50] sm:$0xff] }
 0x145   : > { %4619 = vrcp.f32 %v762_v52  ;;  %v5870_v43 = vadd.f32 %v5800_v21, %v698_v62 }
 0x146   : > { %4621 = vpow2.f32 %v4144_v53  ;;  %v5844_v3 = vpop.f32.mrf.mxu0 }
 0x147   : > { %4623 = vrcp.f32 %v764_v55  ;;  %v4150_v17 = vmul.f32 -1.442695, %v5870_v43 }
 0x148   : > { %4625 = vrcp.f32 %v763_v58  ;;  %v701_v10 = vpop.f32.mrf.mxu0 }
 0x149   : > { %4627 = vpow2.f32 %v4147_v60  ;;  %v5859_v33 = vadd.f32 %v5800_v21, %v701_v10 }
 0x14a   : > { %v4612_v61 = vpop.eup %4611  ;;  %4629 = vpow2.f32 %v4146_v63  ;;  %v859_v63 = vld [vmem:[%s5718_s28 + $0xd0] sm:$0xff] }
 0x14b   : > { %v4614_v0 = vpop.eup %4613  ;;  %v766_v1 = vadd.f32 1.0, %v4612_v61  ;;  %v4151_v50 = vmul.f32 -1.442695, %v5859_v33 }
 0x14c   : > { %v765_v4 = vadd.f32 1.0, %v4614_v0 }
 0x14d   : > { %4631 = vrcp.f32 %v766_v1  ;;  %v5903_v1 = vadd.f32 %v5834_v57, %v5800_v21 }
 0x14e   : > { %v4616_v6 = vpop.eup %4615  ;;  %4633 = vrcp.f32 %v765_v4  ;;  %v863_v4 = vld [vmem:[%s5718_s28 + $0xf0] sm:$0xff] }
 0x14f   : > { %v4618_v7 = vpop.eup %4617  ;;  %v809_v19 = vmul.f32 %v4616_v6, %v5803_v23  ;;  %4635 = vpow2.f32 %v4149_v8  ;;  %v5865_v23 = vld [vmem:[%s5718_s28 + $0x170] sm:$0xff]  ;;  %v864_v6 = vld [vmem:[%s5718_s28 + $0xf8] sm:$0xff]  ;;  %v4183_v16 = vcombine.high %v859_v63, %v863_v4  ;;  %v4152_v24 = vmul.f32 -1.442695, %v5903_v1 }
 0x150   : > { %v768_v32 = vadd.f32 1.0, %v4618_v7  ;;  %4637 = vpow2.f32 %v4148_v22  ;;  %v4199_v48 = vcombine.high %v5862_v34, %v5865_v23  ;;  %v4198_v53 = vcombine.low %v5862_v34, %v5865_v23 }
 0x152   : > { %v4620_v9 = vpop.eup %4619  ;;  %4639 = vrcp.f32 %v768_v32  ;;  %v4182_v32 = vcombine.low %v859_v63, %v863_v4 }
 0x153   : > { %v810_v20 = vmul.f32 %v4620_v9, %v654_v30  ;;  %v4622_v29 = vpop.eup %4621 }
 0x154   : > { %v4624_v30 = vpop.eup %4623  ;;  %v767_v41 = vadd.f32 1.0, %v4622_v29 }
 0x155   : > { %v5856_v31 = vpack.c.bf16 %v810_v20, %v809_v19  ;;  %v4626_v44 = vpop.eup %4625  ;;  %v812_v49 = vmul.f32 %v4624_v30, %v5810_v27  ;;  %v872_v27 = vld [vmem:[%s5718_s28 + $0x138] sm:$0xff]  ;;  %v851_v20 = vld [vmem:[%s5718_s28 + $0x90] sm:$0xff] }
 0x156   : > { %v4628_v13 = vpop.eup %4627  ;;  %4641 = vrcp.f32 %v767_v41  ;;  %v4193_v62 = vcombine.high %v868_v51, %v872_v27  ;;  %v4192_v57 = vcombine.low %v868_v51, %v872_v27  ;;  %v847_v41 = vld [vmem:[%s5718_s28 + $0x70] sm:$0xff]  ;;  %v836_v51 = vld [vmem:[%s5718_s28 + $0x18] sm:$0xff] }
 0x157   : > { %1292 = vmatmul.mubr.bf16.vlgmr.msra.gmra.mxu1 %v5856_v31  ;;  %1405 = vmatmul.mubr.bf16.vlgmr.msra.gmra.mxu0 %v5856_v31  ;;  %v4630_v52 = vpop.eup %4629  ;;  %v770_v58 = vadd.f32 1.0, %v4628_v13  ;;  %4643 = vpow2.f32 %v4151_v50  ;;  %v4176_v50 = vcombine.low %v852_v26, %v856_v28  ;;  %v4167_v13 = vcombine.high %v843_v39, %v847_v41  ;;  %v840_v27 = vld [vmem:[%s5718_s28 + $0x38] sm:$0xff] }
 0x158   : > { %1486 = vmatpush1.bf16.msra.mxu1 %v4214_v15  ;;  %1599 = vmatpush1.bf16.msra.mxu0 %v4216_v18  ;;  %v811_v15 = vmul.f32 %v4626_v44, %v5806_v25  ;;  %v871_v18 = vld [vmem:[%s5718_s28 + $0x130] sm:$0xff]  ;;  %v5898_v25 = vadd.f32 %v5844_v3, %v5800_v21  ;;  %v769_v0 = vadd.f32 1.0, %v4630_v52  ;;  %4645 = vpow2.f32 %v4150_v17  ;;  %v860_v3 = vld [vmem:[%s5718_s28 + $0xd8] sm:$0xff] }
 0x159   : > { %1301 = vmatprep.mubr.bf16.mxu1 %v5444_v11  ;;  %1414 = vmatprep.mubr.bf16.mxu0 %v5444_v11  ;;  %v4191_v61 = vcombine.high %v867_v14, %v871_v18  ;;  %v4190_v8 = vcombine.low %v867_v14, %v871_v18  ;;  %4647 = vrcp.f32 %v770_v58  ;;  %v4185_v19 = vcombine.high %v860_v3, %v864_v6  ;;  %v844_v44 = vld [vmem:[%s5718_s28 + $0x58] sm:$0xff]  ;;  %v839_v18 = vld [vmem:[%s5718_s28 + $0x30] sm:$0xff] }
 0x15a   : > { %1487 = vmatprep.subr.bf16.mxu1 %v4207_v35  ;;  %1600 = vmatprep.subr.bf16.mxu0 %v4209_v37  ;;  %v5894_v55 = vpack.c.bf16 %v812_v49, %v811_v15  ;;  %v4632_v60 = vpop.eup %4631  ;;  %v4153_v21 = vmul.f32 -1.442695, %v5898_v25  ;;  %4649 = vrcp.f32 %v769_v0  ;;  %v4184_v30 = vcombine.low %v860_v3, %v864_v6  ;;  %v835_v15 = vld [vmem:[%s5718_s28 + $0x10] sm:$0xff] }
 0x15b   : > { %v4634_v7 = vpop.eup %4633  ;;  %v814_v9 = vmul.f32 %v4632_v60, %v5819_v38  ;;  %v855_v38 = vld [vmem:[%s5718_s28 + $0xb0] sm:$0xff]  ;;  %v4177_v37 = vcombine.high %v852_v26, %v856_v28  ;;  %v4158_v4 = vcombine.low %v835_v15, %v839_v18  ;;  %v4160_v3 = vcombine.low %v836_v51, %v840_v27 }
 0x15c   : > { %1488 = vmatpush1.bf16.msra.mxu1 %v4206_v45  ;;  %1601 = vmatpush1.bf16.msra.mxu0 %v4208_v46  ;;  %v4636_v10 = vpop.eup %4635  ;;  %v813_v22 = vmul.f32 %v4634_v7, %v5816_v36  ;;  %4651 = vpow2.f32 %v4153_v21  ;;  %v4175_v35 = vcombine.high %v851_v20, %v855_v38  ;;  %v848_v45 = vld [vmem:[%s5718_s28 + $0x78] sm:$0xff]  ;;  %v4174_v49 = vcombine.low %v851_v20, %v855_v38 }
 0x15d   : > { %1489 = vmatprep.subr.bf16.mxu1 %v4199_v48  ;;  %1602 = vmatprep.subr.bf16.mxu0 %v4201_v12  ;;  %v4638_v29 = vpop.eup %4637  ;;  %v772_v23 = vadd.f32 1.0, %v4636_v10  ;;  %4653 = vpow2.f32 %v4152_v24  ;;  %v4169_v14 = vcombine.high %v844_v44, %v848_v45  ;;  %v4168_v58 = vcombine.low %v844_v44, %v848_v45 }
 0x15e   : > { %v5920_v34 = vpack.c.bf16 %v814_v9, %v813_v22  ;;  %v771_v40 = vadd.f32 1.0, %v4638_v29 }
 0x15f   : > { %1302 = vmatmul.mubr.bf16.gmra.mxu1 %v5894_v55  ;;  %1415 = vmatmul.mubr.bf16.gmra.mxu0 %v5894_v55  ;;  %v4640_v36 = vpop.eup %4639  ;;  %4655 = vrcp.f32 %v772_v23 }
 0x160   : > { %1311 = vmatprep.mubr.bf16.mxu1 %v5444_v11  ;;  %1424 = vmatprep.mubr.bf16.mxu0 %v5444_v11  ;;  %v816_v48 = vmul.f32 %v4640_v36, %v5824_v42  ;;  %4657 = vrcp.f32 %v771_v40 }
 0x161   : > { %1490 = vmatpush1.bf16.msra.mxu1 %v4198_v53  ;;  %1603 = vmatpush1.bf16.msra.mxu0 %v4200_v54  ;;  %v4166_v54 = vcombine.low %v843_v39, %v847_v41 }
 0x162   : > { %1491 = vmatprep.subr.bf16.mxu1 %v4191_v61  ;;  %1604 = vmatprep.subr.bf16.mxu0 %v4193_v62  ;;  %v4159_v61 = vcombine.high %v835_v15, %v839_v18  ;;  %v4161_v62 = vcombine.high %v836_v51, %v840_v27 }
 0x163   : > { %v4642_v46 = vpop.eup %4641 }
 0x164   : > { %v4644_v12 = vpop.eup %4643  ;;  %v815_v17 = vmul.f32 %v4642_v46, %v5827_v47 }
 0x165   : > { %1492 = vmatpush1.bf16.msra.mxu1 %v4190_v8  ;;  %1605 = vmatpush1.bf16.msra.mxu0 %v4192_v57  ;;  %v4646_v52 = vpop.eup %4645  ;;  %v774_v53 = vadd.f32 1.0, %v4644_v12 }
 0x166   : > { %1493 = vmatprep.subr.bf16.mxu1 %v4183_v16  ;;  %1606 = vmatprep.subr.bf16.mxu0 %v4185_v19  ;;  %v5936_v42 = vpack.c.bf16 %v816_v48, %v815_v17  ;;  %v4648_v60 = vpop.eup %4647  ;;  %v773_v63 = vadd.f32 1.0, %v4646_v52 }
 0x167   : > { %1312 = vmatmul.mubr.bf16.gmra.mxu1 %v5920_v34  ;;  %1425 = vmatmul.mubr.bf16.gmra.mxu0 %v5920_v34  ;;  %v4650_v47 = vpop.eup %4649  ;;  %v818_v0 = vmul.f32 %v4648_v60, %v5832_v56  ;;  %4659 = vrcp.f32 %v774_v53 }
 0x168   : > { %1321 = vmatprep.mubr.bf16.mxu1 %v5444_v11  ;;  %1434 = vmatprep.mubr.bf16.mxu0 %v5444_v11  ;;  %v817_v7 = vmul.f32 %v4650_v47, %v5837_v59  ;;  %4661 = vrcp.f32 %v773_v63 }
 0x169   : > { %1494 = vmatpush1.bf16.msra.mxu1 %v4182_v32  ;;  %1607 = vmatpush1.bf16.msra.mxu0 %v4184_v30  ;;  %v4652_v6 = vpop.eup %4651 }
 0x16a   : > { %1495 = vmatprep.subr.bf16.mxu1 %v4175_v35  ;;  %1608 = vmatprep.subr.bf16.mxu0 %v4177_v37  ;;  %v4654_v8 = vpop.eup %4653  ;;  %v829_v9 = vpack.c.bf16 %v818_v0, %v817_v7  ;;  %v776_v21 = vadd.f32 1.0, %v4652_v6 }
 0x16b   : > { %v775_v10 = vadd.f32 1.0, %v4654_v8 }
 0x16c   : > { %v4656_v57 = vpop.eup %4655  ;;  %4663 = vrcp.f32 %v776_v21 }
 0x16d   : > { %1496 = vmatpush1.bf16.msra.mxu1 %v4174_v49  ;;  %1609 = vmatpush1.bf16.msra.mxu0 %v4176_v50  ;;  %v4658_v56 = vpop.eup %4657  ;;  %v820_v16 = vmul.f32 %v4656_v57, %v5842_v2  ;;  %4665 = vrcp.f32 %v775_v10 }
 0x16e   : > { %1497 = vmatprep.subr.bf16.mxu1 %v4167_v13  ;;  %1610 = vmatprep.subr.bf16.mxu0 %v4169_v14  ;;  %v819_v59 = vmul.f32 %v4658_v56, %v5847_v5 }
 0x16f   : > { %1322 = vmatmul.mubr.bf16.gmra.mxu1 %v5936_v42  ;;  %1435 = vmatmul.mubr.bf16.gmra.mxu0 %v5936_v42 }
 0x170   : > { %1331 = vmatprep.mubr.bf16.mxu1 %v5444_v11  ;;  %1444 = vmatprep.mubr.bf16.mxu0 %v5444_v11  ;;  %v830_v19 = vpack.c.bf16 %v820_v16, %v819_v59 }
 0x171   : > { %1498 = vmatpush1.bf16.msra.mxu1 %v4166_v54  ;;  %1611 = vmatpush1.bf16.msra.mxu0 %v4168_v58 }
 0x172   : > { %1499 = vmatprep.subr.bf16.mxu1 %v4159_v61  ;;  %1612 = vmatprep.subr.bf16.mxu0 %v4161_v62 }
 0x174   : > { %v4660_v20 = vpop.eup %4659 }
 0x175   : > { %1500 = vmatpush1.bf16.msra.mxu1 %v4158_v4  ;;  %1613 = vmatpush1.bf16.msra.mxu0 %v4160_v3  ;;  %v4662_v22 = vpop.eup %4661  ;;  %v822_v24 = vmul.f32 %v4660_v20, %v5859_v33 }
 0x176   : > { %v821_v38 = vmul.f32 %v4662_v22, %v5870_v43 }
 0x177   : > { %1332 = vmatmul.mubr.bf16.gmra.mxu1 %v829_v9  ;;  %1445 = vmatmul.mubr.bf16.gmra.mxu0 %v829_v9 }
 0x178   : > { %1341 = vmatprep.mubr.bf16.mxu1 %v5444_v11  ;;  %1454 = vmatprep.mubr.bf16.mxu0 %v5444_v11  ;;  %v831_v26 = vpack.c.bf16 %v822_v24, %v821_v38 }
 0x179   : > { %v4664_v28 = vpop.eup %4663 }
 0x17a   : > { %v4666_v2 = vpop.eup %4665  ;;  %v824_v5 = vmul.f32 %v4664_v28, %v5898_v25 }
 0x17b   : > { %v823_v29 = vmul.f32 %v4666_v2, %v5903_v1 }
 0x17d   : > { %v832_v32 = vpack.c.bf16 %v824_v5, %v823_v29 }
 0x17f   : > { %1342 = vmatmul.mubr.bf16.gmra.mxu1 %v830_v19  ;;  %1455 = vmatmul.mubr.bf16.gmra.mxu0 %v830_v19 }
 0x180   : > { %1351 = vmatprep.mubr.bf16.mxu1 %v5444_v11  ;;  %1464 = vmatprep.mubr.bf16.mxu0 %v5444_v11 }
 0x187   : > { %1352 = vmatmul.mubr.bf16.gmra.mxu1 %v831_v26  ;;  %1465 = vmatmul.mubr.bf16.gmra.mxu0 %v831_v26 }
 0x188   : > { %1361 = vmatprep.mubr.bf16.mxu1 %v5444_v11  ;;  %1474 = vmatprep.mubr.bf16.mxu0 %v5444_v11 }
 0x18f   : > { %1362 = vmatmul.mubr.bf16.gmra.mxu1 %v832_v32  ;;  %1475 = vmatmul.mubr.bf16.gmra.mxu0 %v832_v32 }
 0x190   : > { %1517 = vmatprep.mubr.bf16.mxu1 %v5444_v11  ;;  %1630 = vmatprep.mubr.bf16.mxu0 %v5444_v11 }
 0x197   : > { %1518 = vmatmul.mubr.bf16.vlgmr.msra.gmra.mxu1 %v5856_v31  ;;  %1631 = vmatmul.mubr.bf16.vlgmr.msra.gmra.mxu0 %v5856_v31  ;;  %v7511_v31 = vlaneseq }
 0x198   : > { %1527 = vmatprep.mubr.bf16.mxu1 %v5444_v11  ;;  %1640 = vmatprep.mubr.bf16.mxu0 %v5444_v11 }
 0x19f   : > { %1528 = vmatmul.mubr.bf16.gmra.mxu1 %v5894_v55  ;;  %1641 = vmatmul.mubr.bf16.gmra.mxu0 %v5894_v55  ;;  %v5981_v55 = vshrl.u32 %v7511_v31, 7 }
 0x1a0   : > { %1537 = vmatprep.mubr.bf16.mxu1 %v5444_v11  ;;  %1650 = vmatprep.mubr.bf16.mxu0 %v5444_v11 }
 0x1a1   : > { %7619 = vst [vmem:[#allocation8_spill] sm:$0xff] %v5981_v55  ;;  %v7508_v30 = vsub.s32 0, %v5981_v55  ;;  %v7507_v37 = vsub.s32 2, %v5981_v55  ;;  %v7510_v39 = vsub.s32 1, %v5981_v55  ;;  %v7509_v44 = vsub.s32 3, %v5981_v55 }
 0x1a7   : > { %1538 = vmatmul.mubr.bf16.gmra.mxu1 %v5920_v34  ;;  %1651 = vmatmul.mubr.bf16.gmra.mxu0 %v5920_v34 }
 0x1a8   : > { %1547 = vmatprep.mubr.bf16.mxu1 %v5444_v11  ;;  %1660 = vmatprep.mubr.bf16.mxu0 %v5444_v11 }
 0x1af   : > { %1548 = vmatmul.mubr.bf16.gmra.mxu1 %v5936_v42  ;;  %1661 = vmatmul.mubr.bf16.gmra.mxu0 %v5936_v42 }
 0x1b0   : > { %1557 = vmatprep.mubr.bf16.mxu1 %v5444_v11  ;;  %1670 = vmatprep.mubr.bf16.mxu0 %v5444_v11 }
 0x1b7   : > { %1558 = vmatmul.mubr.bf16.gmra.mxu1 %v829_v9  ;;  %1671 = vmatmul.mubr.bf16.gmra.mxu0 %v829_v9 }
 0x1b8   : > { %1567 = vmatprep.mubr.bf16.mxu1 %v5444_v11  ;;  %1680 = vmatprep.mubr.bf16.mxu0 %v5444_v11 }
 0x1bf   : > { %1568 = vmatmul.mubr.bf16.gmra.mxu1 %v830_v19  ;;  %1681 = vmatmul.mubr.bf16.gmra.mxu0 %v830_v19 }
 0x1c0   : > { %1577 = vmatprep.mubr.bf16.mxu1 %v5444_v11  ;;  %1690 = vmatprep.mubr.bf16.mxu0 %v5444_v11 }
 0x1c7   : > { %1578 = vmatmul.mubr.bf16.gmra.mxu1 %v831_v26  ;;  %1691 = vmatmul.mubr.bf16.gmra.mxu0 %v831_v26 }
 0x1c8   : > { %1587 = vmatprep.mubr.bf16.mxu1 %v5444_v11  ;;  %1700 = vmatprep.mubr.bf16.mxu0 %v5444_v11  ;;  %v5989_v11 = vld [vmem:[%s489_s3] sm:$0xff]  ;;  %s4346_s3 = sshll.u32 %s5417_s23, 7 }
 0x1c9   : > { %v5997_v45 = vrot.slane %v5989_v11, %v7508_v30  ;;  %v6002_v49 = vrot.slane %v5989_v11, %v7507_v37  ;;  %v6007_v50 = vrot.slane %v5989_v11, %v7510_v39  ;;  %v6012_v14 = vrot.slane %v5989_v11, %v7509_v44 }
 0x1cf   : > { %1588 = vmatmul.mubr.bf16.gmra.mxu1 %v832_v32  ;;  %1701 = vmatmul.mubr.bf16.gmra.mxu0 %v832_v32 }
 0x217   : > { %v1293_v33 = vpop.f32.mrf.mxu1  ;;  %v1406_v43 = vpop.f32.mrf.mxu0 }
 0x218   : > { %v6015_v15 = vadd.f32 %v1293_v33, %v5997_v45  ;;  %v6018_v51 = vadd.f32 %v1406_v43, %v6002_v49 }
 0x219   : > { %v1295_v25 = vpop.f32.mrf.mxu1  ;;  %v1408_v1 = vpop.f32.mrf.mxu0 }
 0x21a   : > { %7620 = vst [vmem:[#allocation9_spill] sm:$0xff] %v6018_v51  ;;  %v6021_v27 = vadd.f32 %v1295_v25, %v6007_v50  ;;  %v6028_v53 = vadd.f32 %v1408_v1, %v6012_v14  ;;  %v4218_v54 = vmul.f32 -1.442695, %v6015_v15  ;;  %v4220_v62 = vmul.f32 -1.442695, %v6018_v51 }
 0x21b   : > { %v1297_v34 = vpop.f32.mrf.mxu1  ;;  %v1410_v23 = vpop.f32.mrf.mxu0 }
 0x21c   : > { %v6032_v58 = vadd.f32 %v1297_v34, %v5997_v45  ;;  %v6040_v63 = vadd.f32 %v1410_v23, %v6002_v49  ;;  %v4219_v47 = vmul.f32 -1.442695, %v6021_v27  ;;  %v4221_v3 = vmul.f32 -1.442695, %v6028_v53 }
 0x21d   : > { %v1299_v36 = vpop.f32.mrf.mxu1  ;;  %v1412_v35 = vpop.f32.mrf.mxu0  ;;  %4667 = vpow2.f32 %v4218_v54 }
 0x21e   : > { %v6044_v0 = vadd.f32 %v1299_v36, %v6007_v50  ;;  %v6050_v6 = vadd.f32 %v1412_v35, %v6012_v14  ;;  %v4226_v8 = vmul.f32 -1.442695, %v6032_v58  ;;  %4669 = vpow2.f32 %v4220_v62 }
 0x21f   : > { %v1303_v40 = vpop.f32.mrf.mxu1  ;;  %v1416_v41 = vpop.f32.mrf.mxu0  ;;  %v4228_v21 = vmul.f32 -1.442695, %v6040_v63  ;;  %4671 = vpow2.f32 %v4219_v47 }
 0x220   : > { %7621 = vst [vmem:[#allocation10_spill] sm:$0xff] %v6044_v0  ;;  %7622 = vst [vmem:[#allocation11_spill] sm:$0xff] %v6050_v6  ;;  %v6056_v9 = vadd.f32 %v1303_v40, %v5997_v45  ;;  %v6060_v57 = vadd.f32 %v1416_v41, %v6002_v49  ;;  %v4227_v10 = vmul.f32 -1.442695, %v6044_v0  ;;  %4673 = vpow2.f32 %v4221_v3 }
 0x221   : > { %v1305_v46 = vpop.f32.mrf.mxu1  ;;  %v1418_v48 = vpop.f32.mrf.mxu0  ;;  %v4229_v16 = vmul.f32 -1.442695, %v6050_v6  ;;  %4675 = vpow2.f32 %v4226_v8 }
 0x222   : > { %7623 = vst [vmem:[#allocation12_spill] sm:$0xff] %v6060_v57  ;;  %v4234_v19 = vmul.f32 -1.442695, %v6056_v9  ;;  %4677 = vpow2.f32 %v4228_v21  ;;  %v4236_v20 = vmul.f32 -1.442695, %v6060_v57  ;;  %v6071_v22 = vadd.f32 %v1305_v46, %v6007_v50 }
 0x223   : > { %v1307_v12 = vpop.f32.mrf.mxu1  ;;  %v1420_v13 = vpop.f32.mrf.mxu0  ;;  %4679 = vpow2.f32 %v4227_v10  ;;  %v6076_v38 = vadd.f32 %v1418_v48, %v6012_v14 }
 0x224   : > { %7624 = vst [vmem:[#allocation13_spill] sm:$0xff] %v6071_v22  ;;  %4681 = vpow2.f32 %v4229_v16  ;;  %v6081_v28 = vadd.f32 %v1307_v12, %v5997_v45  ;;  %v6084_v2 = vadd.f32 %v1420_v13, %v6002_v49  ;;  %v4235_v5 = vmul.f32 -1.442695, %v6071_v22 }
 0x225   : > { %v1309_v17 = vpop.f32.mrf.mxu1  ;;  %v1422_v18 = vpop.f32.mrf.mxu0  ;;  %7625 = vst [vmem:[#allocation14_spill] sm:$0xff] %v6076_v38  ;;  %4683 = vpow2.f32 %v4234_v19  ;;  %v4237_v33 = vmul.f32 -1.442695, %v6076_v38 }
 0x226   : > { %7626 = vst [vmem:[#allocation15_spill] sm:$0xff] %v6081_v28  ;;  %4685 = vpow2.f32 %v4236_v20  ;;  %7627 = vst [vmem:[#allocation16_spill] sm:$0xff] %v6084_v2  ;;  %v6088_v29 = vadd.f32 %v1309_v17, %v6007_v50  ;;  %v6094_v43 = vadd.f32 %v1422_v18, %v6012_v14  ;;  %v4242_v1 = vmul.f32 -1.442695, %v6081_v28 }
 0x227   : > { %v6023_v52 = vpop.f32.mrf.mxu1  ;;  %v6025_v42 = vpop.f32.mrf.mxu0  ;;  %v4244_v23 = vmul.f32 -1.442695, %v6084_v2  ;;  %4687 = vpow2.f32 %v4235_v5 }
 0x228   : > { %7628 = vst [vmem:[#allocation17_spill] sm:$0xff] %v6094_v43  ;;  %v4243_v35 = vmul.f32 -1.442695, %v6088_v29  ;;  %4689 = vpow2.f32 %v4237_v33  ;;  %v4245_v46 = vmul.f32 -1.442695, %v6094_v43 }
 0x229   : > { %v6034_v60 = vpop.f32.mrf.mxu1  ;;  %v6036_v61 = vpop.f32.mrf.mxu0  ;;  %4691 = vpow2.f32 %v4242_v1  ;;  %v6112_v1 = vadd.f32 %v6023_v52, %v5997_v45 }
 0x22a   : > { %v4668_v34 = vpop.eup %4667  ;;  %4693 = vpow2.f32 %v4244_v23  ;;  %v6128_v52 = vadd.f32 %v6036_v61, %v6012_v14 }
 0x22b   : > { %v6046_v4 = vpop.f32.mrf.mxu1  ;;  %v6052_v7 = vpop.f32.mrf.mxu0  ;;  %v2095_v13 = vadd.f32 1.0, %v4668_v34  ;;  %4695 = vpow2.f32 %v4243_v35  ;;  %7629 = vst [vmem:[#allocation18_spill] sm:$0xff] %v6112_v1 }
 0x22c   : > { %v4670_v36 = vpop.eup %4669  ;;  %4697 = vpow2.f32 %v4245_v46  ;;  %v6124_v46 = vadd.f32 %v6034_v60, %v6007_v50  ;;  %7632 = vst [vmem:[#allocation21_spill] sm:$0xff] %v6128_v52 }
 0x22d   : > { %v6063_v56 = vpop.f32.mrf.mxu1  ;;  %v6066_v59 = vpop.f32.mrf.mxu0  ;;  %v2097_v18 = vadd.f32 1.0, %v4670_v36  ;;  %4699 = vrcp.f32 %v2095_v13  ;;  %v6118_v36 = vadd.f32 %v6025_v42, %v6002_v49  ;;  %v4250_v13 = vmul.f32 -1.442695, %v6112_v1 }
 0x22e   : > { %v4672_v41 = vpop.eup %4671  ;;  %7631 = vst [vmem:[#allocation20_spill] sm:$0xff] %v6124_v46  ;;  %v6133_v42 = vadd.f32 %v6046_v4, %v5997_v45  ;;  %v4253_v4 = vmul.f32 -1.442695, %v6128_v52 }
 0x22f   : > { %v6073_v24 = vpop.f32.mrf.mxu1  ;;  %v6078_v26 = vpop.f32.mrf.mxu0  ;;  %v2096_v62 = vadd.f32 1.0, %v4672_v41  ;;  %4701 = vrcp.f32 %v2097_v18  ;;  %7630 = vst [vmem:[#allocation19_spill] sm:$0xff] %v6118_v36  ;;  %v4252_v60 = vmul.f32 -1.442695, %v6118_v36 }
 0x230   : > { %v4674_v12 = vpop.eup %4673  ;;  %7633 = vst [vmem:[#allocation22_spill] sm:$0xff] %v6133_v42 }
 0x231   : > { %v6090_v32 = vpop.f32.mrf.mxu1  ;;  %v6096_v25 = vpop.f32.mrf.mxu0  ;;  %v2098_v8 = vadd.f32 1.0, %v4674_v12  ;;  %4703 = vrcp.f32 %v2096_v62 }
 0x232   : > { %v4676_v17 = vpop.eup %4675  ;;  %v6164_v37 = vadd.f32 %v6090_v32, %v6007_v50 }
 0x233   : > { %v6101_v40 = vpop.f32.mrf.mxu1  ;;  %v6104_v48 = vpop.f32.mrf.mxu0  ;;  %v2103_v16 = vadd.f32 1.0, %v4676_v17  ;;  %4705 = vrcp.f32 %v2098_v8 }
 0x234   : > { %v4678_v54 = vpop.eup %4677  ;;  %7636 = vst [vmem:[#allocation25_spill] sm:$0xff] %v6164_v37  ;;  %v6219_v51 = vadd.f32 %v6104_v48, %v6002_v49 }
 0x235   : > { %v6106_v47 = vpop.f32.mrf.mxu1  ;;  %v4680_v3 = vpop.eup %4679  ;;  %v2105_v20 = vadd.f32 1.0, %v4678_v54  ;;  %4707 = vrcp.f32 %v2103_v16  ;;  %v6140_v54 = vadd.f32 %v6063_v56, %v6007_v50  ;;  %v4258_v16 = vmul.f32 -1.442695, %v6133_v42 }
 0x236   : > { %v6108_v21 = vpop.f32.mrf.mxu0  ;;  %v4682_v10 = vpop.eup %4681  ;;  %v2104_v33 = vadd.f32 1.0, %v4680_v3  ;;  %v4251_v3 = vmul.f32 -1.442695, %v6124_v46  ;;  %7646 = vst [vmem:[#allocation35_spill] sm:$0xff] %v6219_v51 }
 0x237   : > { %v4684_v19 = vpop.eup %4683  ;;  %v6114_v34 = vpop.f32.mrf.mxu1  ;;  %v2106_v23 = vadd.f32 1.0, %v4682_v10  ;;  %4709 = vrcp.f32 %v2105_v20  ;;  %7634 = vst [vmem:[#allocation23_spill] sm:$0xff] %v6140_v54  ;;  %v4259_v56 = vmul.f32 -1.442695, %v6140_v54 }
 0x238   : > { %v4686_v5 = vpop.eup %4685  ;;  %v6120_v35 = vpop.f32.mrf.mxu0  ;;  %v2111_v41 = vadd.f32 1.0, %v4684_v19  ;;  %4711 = vrcp.f32 %v2104_v33 }
 0x239   : > { %v2113_v12 = vadd.f32 1.0, %v4686_v5  ;;  %v6135_v17 = vpop.f32.mrf.mxu1  ;;  %v4688_v18 = vpop.eup %4687  ;;  %4713 = vrcp.f32 %v2106_v23 }
 0x23a   : > { %v6142_v62 = vpop.f32.mrf.mxu0  ;;  %v4690_v61 = vpop.eup %4689  ;;  %4715 = vrcp.f32 %v2111_v41  ;;  %v2112_v23 = vadd.f32 1.0, %v4688_v18  ;;  %v6158_v41 = vadd.f32 %v6073_v24, %v5997_v45  ;;  %v6170_v18 = vadd.f32 %v6101_v40, %v5997_v45 }
 0x23b   : > { %v4692_v8 = vpop.eup %4691  ;;  %4717 = vrcp.f32 %v2113_v12  ;;  %v6149_v19 = vpop.f32.mrf.mxu1 }
 0x23c   : > { %v6146_v10 = vpop.eup %4693  ;;  %4719 = vpow2.f32 %v4250_v13  ;;  %v6152_v5 = vpop.f32.mrf.mxu0  ;;  %7635 = vst [vmem:[#allocation24_spill] sm:$0xff] %v6158_v41  ;;  %v2114_v13 = vadd.f32 1.0, %v4690_v61  ;;  %v2119_v30 = vadd.f32 1.0, %v4692_v8  ;;  %7638 = vst [vmem:[#allocation27_spill] sm:$0xff] %v6170_v18  ;;  %v6178_v61 = vadd.f32 %v6106_v47, %v6007_v50 }
 0x23d   : > { %v4696_v20 = vpop.eup %4695  ;;  %4721 = vpow2.f32 %v4252_v60  ;;  %v6186_v8 = vadd.f32 %v6052_v7, %v6002_v49  ;;  %v4266_v40 = vmul.f32 -1.442695, %v6158_v41  ;;  %v4267_v47 = vmul.f32 -1.442695, %v6164_v37 }
 0x23e   : > { %v6154_v33 = vpop.eup %4697  ;;  %4723 = vpow2.f32 %v4251_v3  ;;  %v6172_v3 = vpop.f32.mrf.mxu1  ;;  %v2120_v44 = vadd.f32 1.0, %v4696_v20  ;;  %7639 = vst [vmem:[#allocation28_spill] sm:$0xff] %v6178_v61  ;;  %v6193_v20 = vadd.f32 %v6066_v59, %v6012_v14  ;;  %v4274_v7 = vmul.f32 -1.442695, %v6170_v18 }
 0x23f   : > { %v6160_v12 = vpop.eup %4699  ;;  %4725 = vpow2.f32 %v4253_v4  ;;  %v6180_v32 = vpop.f32.mrf.mxu0  ;;  %7640 = vst [vmem:[#allocation29_spill] sm:$0xff] %v6186_v8  ;;  %v6209_v59 = vadd.f32 %v6096_v25, %v6012_v14  ;;  %v6226_v25 = vadd.f32 %v6108_v21, %v6012_v14 }
 0x240   : > { %v6166_v60 = vpop.eup %4701  ;;  %4727 = vpow2.f32 %v4258_v16  ;;  %7641 = vst [vmem:[#allocation30_spill] sm:$0xff] %v6193_v20  ;;  %v6203_v39 = vpop.f32.mrf.mxu1 }
 0x241   : > { %7637 = vst [vmem:[#allocation26_spill] sm:$0xff] %v6166_v60  ;;  %v6174_v24 = vpop.eup %4703  ;;  %4729 = vpow2.f32 %v4259_v56  ;;  %7644 = vst [vmem:[#allocation33_spill] sm:$0xff] %v6209_v59  ;;  %v6212_v60 = vpop.f32.mrf.mxu0  ;;  %v4269_v48 = vmul.f32 -1.442695, %v6209_v59  ;;  %v4277_v21 = vmul.f32 -1.442695, %v6226_v25  ;;  %v6286_v59 = vadd.f32 %v6142_v62, %v6012_v14 }
 0x242   : > { %v6182_v4 = vpop.eup %4705  ;;  %4731 = vrcp.f32 %v2112_v23  ;;  %v6200_v23 = vadd.f32 %v6078_v26, %v6002_v49  ;;  %v4260_v26 = vmul.f32 -1.442695, %v6186_v8  ;;  %7647 = vst [vmem:[#allocation36_spill] sm:$0xff] %v6226_v25 }
 0x243   : > { %v6189_v16 = vpop.eup %4707  ;;  %4733 = vrcp.f32 %v2114_v13  ;;  %v4275_v13 = vmul.f32 -1.442695, %v6178_v61  ;;  %v6234_v0 = vpop.f32.mrf.mxu0  ;;  %7657 = vst [vmem:[#allocation46_spill] sm:$0xff] %v6286_v59 }
 0x244   : > { %v6196_v56 = vpop.eup %4709  ;;  %4735 = vrcp.f32 %v2119_v30  ;;  %7642 = vst [vmem:[#allocation31_spill] sm:$0xff] %v6200_v23  ;;  %v6328_v25 = vadd.f32 %v6234_v0, %v6012_v14 }
 0x245   : > { %v6205_v31 = vpop.eup %4711  ;;  %4737 = vrcp.f32 %v2120_v44  ;;  %v4261_v44 = vmul.f32 -1.442695, %v6193_v20  ;;  %v6240_v8 = vpop.f32.mrf.mxu0 }
 0x246   : > { %7643 = vst [vmem:[#allocation32_spill] sm:$0xff] %v6205_v31  ;;  %v6214_v30 = vpop.eup %4713  ;;  %4739 = vpow2.f32 %v4266_v40  ;;  %v6231_v31 = vpop.f32.mrf.mxu1  ;;  %7664 = vst [vmem:[#allocation53_spill] sm:$0xff] %v6328_v25 }
 0x247   : > { %7645 = vst [vmem:[#allocation34_spill] sm:$0xff] %v6214_v30  ;;  %v6221_v6 = vpop.eup %4715  ;;  %4741 = vpow2.f32 %v4267_v47  ;;  %v4268_v30 = vmul.f32 -1.442695, %v6200_v23  ;;  %v4276_v47 = vmul.f32 -1.442695, %v6219_v51  ;;  %v6321_v37 = vadd.f32 %v6231_v31, %v6007_v50 }
 0x248   : > { %v6228_v57 = vpop.eup %4717  ;;  %4743 = vpow2.f32 %v4274_v7  ;;  %v6238_v7 = vpop.f32.mrf.mxu1 }
 0x249   : > { %7648 = vst [vmem:[#allocation37_spill] sm:$0xff] %v6228_v57  ;;  %v4720_v40 = vpop.eup %4719  ;;  %4745 = vpow2.f32 %v4275_v13  ;;  %7662 = vst [vmem:[#allocation51_spill] sm:$0xff] %v6321_v37  ;;  %v6335_v31 = vadd.f32 %v6238_v7, %v5997_v45 }
 0x24a   : > { %v4722_v38 = vpop.eup %4721  ;;  %4747 = vpow2.f32 %v4260_v26  ;;  %v2127_v22 = vadd.f32 1.0, %v4720_v40  ;;  %v6244_v26 = vadd.f32 %v6114_v34, %v5997_v45 }
 0x24b   : > { %v4724_v2 = vpop.eup %4723  ;;  %4749 = vpow2.f32 %v4261_v44  ;;  %v2129_v28 = vadd.f32 1.0, %v4722_v38  ;;  %7666 = vst [vmem:[#allocation55_spill] sm:$0xff] %v6335_v31 }
 0x24c   : > { %v4726_v57 = vpop.eup %4725  ;;  %4751 = vpow2.f32 %v4268_v30  ;;  %v2128_v20 = vadd.f32 1.0, %v4724_v2  ;;  %7649 = vst [vmem:[#allocation38_spill] sm:$0xff] %v6244_v26  ;;  %v6250_v30 = vadd.f32 %v6135_v17, %v6007_v50  ;;  %v6256_v2 = vadd.f32 %v6149_v19, %v5997_v45  ;;  %v6266_v17 = vpop.f32.mrf.mxu0 }
 0x24d   : > { %v4728_v43 = vpop.eup %4727  ;;  %4753 = vpow2.f32 %v4269_v48  ;;  %v2130_v42 = vadd.f32 1.0, %v4726_v57  ;;  %v6258_v48 = vpop.f32.mrf.mxu1  ;;  %v6264_v57 = vadd.f32 %v6172_v3, %v6007_v50 }
 0x24e   : > { %v4730_v13 = vpop.eup %4729  ;;  %4755 = vpow2.f32 %v4276_v47  ;;  %7651 = vst [vmem:[#allocation40_spill] sm:$0xff] %v6250_v30  ;;  %v2135_v38 = vadd.f32 1.0, %v4728_v43  ;;  %7653 = vst [vmem:[#allocation42_spill] sm:$0xff] %v6256_v2  ;;  %v4283_v19 = vmul.f32 -1.442695, %v6250_v30  ;;  %v6349_v61 = vadd.f32 %v6258_v48, %v6007_v50 }
 0x24f   : > { %v6246_v44 = vpop.eup %4731  ;;  %4757 = vpow2.f32 %v4277_v21  ;;  %v2136_v47 = vadd.f32 1.0, %v4730_v13  ;;  %7655 = vst [vmem:[#allocation44_spill] sm:$0xff] %v6264_v57  ;;  %v6273_v13 = vpop.f32.mrf.mxu1  ;;  %v4291_v3 = vmul.f32 -1.442695, %v6264_v57 }
 0x250   : > { %7650 = vst [vmem:[#allocation39_spill] sm:$0xff] %v6246_v44  ;;  %v6252_v40 = vpop.eup %4733  ;;  %4759 = vrcp.f32 %v2127_v22  ;;  %v4282_v22 = vmul.f32 -1.442695, %v6244_v26  ;;  %7670 = vst [vmem:[#allocation59_spill] sm:$0xff] %v6349_v61 }
 0x251   : > { %7652 = vst [vmem:[#allocation41_spill] sm:$0xff] %v6252_v40  ;;  %v6260_v34 = vpop.eup %4735  ;;  %4761 = vrcp.f32 %v2129_v28  ;;  %v4290_v28 = vmul.f32 -1.442695, %v6256_v2 }
 0x252   : > { %7654 = vst [vmem:[#allocation43_spill] sm:$0xff] %v6260_v34  ;;  %v6268_v21 = vpop.eup %4737  ;;  %4763 = vrcp.f32 %v2128_v20  ;;  %v6276_v34 = vpop.f32.mrf.mxu0 }
 0x253   : > { %v4740_v43 = vpop.eup %4739  ;;  %4765 = vrcp.f32 %v2130_v42  ;;  %v6280_v42 = vadd.f32 %v6120_v35, %v6002_v49 }
 0x254   : > { %v4742_v40 = vpop.eup %4741  ;;  %4767 = vrcp.f32 %v2135_v38  ;;  %v2143_v20 = vadd.f32 1.0, %v4740_v43  ;;  %v6292_v43 = vadd.f32 %v6152_v5, %v6002_v49  ;;  %v1468_v62 = vpop.f32.mrf.mxu0  ;;  %v6307_v5 = vadd.f32 %v6203_v39, %v5997_v45 }
 0x255   : > { %v4744_v44 = vpop.eup %4743  ;;  %4769 = vrcp.f32 %v2136_v47  ;;  %7656 = vst [vmem:[#allocation45_spill] sm:$0xff] %v6280_v42  ;;  %v2144_v38 = vadd.f32 1.0, %v4742_v40  ;;  %v6300_v40 = vadd.f32 %v6180_v32, %v6012_v14 }
 0x256   : > { %v4746_v23 = vpop.eup %4745  ;;  %4771 = vpow2.f32 %v4282_v22  ;;  %v2151_v41 = vadd.f32 1.0, %v4744_v44  ;;  %7658 = vst [vmem:[#allocation47_spill] sm:$0xff] %v6292_v43  ;;  %v6294_v22 = vpop.f32.mrf.mxu1  ;;  %v4284_v44 = vmul.f32 -1.442695, %v6280_v42  ;;  %7660 = vst [vmem:[#allocation49_spill] sm:$0xff] %v6307_v5  ;;  %v6342_v42 = vadd.f32 %v6240_v8, %v6002_v49 }
 0x257   : > { %v6282_v54 = vpop.eup %4747  ;;  %4773 = vpow2.f32 %v4283_v19  ;;  %v2152_v51 = vadd.f32 1.0, %v4746_v23  ;;  %7659 = vst [vmem:[#allocation48_spill] sm:$0xff] %v6300_v40  ;;  %v4285_v23 = vmul.f32 -1.442695, %v6286_v59 }
 0x258   : > { %v6288_v47 = vpop.eup %4749  ;;  %4775 = vpow2.f32 %v4290_v28  ;;  %v1357_v39 = vpop.f32.mrf.mxu1  ;;  %7668 = vst [vmem:[#allocation57_spill] sm:$0xff] %v6342_v42  ;;  %v4308_v48 = vmul.f32 -1.442695, %v6342_v42 }
 0x259   : > { %v6296_v35 = vpop.eup %4751  ;;  %4777 = vpow2.f32 %v4291_v3  ;;  %v6314_v3 = vadd.f32 %v6212_v60, %v6002_v49  ;;  %v1470_v60 = vpop.f32.mrf.mxu0 }
 0x25a   : > { %v6302_v19 = vpop.eup %4753  ;;  %4779 = vrcp.f32 %v2143_v20  ;;  %v4292_v20 = vmul.f32 -1.442695, %v6292_v43  ;;  %v1359_v7 = vpop.f32.mrf.mxu1 }
 0x25b   : > { %v6309_v28 = vpop.eup %4755  ;;  %4781 = vrcp.f32 %v2144_v38  ;;  %7661 = vst [vmem:[#allocation50_spill] sm:$0xff] %v6314_v3  ;;  %v4293_v38 = vmul.f32 -1.442695, %v6300_v40  ;;  %v1472_v8 = vpop.f32.mrf.mxu0 }
 0x25c   : > { %v6316_v32 = vpop.eup %4757  ;;  %4783 = vrcp.f32 %v2151_v41  ;;  %v4298_v41 = vmul.f32 -1.442695, %v6307_v5 }
 0x25d   : > { %v6323_v52 = vpop.eup %4759  ;;  %4785 = vrcp.f32 %v2152_v51  ;;  %v4300_v51 = vmul.f32 -1.442695, %v6314_v3  ;;  %v1476_v40 = vpop.f32.mrf.mxu0 }
 0x25e   : > { %7663 = vst [vmem:[#allocation52_spill] sm:$0xff] %v6323_v52  ;;  %v6330_v18 = vpop.eup %4761  ;;  %4787 = vpow2.f32 %v4284_v44  ;;  %v4299_v44 = vmul.f32 -1.442695, %v6321_v37  ;;  %v6412_v5 = vadd.f32 %v1476_v40, %v6002_v49 }
 0x25f   : > { %7665 = vst [vmem:[#allocation54_spill] sm:$0xff] %v6330_v18  ;;  %v6337_v46 = vpop.eup %4763  ;;  %4789 = vpow2.f32 %v4285_v23  ;;  %v4301_v23 = vmul.f32 -1.442695, %v6328_v25  ;;  %v6377_v25 = vadd.f32 %v1468_v62, %v6012_v14 }
 0x260   : > { %7667 = vst [vmem:[#allocation56_spill] sm:$0xff] %v6337_v46  ;;  %v6344_v0 = vpop.eup %4765  ;;  %4791 = vpow2.f32 %v4292_v20  ;;  %v6356_v46 = vadd.f32 %v6266_v17, %v6012_v14  ;;  %v4306_v20 = vmul.f32 -1.442695, %v6335_v31 }
 0x261   : > { %7669 = vst [vmem:[#allocation58_spill] sm:$0xff] %v6344_v0  ;;  %v6351_v59 = vpop.eup %4767  ;;  %4793 = vpow2.f32 %v4293_v38  ;;  %v4307_v38 = vmul.f32 -1.442695, %v6349_v61  ;;  %7678 = vst [vmem:[#allocation67_spill] sm:$0xff] %v6377_v25 }
 0x262   : > { %7671 = vst [vmem:[#allocation60_spill] sm:$0xff] %v6351_v59  ;;  %7672 = vst [vmem:[#allocation61_spill] sm:$0xff] %v6356_v46  ;;  %v6358_v26 = vpop.eup %4769  ;;  %4795 = vpow2.f32 %v4298_v41  ;;  %v1363_v59 = vpop.f32.mrf.mxu1  ;;  %v4309_v17 = vmul.f32 -1.442695, %v6356_v46  ;;  %v6366_v41 = vadd.f32 %v6273_v13, %v5997_v45 }
 0x263   : > { %7673 = vst [vmem:[#allocation62_spill] sm:$0xff] %v6358_v26  ;;  %v4772_v0 = vpop.eup %4771  ;;  %4797 = vpow2.f32 %v4300_v51 }
 0x264   : > { %v4774_v43 = vpop.eup %4773  ;;  %4799 = vpow2.f32 %v4299_v44  ;;  %v2159_v3 = vadd.f32 1.0, %v4772_v0  ;;  %7674 = vst [vmem:[#allocation63_spill] sm:$0xff] %v6366_v41  ;;  %v6372_v44 = vadd.f32 %v6294_v22, %v6007_v50  ;;  %v1365_v0 = vpop.f32.mrf.mxu1  ;;  %v4314_v22 = vmul.f32 -1.442695, %v6366_v41 }
 0x265   : > { %v4776_v30 = vpop.eup %4775  ;;  %4801 = vpow2.f32 %v4301_v23  ;;  %v2160_v26 = vadd.f32 1.0, %v4774_v43  ;;  %v1478_v43 = vpop.f32.mrf.mxu0 }
 0x266   : > { %v4778_v2 = vpop.eup %4777  ;;  %4803 = vpow2.f32 %v4306_v20  ;;  %7676 = vst [vmem:[#allocation65_spill] sm:$0xff] %v6372_v44  ;;  %v2167_v23 = vadd.f32 1.0, %v4776_v30  ;;  %v6388_v30 = vadd.f32 %v1470_v60, %v6002_v49  ;;  %v4315_v62 = vmul.f32 -1.442695, %v6372_v44 }
 0x267   : > { %v6368_v51 = vpop.eup %4779  ;;  %4805 = vpow2.f32 %v4308_v48  ;;  %v2168_v13 = vadd.f32 1.0, %v4778_v2  ;;  %v6394_v2 = vadd.f32 %v1359_v7, %v6007_v50  ;;  %v6422_v18 = vadd.f32 %v1478_v43, %v6012_v14 }
 0x268   : > { %7675 = vst [vmem:[#allocation64_spill] sm:$0xff] %v6368_v51  ;;  %v6374_v57 = vpop.eup %4781  ;;  %4807 = vpow2.f32 %v4307_v38  ;;  %v6382_v51 = vadd.f32 %v1357_v39, %v5997_v45  ;;  %7681 = vst [vmem:[#allocation70_spill] sm:$0xff] %v6388_v30  ;;  %v4317_v39 = vmul.f32 -1.442695, %v6377_v25 }
 0x269   : > { %7677 = vst [vmem:[#allocation66_spill] sm:$0xff] %v6374_v57  ;;  %v6379_v20 = vpop.eup %4783  ;;  %4809 = vpow2.f32 %v4309_v17  ;;  %v1367_v57 = vpop.f32.mrf.mxu1  ;;  %v4323_v42 = vmul.f32 -1.442695, %v6394_v2 }
 0x26a   : > { %7679 = vst [vmem:[#allocation68_spill] sm:$0xff] %v6379_v20  ;;  %v6384_v48 = vpop.eup %4785  ;;  %4811 = vrcp.f32 %v2159_v3  ;;  %v6400_v3 = vadd.f32 %v1472_v8, %v6012_v14  ;;  %v4322_v60 = vmul.f32 -1.442695, %v6382_v51 }
 0x26b   : > { %7680 = vst [vmem:[#allocation69_spill] sm:$0xff] %v6384_v48  ;;  %v6390_v38 = vpop.eup %4787  ;;  %4813 = vrcp.f32 %v2160_v26  ;;  %v6406_v26 = vadd.f32 %v1363_v59, %v5997_v45  ;;  %v1480_v48 = vpop.f32.mrf.mxu0 }
 0x26c   : > { %v6396_v17 = vpop.eup %4789  ;;  %4815 = vrcp.f32 %v2167_v23  ;;  %7682 = vst [vmem:[#allocation71_spill] sm:$0xff] %v6400_v3  ;;  %v4324_v23 = vmul.f32 -1.442695, %v6388_v30  ;;  %v4325_v59 = vmul.f32 -1.442695, %v6400_v3 }
 0x26d   : > { %v6402_v20 = vpop.eup %4791  ;;  %4817 = vrcp.f32 %v2168_v13  ;;  %v6416_v13 = vadd.f32 %v1365_v0, %v6007_v50  ;;  %v4330_v40 = vmul.f32 -1.442695, %v6406_v26  ;;  %v1482_v46 = vpop.f32.mrf.mxu0  ;;  %v4332_v0 = vmul.f32 -1.442695, %v6412_v5 }
 0x26e   : > { %v6408_v7 = vpop.eup %4793  ;;  %4819 = vpow2.f32 %v4314_v22  ;;  %v1369_v22 = vpop.f32.mrf.mxu1 }
 0x26f   : > { %v4796_v8 = vpop.eup %4795  ;;  %4821 = vpow2.f32 %v4315_v62  ;;  %v6426_v62 = vadd.f32 %v1367_v57, %v5997_v45  ;;  %v4331_v43 = vmul.f32 -1.442695, %v6416_v13  ;;  %v4333_v45 = vmul.f32 -1.442695, %v6422_v18 }
 0x270   : > { %v6418_v37 = vpop.eup %4797  ;;  %4823 = vpow2.f32 %v4317_v39  ;;  %v6432_v39 = vadd.f32 %v1480_v48, %v6002_v49  ;;  %v6442_v57 = vadd.f32 %v1482_v46, %v6012_v14  ;;  %v6448_v48 = vadd.f32 %v6276_v34, %v6002_v49 }
 0x271   : > { %v4800_v36 = vpop.eup %4799  ;;  %4825 = vpow2.f32 %v4322_v60  ;;  %v6436_v60 = vadd.f32 %v1369_v22, %v6007_v50  ;;  %v6451_v50 = vpop.f32.mrf.mxu0 }
 0x272   : > { %v6428_v31 = vpop.eup %4801  ;;  %4827 = vpow2.f32 %v4324_v23  ;;  %v6444_v23 = vpop.f32.mrf.mxu1  ;;  %7683 = vst [vmem:[#allocation72_spill] sm:$0xff] %v6448_v48  ;;  %7684 = vst [vmem:[#allocation73_spill] sm:$0xff] %v6451_v50  ;;  %v4341_v49 = vmul.f32 -1.442695, %v6442_v57  ;;  %v4316_v41 = vmul.f32 -1.442695, %v6448_v48 }
 0x273   : > { %v4804_v52 = vpop.eup %4803  ;;  %4829 = vpow2.f32 %v4323_v42  ;;  %v4338_v42 = vmul.f32 -1.442695, %v6426_v62  ;;  %v4339_v14 = vmul.f32 -1.442695, %v6436_v60  ;;  %v2176_v44 = vadd.f32 1.0, %v4800_v36 }
 0x274   : > { %v6438_v1 = vpop.eup %4805  ;;  %4831 = vpow2.f32 %v4325_v59  ;;  %v4340_v59 = vmul.f32 -1.442695, %v6432_v39  ;;  %v6462_v34 = vpop.f32.mrf.mxu1 }
 0x275   : > { %v4808_v61 = vpop.eup %4807  ;;  %4833 = vpow2.f32 %v4330_v40  ;;  %7687 = vst [vmem:[#allocation76_spill] sm:$0xff] %v6462_v34 }
 0x276   : > { %v6453_v22 = vpop.eup %4809  ;;  %4835 = vpow2.f32 %v4332_v0  ;;  %v6467_v0 = vpop.f32.mrf.mxu0  ;;  %v2184_v3 = vadd.f32 1.0, %v4808_v61 }
 0x277   : > { %v6456_v25 = vpop.eup %4811  ;;  %4837 = vpow2.f32 %v4331_v43  ;;  %7689 = vst [vmem:[#allocation78_spill] sm:$0xff] %v6467_v0  ;;  %v6471_v50 = vpop.f32.mrf.mxu1 }
 0x278   : > { %7685 = vst [vmem:[#allocation74_spill] sm:$0xff] %v6456_v25  ;;  %v6459_v46 = vpop.eup %4813  ;;  %4839 = vpow2.f32 %v4333_v45  ;;  %v2175_v25 = vadd.f32 1.0, %v4796_v8  ;;  %v2183_v45 = vadd.f32 1.0, %v4804_v52  ;;  %7691 = vst [vmem:[#allocation80_spill] sm:$0xff] %v6471_v50 }
 0x279   : > { %7686 = vst [vmem:[#allocation75_spill] sm:$0xff] %v6459_v46  ;;  %v6464_v40 = vpop.eup %4815  ;;  %4841 = vpow2.f32 %v4338_v42 }
 0x27a   : > { %7688 = vst [vmem:[#allocation77_spill] sm:$0xff] %v6464_v40  ;;  %v6469_v30 = vpop.eup %4817  ;;  %4843 = vpow2.f32 %v4340_v59  ;;  %v6473_v40 = vpop.f32.mrf.mxu0 }
 0x27b   : > { %7690 = vst [vmem:[#allocation79_spill] sm:$0xff] %v6469_v30  ;;  %v4820_v43 = vpop.eup %4819  ;;  %4845 = vpow2.f32 %v4339_v14  ;;  %7692 = vst [vmem:[#allocation81_spill] sm:$0xff] %v6473_v40  ;;  %v6475_v14 = vpop.f32.mrf.mxu1 }
 0x27c   : > { %v4822_v46 = vpop.eup %4821  ;;  %4847 = vpow2.f32 %v4341_v49  ;;  %v2191_v0 = vadd.f32 1.0, %v4820_v43  ;;  %7693 = vst [vmem:[#allocation82_spill] sm:$0xff] %v6475_v14  ;;  %v6477_v30 = vpop.f32.mrf.mxu0 }
 0x27d   : > { %v4824_v34 = vpop.eup %4823  ;;  %4849 = vpow2.f32 %v4316_v41  ;;  %v2192_v8 = vadd.f32 1.0, %v4822_v46  ;;  %7694 = vst [vmem:[#allocation83_spill] sm:$0xff] %v6477_v30  ;;  %v6479_v43 = vpop.f32.mrf.mxu1 }
 0x27e   : > { %v4826_v42 = vpop.eup %4825  ;;  %4851 = vrcp.f32 %v2175_v25  ;;  %7695 = vst [vmem:[#allocation84_spill] sm:$0xff] %v6479_v43 }
 0x27f   : > { %v4828_v48 = vpop.eup %4827  ;;  %4853 = vrcp.f32 %v2176_v44  ;;  %v2199_v36 = vadd.f32 1.0, %v4826_v42 }
 0x280   : > { %v4830_v59 = vpop.eup %4829  ;;  %4855 = vrcp.f32 %v2183_v45  ;;  %v6481_v45 = vpop.f32.mrf.mxu0 }
 0x281   : > { %v4832_v52 = vpop.eup %4831  ;;  %4857 = vrcp.f32 %v2184_v3  ;;  %v2200_v49 = vadd.f32 1.0, %v4830_v59  ;;  %7696 = vst [vmem:[#allocation85_spill] sm:$0xff] %v6481_v45 }
 0x282   : > { %v4834_v61 = vpop.eup %4833  ;;  %4859 = vrcp.f32 %v2191_v0  ;;  %v6485_v50 = vpop.f32.mrf.mxu0 }
 0x283   : > { %v4836_v41 = vpop.eup %4835  ;;  %4861 = vrcp.f32 %v2192_v8  ;;  %v2207_v40 = vadd.f32 1.0, %v4834_v61  ;;  %v6483_v8 = vpop.f32.mrf.mxu1  ;;  %7697 = vst [vmem:[#allocation86_spill] sm:$0xff] %v6485_v50 }
 0x284   : > { %v4838_v25 = vpop.eup %4837  ;;  %4863 = vrcp.f32 %v2199_v36  ;;  %v2209_v36 = vadd.f32 1.0, %v4836_v41 }
 0x285   : > { %v4840_v44 = vpop.eup %4839  ;;  %4865 = vrcp.f32 %v2200_v49  ;;  %v2208_v46 = vadd.f32 1.0, %v4838_v25  ;;  %v2202_v25 = vadd.f32 1.0, %v4832_v52  ;;  %v2186_v52 = vadd.f32 1.0, %v6453_v22 }
 0x286   : > { %v4842_v42 = vpop.eup %4841  ;;  %4867 = vrcp.f32 %v2207_v40  ;;  %v2210_v3 = vadd.f32 1.0, %v4840_v44  ;;  %v2201_v44 = vadd.f32 1.0, %v4828_v48  ;;  %v2185_v48 = vadd.f32 1.0, %v6438_v1 }
 0x287   : > { %v4844_v59 = vpop.eup %4843  ;;  %4869 = vrcp.f32 %v2208_v46  ;;  %v2215_v30 = vadd.f32 1.0, %v4842_v42  ;;  %v2194_v42 = vadd.f32 1.0, %v4824_v34  ;;  %v2177_v1 = vadd.f32 1.0, %v6418_v37 }
 0x288   : > { %v4846_v14 = vpop.eup %4845  ;;  %4871 = vrcp.f32 %v2210_v3  ;;  %v2217_v0 = vadd.f32 1.0, %v4844_v59  ;;  %v6491_v3 = vpop.f32.mrf.mxu1 }
 0x289   : > { %v4848_v61 = vpop.eup %4847  ;;  %4873 = vrcp.f32 %v2215_v30  ;;  %v2216_v43 = vadd.f32 1.0, %v4846_v14  ;;  %v6495_v14 = vpop.f32.mrf.mxu0 }
 0x28a   : > { %v4850_v49 = vpop.eup %4849  ;;  %4875 = vrcp.f32 %v2217_v0  ;;  %v2218_v45 = vadd.f32 1.0, %v4848_v61  ;;  %7698 = vst [vmem:[#allocation87_spill] sm:$0xff] %v6495_v14  ;;  %v2178_v61 = vadd.f32 1.0, %v6428_v31  ;;  %v6510_v22 = vpop.f32.mrf.mxu1  ;;  %v7702_v14 = vsub.s32 6, %v5981_v55 }
 0x28b   : > { %v6487_v40 = vpop.eup %4851  ;;  %4877 = vrcp.f32 %v2216_v43  ;;  %v2193_v30 = vadd.f32 1.0, %v4850_v49  ;;  %7699 = vst [vmem:[#allocation88_spill] sm:$0xff] %v6510_v22  ;;  %v2170_v43 = vadd.f32 1.0, %v6408_v7  ;;  %v7701_v49 = vsub.s32 4, %v5981_v55 }
 0x28c   : > { %v6489_v46 = vpop.eup %4853  ;;  %4879 = vrcp.f32 %v2218_v45  ;;  %v6529_v37 = vrot.slane %v5989_v11, %v7702_v14  ;;  %v7703_v7 = vsub.s32 5, %v5981_v55  ;;  %v6545_v14 = vadd.f32 1.0, %v6146_v10 }
 0x28d   : > { %v6493_v59 = vpop.eup %4855  ;;  %4881 = vrcp.f32 %v2209_v36  ;;  %v6524_v36 = vrot.slane %v5989_v11, %v7701_v49  ;;  %v6542_v49 = vpop.f32.mrf.mxu1  ;;  %v6548_v22 = vadd.f32 1.0, %v6154_v33  ;;  %v2154_v10 = vadd.f32 1.0, %v6316_v32 }
 0x28e   : > { %v6497_v41 = vpop.eup %4857  ;;  %4883 = vrcp.f32 %v2202_v25  ;;  %v6564_v33 = vmul.f32 %v6182_v4, %v6028_v53 }
 0x28f   : > { %v6500_v0 = vpop.eup %4859  ;;  %4885 = vrcp.f32 %v2201_v44  ;;  %v6515_v44 = vpop.f32.mrf.mxu0 }
 0x290   : > { %v6505_v45 = vpop.eup %4861  ;;  %4887 = vrcp.f32 %v2194_v42  ;;  %7700 = vst [vmem:[#allocation89_spill] sm:$0xff] %v6515_v44  ;;  %v2169_v42 = vadd.f32 1.0, %v6402_v20  ;;  %v2162_v44 = vadd.f32 1.0, %v6396_v17  ;;  %v7704_v20 = vsub.s32 7, %v5981_v55  ;;  %v6580_v53 = vpop.f32.mrf.mxu1 }
 0x291   : > { %v6512_v25 = vpop.eup %4863  ;;  %4889 = vrcp.f32 %v2193_v30  ;;  %v2161_v17 = vadd.f32 1.0, %v6390_v38  ;;  %v6555_v55 = vmul.f32 %v6160_v12, %v6015_v15  ;;  %v6568_v38 = vmul.f32 %v6189_v16, %v6032_v58 }
 0x292   : > { %v6517_v34 = vpop.eup %4865  ;;  %4891 = vrcp.f32 %v2186_v52  ;;  %v6535_v52 = vrot.slane %v5989_v11, %v7703_v7  ;;  %v6577_v12 = vmul.f32 %v6221_v6, %v6056_v9  ;;  %v2145_v58 = vadd.f32 1.0, %v6296_v35 }
 0x293   : > { %v4868_v31 = vpop.eup %4867  ;;  %4893 = vrcp.f32 %v2185_v48  ;;  %v6540_v48 = vrot.slane %v5989_v11, %v7704_v20  ;;  %v6559_v11 = vmul.f32 %v6174_v24, %v6021_v27  ;;  %v6573_v27 = vmul.f32 %v6196_v56, %v6040_v63 }
 0x294   : > { %v4870_v30 = vpop.eup %4869  ;;  %4895 = vrcp.f32 %v2178_v61  ;;  %v6551_v61 = vpop.f32.mrf.mxu0  ;;  %v2146_v24 = vadd.f32 1.0, %v6302_v19  ;;  %v2138_v63 = vadd.f32 1.0, %v6288_v47  ;;  %v7561_v56 = vmov 0.0  }
 0x295   : > { %v4872_v50 = vpop.eup %4871  ;;  %4897 = vrcp.f32 %v2177_v1  ;;  %v2153_v1 = vadd.f32 1.0, %v6309_v28  ;;  %2680 = vmatprep.mubr.f32.mxu1 %v7561_v56  ;;  %2751 = vmatprep.mubr.f32.mxu0 %v7561_v56  ;;  %v2137_v35 = vadd.f32 1.0, %v6282_v54 }
 0x296   : > { %v4874_v7 = vpop.eup %4873  ;;  %4899 = vrcp.f32 %v2170_v43  ;;  %v6584_v28 = vpop.f32.mrf.mxu0 }
 0x297   : > { %v4876_v20 = vpop.eup %4875  ;;  %4901 = vrcp.f32 %v2169_v42  ;;  %v2599_v6 = vmul.f32 %v4874_v7, %v6426_v62  ;;  %v6596_v62 = vmul.f32 %v6268_v21, %v6088_v29  ;;  %v6600_v42 = vpop.f32.mrf.mxu1  ;;  %v6607_v29 = vadd.f32 %v6444_v23, %v6524_v36  ;;  %v7709_v23 = vld [vmem:[#allocation65_spill] sm:$0xff] }
 0x298   : > { %v4878_v15 = vpop.eup %4877  ;;  %4903 = vrcp.f32 %v2162_v44  ;;  %v2601_v43 = vmul.f32 %v4876_v20, %v6432_v39  ;;  %v2594_v44 = vmul.f32 %v4872_v50, %v6422_v18  ;;  %v6609_v21 = vpop.f32.mrf.mxu0  ;;  %v7706_v50 = vld [vmem:[#allocation71_spill] sm:$0xff] }
 0x299   : > { %v4880_v4 = vpop.eup %4879  ;;  %4905 = vrcp.f32 %v2161_v17  ;;  %v2600_v16 = vmul.f32 %v4878_v15, %v6436_v60  ;;  %v2592_v60 = vmul.f32 %v4870_v30, %v6416_v13  ;;  %v2584_v13 = vmul.f32 %v6517_v34, %v6394_v2  ;;  %7705 = vst [vmem:[#allocation90_spill] sm:$0xff] %v6607_v29  ;;  %v7707_v30 = vld [vmem:[#allocation73_spill] sm:$0xff]  ;;  %v7710_v17 = vld [vmem:[#allocation70_spill] sm:$0xff]  ;;  %v7714_v15 = vld [vmem:[#allocation67_spill] sm:$0xff] }
 0x29a   : > { %v4882_v32 = vpop.eup %4881  ;;  %4907 = vrcp.f32 %v2154_v10  ;;  %v2602_v9 = vmul.f32 %v4880_v4, %v6442_v57  ;;  %v2591_v57 = vmul.f32 %v4868_v31, %v6406_v26  ;;  %v2583_v26 = vmul.f32 %v6512_v25, %v6382_v51  ;;  %v7711_v10 = vld [vmem:[#allocation76_spill] sm:$0xff]  ;;  %v7713_v25 = vld [vmem:[#allocation63_spill] sm:$0xff] }
 0x29b   : > { %v4884_v19 = vpop.eup %4883  ;;  %4909 = vrcp.f32 %v2153_v1  ;;  %2616 = vmatprep.subr.mxu1 %v2600_v16  ;;  %v2593_v39 = vmul.f32 %v4882_v32, %v6412_v5  ;;  %v6616_v2 = vadd.f32 %v7707_v30, %v6529_v37  ;;  %v2576_v34 = vmul.f32 %v6505_v45, %v7709_v23  ;;  %v7715_v4 = vld [vmem:[#allocation80_spill] sm:$0xff]  ;;  %v6633_v45 = vpop.f32.mrf.mxu1  ;;  %v7717_v32 = vld [vmem:[#allocation59_spill] sm:$0xff]  ;;  %v7728_v30 = vld [vmem:[#allocation57_spill] sm:$0xff] }
 0x29c   : > { %v4886_v47 = vpop.eup %4885  ;;  %4911 = vrcp.f32 %v2146_v24  ;;  %2687 = vmatprep.subr.mxu0 %v2602_v9  ;;  %2617 = vmatpush1.msra.mxu1 %v2599_v6  ;;  %v2586_v31 = vmul.f32 %v4884_v19, %v7706_v50  ;;  %v6623_v20 = vadd.f32 %v7711_v10, %v6535_v52  ;;  %v2575_v1 = vmul.f32 %v6500_v0, %v7713_v25  ;;  %v7719_v0 = vld [vmem:[#allocation82_spill] sm:$0xff]  ;;  %v6643_v19 = vpop.f32.mrf.mxu0  ;;  %v7727_v50 = vld [vmem:[#allocation51_spill] sm:$0xff] }
 0x29d   : > { %v4888_v54 = vpop.eup %4887  ;;  %4913 = vrcp.f32 %v2145_v58  ;;  %2688 = vmatpush1.msra.mxu0 %v2601_v43  ;;  %2618 = vmatprep.subr.mxu1 %v2592_v60  ;;  %7708 = vst [vmem:[#allocation71_spill] sm:$0xff] %v6616_v2  ;;  %v2585_v7 = vmul.f32 %v4886_v47, %v7710_v17  ;;  %v6631_v58 = vadd.f32 %v7715_v4, %v6524_v36  ;;  %v7721_v60 = vld [vmem:[#allocation18_spill] sm:$0xff]  ;;  %v7722_v43 = vld [vmem:[#allocation52_spill] sm:$0xff]  ;;  %v6665_v25 = vmul.f32 -1.442695, %v6616_v2 }
 0x29e   : > { %v4890_v18 = vpop.eup %4889  ;;  %4915 = vrcp.f32 %v2138_v63  ;;  %2689 = vmatprep.subr.mxu0 %v2594_v44  ;;  %2619 = vmatpush1.msra.mxu1 %v2591_v57  ;;  %7712 = vst [vmem:[#allocation73_spill] sm:$0xff] %v6623_v20  ;;  %v2578_v24 = vmul.f32 %v4888_v54, %v7714_v15  ;;  %v2568_v63 = vmul.f32 %v6497_v41, %v7717_v32  ;;  %v7723_v57 = vld [vmem:[#allocation55_spill] sm:$0xff]  ;;  %v7724_v44 = vld [vmem:[#allocation61_spill] sm:$0xff]  ;;  %v4222_v54 = vmul.f32 -1.442695, %v6607_v29  ;;  %v6668_v15 = vpop.f32.mrf.mxu1  ;;  %v7733_v32 = vld [vmem:[#allocation50_spill] sm:$0xff] }
 0x29f   : > { %v4892_v5 = vpop.eup %4891  ;;  %4917 = vrcp.f32 %v2137_v35  ;;  %2690 = vmatpush1.msra.mxu0 %v2593_v39  ;;  %2620 = vmatprep.subr.mxu1 %v2584_v13  ;;  %7716 = vst [vmem:[#allocation65_spill] sm:$0xff] %v6631_v58  ;;  %v6641_v9 = vadd.f32 %v7719_v0, %v6535_v52  ;;  %v6647_v47 = vmul.f32 %v7722_v43, %v7721_v60  ;;  %v7725_v39 = vld [vmem:[#allocation19_spill] sm:$0xff]  ;;  %v7736_v60 = vld [vmem:[#allocation42_spill] sm:$0xff]  ;;  %v7737_v43 = vld [vmem:[#allocation77_spill] sm:$0xff] }
 0x2a0   : > { %v4894_v51 = vpop.eup %4893  ;;  %4919 = vrcp.f32 %v6545_v14  ;;  %2691 = vmatprep.subr.mxu0 %v2586_v31  ;;  %2621 = vmatpush1.msra.mxu1 %v2583_v26  ;;  %v7718_v14 = vld [vmem:[#allocation72_spill] sm:$0xff]  ;;  %v2570_v41 = vmul.f32 %v4892_v5, %v7724_v44  ;;  %v2560_v31 = vmul.f32 %v6489_v46, %v7727_v50  ;;  %v7729_v5 = vld [vmem:[#allocation49_spill] sm:$0xff]  ;;  %v7742_v50 = vld [vmem:[#allocation75_spill] sm:$0xff] }
 0x2a1   : > { %v4896_v16 = vpop.eup %4895  ;;  %4921 = vrcp.f32 %v6548_v22  ;;  %v2577_v6 = vmul.f32 %v4890_v18, %v7718_v14  ;;  %7720 = vst [vmem:[#allocation70_spill] sm:$0xff] %v6641_v9  ;;  %2692 = vmatpush1.msra.mxu0 %v2585_v7  ;;  %2622 = vmatprep.subr.mxu1 %v2576_v34  ;;  %v2567_v22 = vmul.f32 %v6493_v59, %v7723_v57  ;;  %v7726_v18 = vld [vmem:[#allocation54_spill] sm:$0xff]  ;;  %v4223_v34 = vmul.f32 -1.442695, %v6623_v20  ;;  %v7730_v7 = vld [vmem:[#allocation53_spill] sm:$0xff] }
 0x2a2   : > { %v4898_v35 = vpop.eup %4897  ;;  %2693 = vmatprep.subr.mxu0 %v2578_v24  ;;  %2623 = vmatpush1.msra.mxu1 %v2575_v1  ;;  %v6655_v26 = vmul.f32 %v7726_v18, %v7725_v39  ;;  %v2569_v23 = vmul.f32 %v4894_v51, %v7728_v30  ;;  %v2559_v17 = vmul.f32 %v6487_v40, %v7729_v5  ;;  %v4230_v1 = vmul.f32 -1.442695, %v6631_v58  ;;  %v7731_v51 = vld [vmem:[#allocation44_spill] sm:$0xff]  ;;  %v7732_v24 = vld [vmem:[#allocation79_spill] sm:$0xff]  ;;  %v7734_v14 = vld [vmem:[#allocation78_spill] sm:$0xff] }
 0x2a3   : > { %v4900_v13 = vpop.eup %4899  ;;  %2694 = vmatpush1.msra.mxu0 %v2577_v6  ;;  %2624 = vmatprep.subr.mxu1 %v2568_v63  ;;  %v2562_v10 = vmul.f32 %v4896_v16, %v7730_v7  ;;  %v2552_v4 = vmul.f32 %v7732_v24, %v7731_v51  ;;  %v2561_v63 = vmul.f32 %v4898_v35, %v7733_v32  ;;  %v4231_v16 = vmul.f32 -1.442695, %v6641_v9  ;;  %v6678_v6 = vpop.f32.mrf.mxu0  ;;  %v7741_v18 = vld [vmem:[#allocation40_spill] sm:$0xff]  ;;  %v7743_v5 = vld [vmem:[#allocation47_spill] sm:$0xff]  ;;  %v7746_v7 = vld [vmem:[#allocation74_spill] sm:$0xff] }
 0x2a4   : > { %v4902_v59 = vpop.eup %4901  ;;  %2695 = vmatprep.subr.mxu0 %v2570_v41  ;;  %2625 = vmatpush1.msra.mxu1 %v2567_v22  ;;  %v6675_v40 = vadd.f32 %v7734_v14, %v6540_v48  ;;  %v2551_v57 = vmul.f32 %v7737_v43, %v7736_v60  ;;  %v7738_v22 = vld [vmem:[#allocation48_spill] sm:$0xff]  ;;  %4923 = vpow2.f32 %v4222_v54  ;;  %v2544_v30 = vmul.f32 %v7742_v50, %v7741_v18  ;;  %v7747_v24 = vld [vmem:[#allocation46_spill] sm:$0xff]  ;;  %v6701_v32 = vpop.f32.mrf.mxu1 }
 0x2a5   : > { %v4904_v46 = vpop.eup %4903  ;;  %2696 = vmatpush1.msra.mxu0 %v2569_v23  ;;  %2626 = vmatprep.subr.mxu1 %v2560_v31  ;;  %v2554_v44 = vmul.f32 %v4900_v13, %v7738_v22  ;;  %v7739_v41 = vld [vmem:[#allocation84_spill] sm:$0xff]  ;;  %v2553_v23 = vmul.f32 %v4902_v59, %v7743_v5  ;;  %4925 = vpow2.f32 %v4223_v34  ;;  %v6692_v31 = vadd.f32 %v6483_v8, %v6535_v52  ;;  %v7745_v13 = vld [vmem:[#allocation38_spill] sm:$0xff]  ;;  %v7750_v59 = vld [vmem:[#allocation69_spill] sm:$0xff] }
 0x2a6   : > { %7735 = vst [vmem:[#allocation76_spill] sm:$0xff] %v6675_v40  ;;  %v4906_v0 = vpop.eup %4905  ;;  %v6685_v35 = vadd.f32 %v7739_v41, %v6524_v36  ;;  %2697 = vmatprep.subr.mxu0 %v2562_v10  ;;  %2627 = vmatpush1.msra.mxu1 %v2559_v17  ;;  %v2543_v51 = vmul.f32 %v7746_v7, %v7745_v13  ;;  %4927 = vpow2.f32 %v4230_v1  ;;  %v7749_v8 = vld [vmem:[#allocation28_spill] sm:$0xff]  ;;  %v6710_v1 = vpop.f32.mrf.mxu0  ;;  %v7759_v13 = vld [vmem:[#allocation21_spill] sm:$0xff]  ;;  %v7760_v7 = vld [vmem:[#allocation58_spill] sm:$0xff] }
 0x2a7   : > { %v4908_v39 = vpop.eup %4907  ;;  %7744 = vst [vmem:[#allocation67_spill] sm:$0xff] %v6692_v31  ;;  %2698 = vmatpush1.msra.mxu0 %v2561_v63  ;;  %2628 = vmatprep.subr.mxu1 %v2552_v4  ;;  %v2546_v10 = vmul.f32 %v4904_v46, %v7747_v24  ;;  %v6699_v17 = vadd.f32 %v6491_v3, %v6524_v36  ;;  %v7751_v4 = vld [vmem:[#allocation45_spill] sm:$0xff]  ;;  %4929 = vpow2.f32 %v4231_v16  ;;  %v7752_v60 = vld [vmem:[#allocation88_spill] sm:$0xff]  ;;  %v7776_v2 = vld [vmem:[#allocation30_spill] sm:$0xff] }
 0x2a8   : > { %7740 = vst [vmem:[#allocation63_spill] sm:$0xff] %v6685_v35  ;;  %v4910_v54 = vpop.eup %4909  ;;  %2699 = vmatprep.subr.mxu0 %v2554_v44  ;;  %2629 = vmatpush1.msra.mxu1 %v2551_v57  ;;  %v2536_v63 = vmul.f32 %v7750_v59, %v7749_v8  ;;  %v2545_v14 = vmul.f32 %v4906_v0, %v7751_v4  ;;  %v7754_v46 = vld [vmem:[#allocation20_spill] sm:$0xff]  ;;  %v7756_v57 = vld [vmem:[#allocation27_spill] sm:$0xff]  ;;  %v4238_v0 = vmul.f32 -1.442695, %v6685_v35  ;;  %v7761_v8 = vld [vmem:[#allocation25_spill] sm:$0xff] }
 0x2a9   : > { %7748 = vst [vmem:[#allocation80_spill] sm:$0xff] %v6699_v17  ;;  %v4912_v34 = vpop.eup %4911  ;;  %v6708_v43 = vadd.f32 %v7752_v60, %v6535_v52  ;;  %2700 = vmatpush1.msra.mxu0 %v2553_v23  ;;  %2630 = vmatprep.subr.mxu1 %v2544_v30  ;;  %v7755_v22 = vld [vmem:[#allocation56_spill] sm:$0xff]  ;;  %v2514_v24 = vmul.f32 %v7760_v7, %v7759_v13  ;;  %v7762_v23 = vld [vmem:[#allocation66_spill] sm:$0xff]  ;;  %v7763_v59 = vld [vmem:[#allocation35_spill] sm:$0xff]  ;;  %v4239_v60 = vmul.f32 -1.442695, %v6692_v31  ;;  %v6732_v7 = vpop.f32.mrf.mxu1 }
 0x2aa   : > { %v4914_v3 = vpop.eup %4913  ;;  %v2512_v44 = vmul.f32 %v7755_v22, %v7754_v46  ;;  %v7757_v41 = vld [vmem:[#allocation68_spill] sm:$0xff]  ;;  %2701 = vmatprep.subr.mxu0 %v2546_v10  ;;  %2631 = vmatpush1.msra.mxu1 %v2543_v51  ;;  %v2528_v30 = vmul.f32 %v7762_v23, %v7761_v8  ;;  %v2537_v4 = vmul.f32 %v4910_v54, %v7763_v59  ;;  %v7767_v51 = vld [vmem:[#allocation81_spill] sm:$0xff]  ;;  %v4246_v13 = vmul.f32 -1.442695, %v6699_v17  ;;  %v7771_v23 = vld [vmem:[#allocation31_spill] sm:$0xff] }
 0x2ab   : > { %7753 = vst [vmem:[#allocation59_spill] sm:$0xff] %v6708_v43  ;;  %v2535_v18 = vmul.f32 %v7757_v41, %v7756_v57  ;;  %v7758_v50 = vld [vmem:[#allocation36_spill] sm:$0xff]  ;;  %v4916_v16 = vpop.eup %4915  ;;  %2702 = vmatpush1.msra.mxu0 %v2545_v14  ;;  %2632 = vmatprep.subr.mxu1 %v2536_v63  ;;  %v7766_v41 = vld [vmem:[#allocation33_spill] sm:$0xff]  ;;  %v7769_v14 = vld [vmem:[#allocation23_spill] sm:$0xff]  ;;  %v2529_v59 = vmul.f32 %v4914_v3, %v7771_v23  ;;  %4931 = vpow2.f32 %v4238_v0 }
 0x2ac   : > { %v2538_v5 = vmul.f32 %v4908_v39, %v7758_v50  ;;  %v4918_v46 = vpop.eup %4917  ;;  %v7764_v22 = vld [vmem:[#allocation24_spill] sm:$0xff]  ;;  %v2530_v10 = vmul.f32 %v4912_v34, %v7766_v41  ;;  %v6729_v50 = vadd.f32 %v7767_v51, %v6529_v37  ;;  %v7770_v63 = vld [vmem:[#allocation62_spill] sm:$0xff]  ;;  %v6742_v41 = vpop.f32.mrf.mxu0  ;;  %v2522_v29 = vmul.f32 %v4916_v16, %v7776_v2  ;;  %v7782_v0 = vld [vmem:[#allocation87_spill] sm:$0xff] }
 0x2ad   : > { %v7765_v39 = vld [vmem:[#allocation64_spill] sm:$0xff]  ;;  %2633 = vmatpush1.msra.mxu1 %v2535_v18  ;;  %v4920_v54 = vpop.eup %4919  ;;  %v2520_v8 = vmul.f32 %v7770_v63, %v7769_v14  ;;  %v7777_v14 = vld [vmem:[#allocation85_spill] sm:$0xff]  ;;  %4933 = vpow2.f32 %v4239_v60  ;;  %v6761_v16 = vadd.f32 %v7782_v0, %v6529_v37 }
 0x2ae   : > { %v2527_v57 = vmul.f32 %v7765_v39, %v7764_v22  ;;  %7768 = vst [vmem:[#allocation72_spill] sm:$0xff] %v6729_v50  ;;  %2703 = vmatprep.subr.mxu0 %v2538_v5  ;;  %v7772_v22 = vld [vmem:[#allocation83_spill] sm:$0xff]  ;;  %v4247_v39 = vmul.f32 -1.442695, %v6708_v43  ;;  %2634 = vmatprep.subr.mxu1 %v2528_v30  ;;  %v4922_v51 = vpop.eup %4921  ;;  %v7774_v5 = vld [vmem:[#allocation22_spill] sm:$0xff]  ;;  %v7775_v18 = vld [vmem:[#allocation60_spill] sm:$0xff]  ;;  %v6749_v3 = vadd.f32 %v7777_v14, %v6529_v37  ;;  %4935 = vpow2.f32 %v4246_v13 }
 0x2af   : > { %v6739_v34 = vadd.f32 %v7772_v22, %v6540_v48  ;;  %2704 = vmatpush1.msra.mxu0 %v2537_v4  ;;  %v2519_v56 = vmul.f32 %v7775_v18, %v7774_v5  ;;  %v7779_v63 = vld [vmem:[#allocation29_spill] sm:$0xff]  ;;  %v4225_v22 = vmul.f32 -1.442695, %v6675_v40  ;;  %v7780_v30 = vld [vmem:[#allocation86_spill] sm:$0xff]  ;;  %v4232_v2 = vmul.f32 -1.442695, %v6729_v50 }
 0x2b0   : > { %7778 = vst [vmem:[#allocation18_spill] sm:$0xff] %v6749_v3  ;;  %2705 = vmatprep.subr.mxu0 %v2530_v10  ;;  %2635 = vmatpush1.msra.mxu1 %v2527_v57  ;;  %v2521_v23 = vmul.f32 %v4918_v46, %v7779_v63  ;;  %v6756_v4 = vadd.f32 %v7780_v30, %v6540_v48  ;;  %7783 = vst [vmem:[#allocation55_spill] sm:$0xff] %v6761_v16  ;;  %v6763_v57 = vpop.f32.mrf.mxu1  ;;  %v7784_v46 = vlaneseq  ;;  %4937 = vpow2.f32 %v4247_v39  ;;  %v7785_v5 = vld [vmem:[#allocation89_spill] sm:$0xff]  ;;  %v7787_v18 = vld [vmem:[#allocation15_spill] sm:$0xff] }
 0x2b1   : > { %7773 = vst [vmem:[#allocation82_spill] sm:$0xff] %v6739_v34  ;;  %2706 = vmatpush1.msra.mxu0 %v2529_v59  ;;  %2636 = vmatprep.subr.mxu1 %v2520_v8  ;;  %v4233_v60 = vmul.f32 -1.442695, %v6739_v34  ;;  %v6769_v59 = vadd.f32 %v7785_v5, %v6540_v48  ;;  %v6771_v8 = vpop.f32.mrf.mxu0  ;;  %v2610_v13 = vstv %s4346_s3  ;;  %v7788_v14 = vld [vmem:[#allocation43_spill] sm:$0xff]  ;;  %v7789_v30 = vld [vmem:[#allocation17_spill] sm:$0xff]  ;;  %4939 = vpow2.f32 %v6665_v25  ;;  %v4924_v39 = vpop.eup %4923  ;;  %v7792_v40 = vld [vmem:[#allocation16_spill] sm:$0xff] }
 0x2b2   : > { %7781 = vst [vmem:[#allocation52_spill] sm:$0xff] %v6756_v4  ;;  %2707 = vmatprep.subr.mxu0 %v2522_v29  ;;  %2637 = vmatpush1.msra.mxu1 %v2519_v56  ;;  %v2609_v10 = vand.u32 127, %v7784_v46  ;;  %v2503_v63 = vmul.f32 %v7788_v14, %v7787_v18  ;;  %v2506_v29 = vmul.f32 %v4922_v51, %v7789_v30  ;;  %v4240_v56 = vmul.f32 -1.442695, %v6749_v3  ;;  %v7790_v0 = vld [vmem:[#allocation13_spill] sm:$0xff]  ;;  %v7791_v46 = vld [vmem:[#allocation39_spill] sm:$0xff]  ;;  %v4926_v51 = vpop.eup %4925 }
 0x2b3   : > { %7786 = vst [vmem:[#allocation61_spill] sm:$0xff] %v6769_v59  ;;  %2708 = vmatpush1.msra.mxu0 %v2521_v23  ;;  %2638 = vmatprep.subr.mxu1 %v2512_v44  ;;  %v2496_v5 = vmul.f32 %v7791_v46, %v7790_v0  ;;  %v2505_v23 = vmul.f32 %v4920_v54, %v7792_v40  ;;  %4941 = vpow2.f32 %v4225_v22  ;;  %v4241_v44 = vmul.f32 -1.442695, %v6756_v4  ;;  %v7793_v25 = vld [vmem:[#allocation14_spill] sm:$0xff]  ;;  %v7794_v18 = vld [vmem:[#allocation41_spill] sm:$0xff]  ;;  %v4928_v40 = vpop.eup %4927  ;;  %v7797_v22 = vld [vmem:[#allocation32_spill] sm:$0xff] }
 0x2b4   : > { %2709 = vmatprep.subr.mxu0 %v2514_v24  ;;  %2639 = vmatpush1.msra.mxu1 %v6647_v47  ;;  %v2498_v14 = vmul.f32 %v7794_v18, %v7793_v25  ;;  %4943 = vpow2.f32 %v4232_v2  ;;  %v4248_v47 = vmul.f32 -1.442695, %v6761_v16  ;;  %v6788_v24 = vpop.f32.mrf.mxu1  ;;  %v6790_v30 = vadd.s32 %v2610_v13, %v2609_v10  ;;  %v7796_v54 = vld [vmem:[#allocation10_spill] sm:$0xff]  ;;  %v7799_v46 = vld [vmem:[#allocation37_spill] sm:$0xff]  ;;  %v6797_v25 = vpop.f32.mrf.mxu0  ;;  %v7800_v18 = vld [vmem:[#allocation11_spill] sm:$0xff] }
 0x2b5   : > { %2710 = vmatpush1.msra.mxu0 %v6655_v26  ;;  %2640 = vmatprep.subr.mxu1 %v6596_v62  ;;  %v2488_v0 = vmul.f32 %v7797_v22, %v7796_v54  ;;  %v7798_v26 = vld [vmem:[#allocation12_spill] sm:$0xff]  ;;  %4945 = vpow2.f32 %v4233_v60  ;;  %v4249_v50 = vmul.f32 -1.442695, %v6769_v59  ;;  %v4930_v2 = vpop.eup %4929  ;;  %v2099_v10 = vadd.f32 1.0, %v4924_v39 }
 0x2b6   : > { %2711 = vmatprep.subr.mxu0 %v2506_v29  ;;  %2641 = vmatpush1.msra.mxu1 %v2503_v63  ;;  %7795 = vst [vmem:[#allocation19_spill] sm:$0xff] %v6790_v30  ;;  %v2497_v62 = vmul.f32 %v7799_v46, %v7798_v26  ;;  %v7801_v29 = vld [vmem:[#allocation34_spill] sm:$0xff]  ;;  %4947 = vpow2.f32 %v4240_v56  ;;  %v6803_v13 = vadd.f32 %v6542_v49, %v6524_v36  ;;  %v2100_v60 = vadd.f32 1.0, %v4926_v51  ;;  %v6814_v39 = vpop.f32.mrf.mxu1  ;;  %v7805_v49 = vld [vmem:[#allocation9_spill] sm:$0xff] }
 0x2b7   : > { %2712 = vmatpush1.msra.mxu0 %v2505_v23  ;;  %2642 = vmatprep.subr.mxu1 %v2496_v5  ;;  %v2490_v63 = vmul.f32 %v7801_v29, %v7800_v18  ;;  %4949 = vpow2.f32 %v4241_v44  ;;  %v6808_v54 = vadd.f32 %v6580_v53, %v6535_v52  ;;  %v6812_v5 = vadd.f32 %v6600_v42, %v6524_v36  ;;  %v6824_v44 = vpop.f32.mrf.mxu0 }
 0x2b8   : > { %7802 = vst [vmem:[#allocation54_spill] sm:$0xff] %v6803_v13  ;;  %2713 = vmatprep.subr.mxu0 %v2498_v14  ;;  %2643 = vmatpush1.msra.mxu1 %v6577_v12  ;;  %v2107_v56 = vadd.f32 1.0, %v4928_v40  ;;  %4951 = vpow2.f32 %v4248_v47  ;;  %vm2612_vm1 = vcmp.lt.s32.totalorder %v6790_v30, 576  ;;  %v7806_v12 = vld [vmem:[#allocation26_spill] sm:$0xff]  ;;  %v2108_v53 = vadd.f32 1.0, %v4930_v2  ;;  %v4932_v51 = vpop.eup %4931  ;;  %v6836_v14 = vpop.f32.mrf.mxu1 }
 0x2b9   : > { %7803 = vst [vmem:[#allocation51_spill] sm:$0xff] %v6808_v54  ;;  %7804 = vst [vmem:[#allocation57_spill] sm:$0xff] %v6812_v5  ;;  %2714 = vmatpush1.msra.mxu0 %v2497_v62  ;;  %2644 = vmatprep.subr.mxu1 %v2488_v0  ;;  %v2481_v23 = vmul.f32 %v7806_v12, %v7805_v49  ;;  %4953 = vpow2.f32 %v4249_v50  ;;  %v6822_v42 = vadd.f32 %v6633_v45, %v6535_v52  ;;  %v7567_v45 = vmov 1.0   ;;  %v6843_v40 = vpop.f32.mrf.mxu0 }
 0x2ba   : > { %2715 = vmatprep.subr.mxu0 %v2490_v63  ;;  %2645 = vmatpush1.msra.mxu1 %v6568_v38  ;;  %4955 = vrcp.f32 %v2099_v10  ;;  %v4254_v38 = vmul.f32 -1.442695, %v6803_v13  ;;  %v4255_v50 = vmul.f32 -1.442695, %v6808_v54  ;;  %v2115_v0 = vadd.f32 1.0, %v4932_v51  ;;  %v6862_v10 = vpop.f32.mrf.mxu1 }
 0x2bb   : > { %7807 = vst [vmem:[#allocation49_spill] sm:$0xff] %v6822_v42  ;;  %2716 = vmatpush1.msra.mxu0 %v6573_v27  ;;  %2646 = vmatprep.subr.mxu1 %v6559_v11  ;;  %4957 = vrcp.f32 %v2100_v60  ;;  %v4934_v27 = vpop.eup %4933  ;;  %v4262_v11 = vmul.f32 -1.442695, %v6812_v5  ;;  %v4263_v47 = vmul.f32 -1.442695, %v6822_v42  ;;  %v6848_v26 = vadd.f32 %v6668_v15, %v6524_v36 }
 0x2bc   : > { %2717 = vmatprep.subr.mxu0 %v6564_v33  ;;  %2647 = vmatpush1.msra.mxu1 %v6555_v55  ;;  %4959 = vrcp.f32 %v2107_v56  ;;  %v7808_v55 = vmov 0.0   ;;  %v4936_v33 = vpop.eup %4935  ;;  %v2116_v62 = vadd.f32 1.0, %v4934_v27  ;;  %v6854_v2 = vadd.f32 %v6701_v32, %v6535_v52  ;;  %v6870_v32 = vpop.f32.mrf.mxu0 }
 0x2bd   : > { %2718 = vmatpush1.msra.mxu0 %v2481_v23  ;;  %4348 = vmatmul.mubr.msk.f32.vlgmr.msra.gmra.mxu1 %vm2612_vm1, %v7567_v45  ;;  %4961 = vrcp.f32 %v2108_v53  ;;  %v4938_v22 = vpop.eup %4937  ;;  %7809 = vst [vmem:[#allocation53_spill] sm:$0xff] %v6848_v26  ;;  %v2123_v29 = vadd.f32 1.0, %v4936_v33  ;;  %v6860_v63 = vadd.f32 %v6732_v7, %v6524_v36  ;;  %v6868_v56 = vadd.f32 %v6763_v57, %v6535_v52 }
 0x2be   : > { %4349 = vmatmul.mubr.msk.f32.vlgmr.msra.gmra.mxu0 %vm2612_vm1, %v7567_v45  ;;  %2822 = vmatprep.mubr.f32.mxu1 %v7808_v55  ;;  %4963 = vpow2.f32 %v4254_v38  ;;  %v6850_v46 = vpop.eup %4939  ;;  %7811 = vst [vmem:[#allocation79_spill] sm:$0xff] %v6854_v2  ;;  %v2124_v60 = vadd.f32 1.0, %v4938_v22  ;;  %v6876_v12 = vadd.f32 %v6551_v61, %v6529_v37  ;;  %v4270_v7 = vmul.f32 -1.442695, %v6848_v26 }
 0x2bf   : > { %2893 = vmatprep.mubr.f32.mxu0 %v7808_v55  ;;  %7810 = vst [vmem:[#allocation44_spill] sm:$0xff] %v6850_v46  ;;  %4965 = vpow2.f32 %v4255_v50  ;;  %7813 = vst [vmem:[#allocation78_spill] sm:$0xff] %v6860_v63  ;;  %v6883_v53 = vadd.f32 %v6584_v28, %v6540_v48  ;;  %v4271_v57 = vmul.f32 -1.442695, %v6854_v2  ;;  %v6890_v51 = vadd.f32 %v6609_v21, %v6529_v37  ;;  %v6893_v50 = vpop.f32.mrf.mxu1  ;;  %v6902_v55 = vpop.f32.mrf.mxu0 }
 0x2c0   : > { %v6856_v18 = vpop.eup %4941  ;;  %4967 = vpow2.f32 %v4262_v11  ;;  %7814 = vst [vmem:[#allocation42_spill] sm:$0xff] %v6868_v56  ;;  %7815 = vst [vmem:[#allocation77_spill] sm:$0xff] %v6876_v12  ;;  %v4278_v61 = vmul.f32 -1.442695, %v6860_v63  ;;  %v6899_v28 = vadd.f32 %v6643_v19, %v6540_v48  ;;  %v4279_v11 = vmul.f32 -1.442695, %v6868_v56 }
 0x2c1   : > { %7812 = vst [vmem:[#allocation50_spill] sm:$0xff] %v6856_v18  ;;  %v6864_v15 = vpop.eup %4943  ;;  %4969 = vpow2.f32 %v4263_v47  ;;  %7816 = vst [vmem:[#allocation48_spill] sm:$0xff] %v6883_v53  ;;  %v4256_v21 = vmul.f32 -1.442695, %v6876_v12  ;;  %v6909_v47 = vadd.f32 %v6678_v6, %v6529_v37  ;;  %v6916_v19 = vadd.f32 %v6710_v1, %v6540_v48  ;;  %v6925_v6 = vpop.f32.mrf.mxu1 }
 0x2c2   : > { %v6872_v49 = vpop.eup %4945  ;;  %4971 = vrcp.f32 %v2115_v0  ;;  %7817 = vst [vmem:[#allocation84_spill] sm:$0xff] %v6890_v51  ;;  %7818 = vst [vmem:[#allocation40_spill] sm:$0xff] %v6899_v28  ;;  %v4257_v0 = vmul.f32 -1.442695, %v6883_v53  ;;  %v4265_v45 = vmul.f32 -1.442695, %v6899_v28  ;;  %v6932_v1 = vadd.f32 %v6771_v8, %v6540_v48 }
 0x2c3   : > { %v6879_v23 = vpop.eup %4947  ;;  %4973 = vrcp.f32 %v2116_v62  ;;  %7819 = vst [vmem:[#allocation75_spill] sm:$0xff] %v6909_v47  ;;  %7821 = vst [vmem:[#allocation38_spill] sm:$0xff] %v6916_v19  ;;  %v6990_v59 = vadd.f32 %v6824_v44, %v6540_v48  ;;  %v7025_v12 = vadd.f32 %v6925_v6, %v6535_v52 }
 0x2c4   : > { %v6886_v38 = vpop.eup %4949  ;;  %4975 = vrcp.f32 %v2123_v29  ;;  %v4264_v29 = vmul.f32 -1.442695, %v6890_v51  ;;  %7825 = vst [vmem:[#allocation69_spill] sm:$0xff] %v6932_v1  ;;  %v4281_v8 = vmul.f32 -1.442695, %v6932_v1 }
 0x2c5   : > { %v6895_v27 = vpop.eup %4951  ;;  %4977 = vrcp.f32 %v2124_v60  ;;  %v6923_v60 = vadd.f32 %v6742_v41, %v6529_v37  ;;  %7836 = vst [vmem:[#allocation66_spill] sm:$0xff] %v6990_v59 }
 0x2c6   : > { %v6904_v33 = vpop.eup %4953  ;;  %4979 = vpow2.f32 %v4270_v7 }
 0x2c7   : > { %v6911_v22 = vpop.eup %4955  ;;  %4981 = vpow2.f32 %v4271_v57  ;;  %7823 = vst [vmem:[#allocation46_spill] sm:$0xff] %v6923_v60  ;;  %v6934_v57 = vpop.f32.mrf.mxu0  ;;  %v4280_v20 = vmul.f32 -1.442695, %v6923_v60 }
 0x2c8   : > { %7820 = vst [vmem:[#allocation47_spill] sm:$0xff] %v6911_v22  ;;  %v6918_v62 = vpop.eup %4957  ;;  %4983 = vpow2.f32 %v4278_v61  ;;  %v4272_v61 = vmul.f32 -1.442695, %v6909_v47  ;;  %v4273_v22 = vmul.f32 -1.442695, %v6916_v19  ;;  %v7032_v43 = vadd.f32 %v6934_v57, %v6540_v48 }
 0x2c9   : > { %7822 = vst [vmem:[#allocation74_spill] sm:$0xff] %v6918_v62  ;;  %v6927_v7 = vpop.eup %4959  ;;  %4985 = vpow2.f32 %v4279_v11  ;;  %v6941_v11 = vpop.f32.mrf.mxu1 }
 0x2ca   : > { %7824 = vst [vmem:[#allocation28_spill] sm:$0xff] %v6927_v7  ;;  %v6936_v30 = vpop.eup %4961  ;;  %4987 = vpow2.f32 %v4256_v21  ;;  %v6944_v7 = vpop.f32.mrf.mxu0  ;;  %7841 = vst [vmem:[#allocation81_spill] sm:$0xff] %v7032_v43  ;;  %v7039_v6 = vadd.f32 %v6941_v11, %v6524_v36 }
 0x2cb   : > { %7826 = vst [vmem:[#allocation45_spill] sm:$0xff] %v6936_v30  ;;  %v4964_v41 = vpop.eup %4963  ;;  %4989 = vpow2.f32 %v4257_v0  ;;  %v6948_v0 = vadd.f32 %v6788_v24, %v6524_v36  ;;  %v6954_v30 = vadd.f32 %v6814_v39, %v6535_v52  ;;  %v7046_v51 = vadd.f32 %v6944_v7, %v6529_v37 }
 0x2cc   : > { %v4966_v62 = vpop.eup %4965  ;;  %4991 = vpow2.f32 %v4264_v29  ;;  %v2131_v21 = vadd.f32 1.0, %v4964_v41  ;;  %v6960_v41 = vadd.f32 %v6836_v14, %v6524_v36  ;;  %v6970_v39 = vpop.f32.mrf.mxu0 }
 0x2cd   : > { %v4968_v34 = vpop.eup %4967  ;;  %4993 = vpow2.f32 %v4265_v45  ;;  %7827 = vst [vmem:[#allocation88_spill] sm:$0xff] %v6948_v0  ;;  %v2132_v29 = vadd.f32 1.0, %v4966_v62  ;;  %7829 = vst [vmem:[#allocation56_spill] sm:$0xff] %v6954_v30  ;;  %v4287_v14 = vmul.f32 -1.442695, %v6954_v30 }
 0x2ce   : > { %v4970_v58 = vpop.eup %4969  ;;  %4995 = vpow2.f32 %v4272_v61  ;;  %v2139_v9 = vadd.f32 1.0, %v4968_v34  ;;  %7831 = vst [vmem:[#allocation68_spill] sm:$0xff] %v6960_v41  ;;  %v6962_v61 = vpop.f32.mrf.mxu1  ;;  %7843 = vst [vmem:[#allocation62_spill] sm:$0xff] %v7046_v51 }
 0x2cf   : > { %v6950_v3 = vpop.eup %4971  ;;  %4997 = vpow2.f32 %v4273_v22  ;;  %v2140_v4 = vadd.f32 1.0, %v4970_v58  ;;  %v6968_v22 = vadd.f32 %v6862_v10, %v6535_v52  ;;  %v4294_v58 = vmul.f32 -1.442695, %v6960_v41  ;;  %v6980_v16 = vpop.f32.mrf.mxu0 }
 0x2d0   : > { %7828 = vst [vmem:[#allocation20_spill] sm:$0xff] %v6950_v3  ;;  %v6956_v45 = vpop.eup %4973  ;;  %4999 = vpow2.f32 %v4280_v20  ;;  %v4286_v20 = vmul.f32 -1.442695, %v6948_v0  ;;  %v7053_v54 = vadd.f32 %v6962_v61, %v6535_v52  ;;  %v4312_v61 = vmul.f32 -1.442695, %v7046_v51 }
 0x2d1   : > { %7830 = vst [vmem:[#allocation27_spill] sm:$0xff] %v6956_v45  ;;  %v6964_v24 = vpop.eup %4975  ;;  %5001 = vpow2.f32 %v4281_v8  ;;  %7833 = vst [vmem:[#allocation21_spill] sm:$0xff] %v6968_v22  ;;  %v6977_v8 = vpop.f32.mrf.mxu1  ;;  %v4295_v10 = vmul.f32 -1.442695, %v6968_v22 }
 0x2d2   : > { %7832 = vst [vmem:[#allocation36_spill] sm:$0xff] %v6964_v24  ;;  %v6972_v62 = vpop.eup %4977  ;;  %5003 = vrcp.f32 %v2131_v21  ;;  %v1694_v44 = vpop.f32.mrf.mxu0 }
 0x2d3   : > { %7834 = vst [vmem:[#allocation58_spill] sm:$0xff] %v6972_v62  ;;  %v4980_v34 = vpop.eup %4979  ;;  %5005 = vrcp.f32 %v2132_v29  ;;  %v6984_v29 = vadd.f32 %v6797_v25, %v6529_v37  ;;  %v7081_v1 = vadd.f32 %v1694_v44, %v6540_v48 }
 0x2d4   : > { %v4982_v3 = vpop.eup %4981  ;;  %5007 = vrcp.f32 %v2139_v9  ;;  %v2147_v21 = vadd.f32 1.0, %v4980_v34  ;;  %v6996_v34 = vadd.f32 %v6843_v40, %v6529_v37  ;;  %v7011_v40 = vadd.f32 %v6893_v50, %v6524_v36 }
 0x2d5   : > { %v4984_v35 = vpop.eup %4983  ;;  %5009 = vrcp.f32 %v2140_v4  ;;  %7835 = vst [vmem:[#allocation25_spill] sm:$0xff] %v6984_v29  ;;  %v2148_v9 = vadd.f32 1.0, %v4982_v3  ;;  %v7004_v3 = vadd.f32 %v6870_v32, %v6540_v48 }
 0x2d6   : > { %v4986_v45 = vpop.eup %4985  ;;  %5011 = vpow2.f32 %v4286_v20  ;;  %v2155_v24 = vadd.f32 1.0, %v4984_v35  ;;  %7837 = vst [vmem:[#allocation35_spill] sm:$0xff] %v6996_v34  ;;  %v6998_v20 = vpop.f32.mrf.mxu1  ;;  %v4288_v35 = vmul.f32 -1.442695, %v6984_v29  ;;  %7839 = vst [vmem:[#allocation64_spill] sm:$0xff] %v7011_v40 }
 0x2d7   : > { %v6986_v31 = vpop.eup %4987  ;;  %5013 = vpow2.f32 %v4287_v14  ;;  %v2156_v17 = vadd.f32 1.0, %v4986_v45  ;;  %7838 = vst [vmem:[#allocation24_spill] sm:$0xff] %v7004_v3  ;;  %v4289_v45 = vmul.f32 -1.442695, %v6990_v59 }
 0x2d8   : > { %v6992_v4 = vpop.eup %4989  ;;  %5015 = vpow2.f32 %v4294_v58  ;;  %v1583_v50 = vpop.f32.mrf.mxu1 }
 0x2d9   : > { %v7000_v25 = vpop.eup %4991  ;;  %5017 = vpow2.f32 %v4295_v10  ;;  %v7018_v10 = vadd.f32 %v6902_v55, %v6529_v37  ;;  %v1696_v55 = vpop.f32.mrf.mxu0 }
 0x2da   : > { %v7006_v14 = vpop.eup %4993  ;;  %5019 = vrcp.f32 %v2147_v21  ;;  %v4296_v21 = vmul.f32 -1.442695, %v6996_v34  ;;  %v1585_v11 = vpop.f32.mrf.mxu1 }
 0x2db   : > { %v7013_v58 = vpop.eup %4995  ;;  %5021 = vrcp.f32 %v2148_v9  ;;  %7840 = vst [vmem:[#allocation33_spill] sm:$0xff] %v7018_v10  ;;  %v4297_v9 = vmul.f32 -1.442695, %v7004_v3  ;;  %v1698_v7 = vpop.f32.mrf.mxu0 }
 0x2dc   : > { %v7020_v32 = vpop.eup %4997  ;;  %5023 = vrcp.f32 %v2155_v24  ;;  %v4302_v24 = vmul.f32 -1.442695, %v7011_v40 }
 0x2dd   : > { %v7027_v62 = vpop.eup %4999  ;;  %5025 = vrcp.f32 %v2156_v17  ;;  %v4304_v17 = vmul.f32 -1.442695, %v7018_v10  ;;  %v1702_v19 = vpop.f32.mrf.mxu0 }
 0x2de   : > { %v7034_v53 = vpop.eup %5001  ;;  %5027 = vpow2.f32 %v4288_v35  ;;  %v4303_v35 = vmul.f32 -1.442695, %v7025_v12  ;;  %v7116_v29 = vadd.f32 %v1702_v19, %v6529_v37 }
 0x2df   : > { %v7041_v13 = vpop.eup %5003  ;;  %5029 = vpow2.f32 %v4289_v45  ;;  %v4305_v45 = vmul.f32 -1.442695, %v7032_v43 }
 0x2e0   : > { %7842 = vst [vmem:[#allocation23_spill] sm:$0xff] %v7041_v13  ;;  %v7048_v57 = vpop.eup %5005  ;;  %5031 = vpow2.f32 %v4296_v21  ;;  %v7060_v13 = vadd.f32 %v6970_v39, %v6540_v48  ;;  %v4310_v21 = vmul.f32 -1.442695, %v7039_v6 }
 0x2e1   : > { %7844 = vst [vmem:[#allocation31_spill] sm:$0xff] %v7048_v57  ;;  %v7055_v28 = vpop.eup %5007  ;;  %5033 = vpow2.f32 %v4297_v9  ;;  %v4311_v9 = vmul.f32 -1.442695, %v7053_v54 }
 0x2e2   : > { %7845 = vst [vmem:[#allocation83_spill] sm:$0xff] %v7055_v28  ;;  %v7062_v5 = vpop.eup %5009  ;;  %5035 = vpow2.f32 %v4302_v24  ;;  %v1589_v28 = vpop.f32.mrf.mxu1  ;;  %v4313_v39 = vmul.f32 -1.442695, %v7060_v13  ;;  %v7070_v24 = vadd.f32 %v6977_v8, %v6524_v36 }
 0x2e3   : > { %7846 = vst [vmem:[#allocation22_spill] sm:$0xff] %v7062_v5  ;;  %v5012_v57 = vpop.eup %5011  ;;  %5037 = vpow2.f32 %v4304_v17 }
 0x2e4   : > { %v5014_v47 = vpop.eup %5013  ;;  %5039 = vpow2.f32 %v4303_v35  ;;  %v2163_v60 = vadd.f32 1.0, %v5012_v57  ;;  %v7076_v35 = vadd.f32 %v6998_v20, %v6535_v52  ;;  %v1591_v57 = vpop.f32.mrf.mxu1  ;;  %v4318_v20 = vmul.f32 -1.442695, %v7070_v24 }
 0x2e5   : > { %v5016_v42 = vpop.eup %5015  ;;  %5041 = vpow2.f32 %v4305_v45  ;;  %v2164_v5 = vadd.f32 1.0, %v5014_v47  ;;  %v1704_v47 = vpop.f32.mrf.mxu0 }
 0x2e6   : > { %v5018_v26 = vpop.eup %5017  ;;  %5043 = vpow2.f32 %v4310_v21  ;;  %v2171_v45 = vadd.f32 1.0, %v5016_v42  ;;  %v7092_v42 = vadd.f32 %v1696_v55, %v6529_v37  ;;  %v4319_v44 = vmul.f32 -1.442695, %v7076_v35 }
 0x2e7   : > { %v7072_v17 = vpop.eup %5019  ;;  %5045 = vpow2.f32 %v4312_v61  ;;  %v2172_v8 = vadd.f32 1.0, %v5018_v26  ;;  %v7098_v26 = vadd.f32 %v1585_v11, %v6535_v52  ;;  %v1706_v63 = vpop.f32.mrf.mxu0  ;;  %v7126_v59 = vadd.f32 %v1704_v47, %v6540_v48 }
 0x2e8   : > { %7847 = vst [vmem:[#allocation60_spill] sm:$0xff] %v7072_v17  ;;  %v7078_v2 = vpop.eup %5021  ;;  %5047 = vpow2.f32 %v4311_v9  ;;  %v7086_v17 = vadd.f32 %v1583_v50, %v6524_v36  ;;  %v4321_v50 = vmul.f32 -1.442695, %v7081_v1 }
 0x2e9   : > { %7848 = vst [vmem:[#allocation30_spill] sm:$0xff] %v7078_v2  ;;  %v7083_v21 = vpop.eup %5023  ;;  %5049 = vpow2.f32 %v4313_v39  ;;  %v1593_v2 = vpop.f32.mrf.mxu1 }
 0x2ea   : > { %7849 = vst [vmem:[#allocation85_spill] sm:$0xff] %v7083_v21  ;;  %v7088_v61 = vpop.eup %5025  ;;  %5051 = vrcp.f32 %v2163_v60  ;;  %v7104_v60 = vadd.f32 %v1698_v7, %v6540_v48  ;;  %v4326_v55 = vmul.f32 -1.442695, %v7086_v17  ;;  %v1708_v34 = vpop.f32.mrf.mxu0 }
 0x2eb   : > { %7850 = vst [vmem:[#allocation29_spill] sm:$0xff] %v7088_v61  ;;  %v7094_v9 = vpop.eup %5027  ;;  %5053 = vrcp.f32 %v2164_v5  ;;  %v7110_v5 = vadd.f32 %v1589_v28, %v6524_v36  ;;  %v4327_v61 = vmul.f32 -1.442695, %v7098_v26 }
 0x2ec   : > { %v7100_v39 = vpop.eup %5029  ;;  %5055 = vrcp.f32 %v2171_v45  ;;  %v4328_v45 = vmul.f32 -1.442695, %v7092_v42  ;;  %v4329_v28 = vmul.f32 -1.442695, %v7104_v60 }
 0x2ed   : > { %v7106_v21 = vpop.eup %5031  ;;  %5057 = vrcp.f32 %v2172_v8  ;;  %v7120_v8 = vadd.f32 %v1591_v57, %v6535_v52  ;;  %v4334_v19 = vmul.f32 -1.442695, %v7110_v5  ;;  %v4336_v57 = vmul.f32 -1.442695, %v7116_v29 }
 0x2ee   : > { %v7112_v11 = vpop.eup %5033  ;;  %5059 = vpow2.f32 %v4318_v20  ;;  %v1595_v20 = vpop.f32.mrf.mxu1 }
 0x2ef   : > { %v5036_v7 = vpop.eup %5035  ;;  %5061 = vpow2.f32 %v4319_v44  ;;  %v7130_v44 = vadd.f32 %v1593_v2, %v6524_v36  ;;  %v4335_v47 = vmul.f32 -1.442695, %v7120_v8  ;;  %v4337_v36 = vmul.f32 -1.442695, %v7126_v59 }
 0x2f0   : > { %v7122_v56 = vpop.eup %5037  ;;  %5063 = vpow2.f32 %v4321_v50  ;;  %v7136_v50 = vadd.f32 %v1706_v63, %v6529_v37  ;;  %v7146_v2 = vadd.f32 %v1708_v34, %v6540_v48  ;;  %v7150_v63 = vadd.f32 %v6980_v16, %v6529_v37 }
 0x2f1   : > { %v5040_v0 = vpop.eup %5039  ;;  %5065 = vpow2.f32 %v4326_v55  ;;  %v7140_v55 = vadd.f32 %v1595_v20, %v6535_v52 }
 0x2f2   : > { %v7132_v30 = vpop.eup %5041  ;;  %5067 = vpow2.f32 %v4328_v45  ;;  %v4344_v52 = vmul.f32 -1.442695, %v7136_v50  ;;  %v4345_v34 = vmul.f32 -1.442695, %v7146_v2  ;;  %v4320_v16 = vmul.f32 -1.442695, %v7150_v63 }
 0x2f3   : > { %v5044_v3 = vpop.eup %5043  ;;  %5069 = vpow2.f32 %v4327_v61  ;;  %v4342_v61 = vmul.f32 -1.442695, %v7130_v44  ;;  %v2180_v46 = vadd.f32 1.0, %v5040_v0 }
 0x2f4   : > { %v7142_v41 = vpop.eup %5045  ;;  %5071 = vpow2.f32 %v4329_v28  ;;  %v4343_v28 = vmul.f32 -1.442695, %v7140_v55 }
 0x2f5   : > { %v5048_v45 = vpop.eup %5047  ;;  %5073 = vpow2.f32 %v4334_v19 }
 0x2f6   : > { %v7153_v10 = vpop.eup %5049  ;;  %5075 = vpow2.f32 %v4336_v57  ;;  %v2179_v57 = vadd.f32 1.0, %v5036_v7 }
 0x2f7   : > { %v7156_v20 = vpop.eup %5051  ;;  %5077 = vpow2.f32 %v4335_v47 }
 0x2f8   : > { %7851 = vst [vmem:[#allocation86_spill] sm:$0xff] %v7156_v20  ;;  %v7159_v48 = vpop.eup %5053  ;;  %5079 = vpow2.f32 %v4337_v36  ;;  %v2187_v20 = vadd.f32 1.0, %v5044_v3 }
 0x2f9   : > { %7852 = vst [vmem:[#allocation87_spill] sm:$0xff] %v7159_v48  ;;  %v7162_v37 = vpop.eup %5055  ;;  %5081 = vpow2.f32 %v4342_v61  ;;  %v2188_v48 = vadd.f32 1.0, %v5048_v45 }
 0x2fa   : > { %7853 = vst [vmem:[#allocation89_spill] sm:$0xff] %v7162_v37  ;;  %v7165_v19 = vpop.eup %5057  ;;  %5083 = vpow2.f32 %v4344_v52 }
 0x2fb   : > { %7854 = vst [vmem:[#allocation15_spill] sm:$0xff] %v7165_v19  ;;  %v5060_v22 = vpop.eup %5059  ;;  %5085 = vpow2.f32 %v4343_v28 }
 0x2fc   : > { %v5062_v47 = vpop.eup %5061  ;;  %5087 = vpow2.f32 %v4345_v34  ;;  %v2195_v40 = vadd.f32 1.0, %v5060_v22 }
 0x2fd   : > { %v5064_v43 = vpop.eup %5063  ;;  %5089 = vpow2.f32 %v4320_v16  ;;  %v2196_v18 = vadd.f32 1.0, %v5062_v47 }
 0x2fe   : > { %v5066_v36 = vpop.eup %5065  ;;  %5091 = vrcp.f32 %v2179_v57 }
 0x2ff   : > { %v5068_v37 = vpop.eup %5067  ;;  %5093 = vrcp.f32 %v2180_v46  ;;  %v2203_v19 = vadd.f32 1.0, %v5066_v36 }
 0x300   : > { %v5070_v61 = vpop.eup %5069  ;;  %5095 = vrcp.f32 %v2187_v20 }
 0x301   : > { %v5072_v7 = vpop.eup %5071  ;;  %5097 = vrcp.f32 %v2188_v48  ;;  %v2204_v52 = vadd.f32 1.0, %v5070_v61 }
 0x302   : > { %v5074_v0 = vpop.eup %5073  ;;  %5099 = vrcp.f32 %v2195_v40 }
 0x303   : > { %v5076_v28 = vpop.eup %5075  ;;  %5101 = vrcp.f32 %v2196_v18  ;;  %v2211_v3 = vadd.f32 1.0, %v5074_v0  ;;  %v2206_v0 = vadd.f32 1.0, %v5072_v7 }
 0x304   : > { %v5078_v34 = vpop.eup %5077  ;;  %5103 = vrcp.f32 %v2203_v19  ;;  %v2213_v61 = vadd.f32 1.0, %v5076_v28  ;;  %v2190_v28 = vadd.f32 1.0, %v7153_v10 }
 0x305   : > { %v5080_v45 = vpop.eup %5079  ;;  %5105 = vrcp.f32 %v2204_v52  ;;  %v2212_v16 = vadd.f32 1.0, %v5078_v34  ;;  %v2205_v52 = vadd.f32 1.0, %v5068_v37  ;;  %v2198_v34 = vadd.f32 1.0, %v5064_v43 }
 0x306   : > { %v5082_v22 = vpop.eup %5081  ;;  %5107 = vrcp.f32 %v2211_v3  ;;  %v2214_v46 = vadd.f32 1.0, %v5080_v45 }
 0x307   : > { %v5084_v57 = vpop.eup %5083  ;;  %5109 = vrcp.f32 %v2212_v16  ;;  %v2219_v20 = vadd.f32 1.0, %v5082_v22 }
 0x308   : > { %v5086_v47 = vpop.eup %5085  ;;  %5111 = vrcp.f32 %v2214_v46  ;;  %v2221_v48 = vadd.f32 1.0, %v5084_v57  ;;  %v2189_v46 = vadd.f32 1.0, %v7142_v41  ;;  %v2182_v57 = vadd.f32 1.0, %v7132_v30 }
 0x309   : > { %v5088_v36 = vpop.eup %5087  ;;  %5113 = vrcp.f32 %v2219_v20  ;;  %v2220_v40 = vadd.f32 1.0, %v5086_v47  ;;  %v2181_v20 = vadd.f32 1.0, %v7122_v56  ;;  %v2166_v41 = vadd.f32 1.0, %v7100_v39 }
 0x30a   : > { %v5090_v18 = vpop.eup %5089  ;;  %5115 = vrcp.f32 %v2221_v48  ;;  %v2222_v19 = vadd.f32 1.0, %v5088_v36  ;;  %v2174_v48 = vadd.f32 1.0, %v7112_v11  ;;  %v2173_v36 = vadd.f32 1.0, %v7106_v21 }
 0x30b   : > { %v7167_v51 = vpop.eup %5091  ;;  %5117 = vrcp.f32 %v2220_v40  ;;  %v2197_v16 = vadd.f32 1.0, %v5090_v18  ;;  %v2165_v30 = vadd.f32 1.0, %v7094_v9  ;;  %v2158_v56 = vadd.f32 1.0, %v7034_v53 }
 0x30c   : > { %v7169_v3 = vpop.eup %5093  ;;  %5119 = vrcp.f32 %v2222_v19  ;;  %v2157_v11 = vadd.f32 1.0, %v7027_v62  ;;  %v2150_v21 = vadd.f32 1.0, %v7020_v32  ;;  %v2149_v39 = vadd.f32 1.0, %v7013_v58 }
 0x30d   : > { %v7171_v45 = vpop.eup %5095  ;;  %5121 = vrcp.f32 %v2213_v61 }
 0x30e   : > { %v7173_v22 = vpop.eup %5097  ;;  %5123 = vrcp.f32 %v2206_v0 }
 0x30f   : > { %v7176_v7 = vpop.eup %5099  ;;  %5125 = vrcp.f32 %v2205_v52 }
 0x310   : > { %v7179_v37 = vpop.eup %5101  ;;  %5127 = vrcp.f32 %v2198_v34 }
 0x311   : > { %v5104_v43 = vpop.eup %5103  ;;  %5129 = vrcp.f32 %v2197_v16  ;;  %v2142_v16 = vadd.f32 1.0, %v7006_v14 }
 0x312   : > { %v5106_v47 = vpop.eup %5105  ;;  %5131 = vrcp.f32 %v2190_v28 }
 0x313   : > { %v5108_v10 = vpop.eup %5107  ;;  %5133 = vrcp.f32 %v2189_v46  ;;  %v2141_v46 = vadd.f32 1.0, %v7000_v25  ;;  %v2588_v25 = vmul.f32 %v5106_v47, %v7098_v26  ;;  %v2580_v26 = vmul.f32 %v7179_v37, %v7076_v35 }
 0x314   : > { %v5110_v61 = vpop.eup %5109  ;;  %5135 = vrcp.f32 %v2182_v57  ;;  %v2595_v14 = vmul.f32 %v5108_v10, %v7110_v5  ;;  %v2587_v5 = vmul.f32 %v5104_v43, %v7086_v17  ;;  %v2579_v17 = vmul.f32 %v7176_v7, %v7070_v24  ;;  %v7856_v10 = vld [vmem:[#allocation50_spill] sm:$0xff] }
 0x315   : > { %v5112_v40 = vpop.eup %5111  ;;  %5137 = vrcp.f32 %v2181_v20  ;;  %v2596_v32 = vmul.f32 %v5110_v61, %v7120_v8  ;;  %v2117_v43 = vadd.f32 1.0, %v6879_v23  ;;  %v2572_v35 = vmul.f32 %v7173_v22, %v7053_v54 }
 0x316   : > { %v5114_v18 = vpop.eup %5113  ;;  %5139 = vrcp.f32 %v2174_v48  ;;  %v2598_v20 = vmul.f32 %v5112_v40, %v7126_v59  ;;  %v2110_v37 = vadd.f32 1.0, %v6872_v49  ;;  %v2109_v7 = vadd.f32 1.0, %v6864_v15 }
 0x317   : > { %v5116_v0 = vpop.eup %5115  ;;  %5141 = vrcp.f32 %v2173_v36  ;;  %v2603_v53 = vmul.f32 %v5114_v18, %v7130_v44  ;;  %v2564_v54 = vmul.f32 %v7169_v3, %v7025_v12  ;;  %v2102_v36 = vadd.f32 1.0, %v7856_v10  ;;  %v7860_v12 = vld [vmem:[#allocation21_spill] sm:$0xff]  ;;  %v7861_v3 = vld [vmem:[#allocation15_spill] sm:$0xff] }
 0x318   : > { %v5118_v19 = vpop.eup %5117  ;;  %5143 = vrcp.f32 %v2166_v41  ;;  %v2605_v57 = vmul.f32 %v5116_v0, %v7136_v50  ;;  %v7859_v41 = vld [vmem:[#allocation44_spill] sm:$0xff]  ;;  %v7862_v18 = vld [vmem:[#allocation33_spill] sm:$0xff]  ;;  %v7888_v10 = vld [vmem:[#allocation83_spill] sm:$0xff] }
 0x319   : > { %v5120_v52 = vpop.eup %5119  ;;  %5145 = vrcp.f32 %v2165_v30  ;;  %v2604_v34 = vmul.f32 %v5118_v19, %v7140_v55  ;;  %v2134_v55 = vadd.f32 1.0, %v6992_v4  ;;  %v2126_v4 = vadd.f32 1.0, %v6904_v33  ;;  %v7864_v19 = vld [vmem:[#allocation89_spill] sm:$0xff] }
 0x31a   : > { %v5122_v9 = vpop.eup %5121  ;;  %5147 = vrcp.f32 %v2158_v56  ;;  %v2606_v28 = vmul.f32 %v5120_v52, %v7146_v2  ;;  %v2133_v2 = vadd.f32 1.0, %v6986_v31  ;;  %v2125_v31 = vadd.f32 1.0, %v6895_v27 }
 0x31b   : > { %v5124_v62 = vpop.eup %5123  ;;  %5149 = vrcp.f32 %v2157_v11  ;;  %2758 = vmatprep.subr.mxu1 %v2604_v34  ;;  %v2597_v8 = vmul.f32 %v5122_v9, %v7116_v29  ;;  %v2118_v33 = vadd.f32 1.0, %v6886_v38  ;;  %v2101_v40 = vadd.f32 1.0, %v7859_v41  ;;  %v7863_v11 = vld [vmem:[#allocation68_spill] sm:$0xff]  ;;  %v7867_v9 = vld [vmem:[#allocation87_spill] sm:$0xff] }
 0x31c   : > { %v5126_v58 = vpop.eup %5125  ;;  %5151 = vrcp.f32 %v2150_v21  ;;  %2829 = vmatprep.subr.mxu0 %v2606_v28  ;;  %2759 = vmatpush1.msra.mxu1 %v2603_v53  ;;  %v2590_v59 = vmul.f32 %v5124_v62, %v7104_v60  ;;  %v2556_v30 = vmul.f32 %v7861_v3, %v7860_v12  ;;  %v7865_v21 = vld [vmem:[#allocation24_spill] sm:$0xff]  ;;  %v7868_v53 = vld [vmem:[#allocation35_spill] sm:$0xff] }
 0x31d   : > { %v5128_v44 = vpop.eup %5127  ;;  %5153 = vrcp.f32 %v2149_v39  ;;  %2830 = vmatpush1.msra.mxu0 %v2605_v57  ;;  %2760 = vmatprep.subr.mxu1 %v2596_v32  ;;  %v2589_v29 = vmul.f32 %v5126_v58, %v7092_v42  ;;  %v7866_v34 = vld [vmem:[#allocation56_spill] sm:$0xff]  ;;  %v7870_v32 = vld [vmem:[#allocation86_spill] sm:$0xff] }
 0x31e   : > { %v5130_v50 = vpop.eup %5129  ;;  %5155 = vrcp.f32 %v2142_v16  ;;  %2831 = vmatprep.subr.mxu0 %v2598_v20  ;;  %2761 = vmatpush1.msra.mxu1 %v2595_v14  ;;  %v2582_v60 = vmul.f32 %v5128_v44, %v7081_v1  ;;  %v2571_v1 = vmul.f32 %v7171_v45, %v7039_v6  ;;  %v7857_v6 = vld [vmem:[#allocation64_spill] sm:$0xff]  ;;  %v7858_v45 = vld [vmem:[#allocation81_spill] sm:$0xff]  ;;  %v2548_v16 = vmul.f32 %v7867_v9, %v7866_v34  ;;  %v7871_v58 = vld [vmem:[#allocation66_spill] sm:$0xff] }
 0x31f   : > { %v5132_v48 = vpop.eup %5131  ;;  %5157 = vrcp.f32 %v2141_v46  ;;  %2832 = vmatpush1.msra.mxu0 %v2597_v8  ;;  %2762 = vmatprep.subr.mxu1 %v2588_v25  ;;  %v2581_v42 = vmul.f32 %v5130_v50, %v7150_v63  ;;  %v7855_v63 = vld [vmem:[#allocation62_spill] sm:$0xff]  ;;  %v7869_v46 = vld [vmem:[#allocation88_spill] sm:$0xff]  ;;  %v7873_v44 = vld [vmem:[#allocation29_spill] sm:$0xff] }
 0x320   : > { %v5134_v47 = vpop.eup %5133  ;;  %5159 = vrcp.f32 %v2134_v55  ;;  %2833 = vmatprep.subr.mxu0 %v2590_v59  ;;  %2763 = vmatpush1.msra.mxu1 %v2587_v5  ;;  %v2574_v24 = vmul.f32 %v5132_v48, %v7060_v13  ;;  %v2563_v13 = vmul.f32 %v7167_v51, %v7857_v6  ;;  %v2555_v51 = vmul.f32 %v7864_v19, %v7863_v11  ;;  %v7872_v20 = vld [vmem:[#allocation42_spill] sm:$0xff]  ;;  %v7874_v25 = vld [vmem:[#allocation25_spill] sm:$0xff]  ;;  %v7889_v6 = vld [vmem:[#allocation40_spill] sm:$0xff] }
 0x321   : > { %v5136_v27 = vpop.eup %5135  ;;  %5161 = vrcp.f32 %v2133_v2  ;;  %2834 = vmatpush1.msra.mxu0 %v2589_v29  ;;  %2764 = vmatprep.subr.mxu1 %v2580_v26  ;;  %v2573_v22 = vmul.f32 %v5134_v47, %v7855_v63  ;;  %v2547_v57 = vmul.f32 %v7870_v32, %v7869_v46  ;;  %v2540_v2 = vmul.f32 %v7873_v44, %v7872_v20  ;;  %v7876_v5 = vld [vmem:[#allocation85_spill] sm:$0xff]  ;;  %v7878_v29 = vld [vmem:[#allocation79_spill] sm:$0xff]  ;;  %v7879_v47 = vld [vmem:[#allocation30_spill] sm:$0xff] }
 0x322   : > { %v5138_v38 = vpop.eup %5137  ;;  %5163 = vrcp.f32 %v2126_v4  ;;  %2835 = vmatprep.subr.mxu0 %v2582_v60  ;;  %2765 = vmatpush1.msra.mxu1 %v2579_v17  ;;  %v2566_v61 = vmul.f32 %v5136_v27, %v7858_v45  ;;  %v7875_v4 = vld [vmem:[#allocation78_spill] sm:$0xff]  ;;  %v7877_v48 = vld [vmem:[#allocation69_spill] sm:$0xff] }
 0x323   : > { %v5140_v23 = vpop.eup %5139  ;;  %5165 = vrcp.f32 %v2125_v31  ;;  %2836 = vmatpush1.msra.mxu0 %v2581_v42  ;;  %2766 = vmatprep.subr.mxu1 %v2572_v35  ;;  %v2565_v56 = vmul.f32 %v5138_v38, %v7862_v18  ;;  %v2539_v59 = vmul.f32 %v7876_v5, %v7875_v4  ;;  %v7880_v17 = vld [vmem:[#allocation46_spill] sm:$0xff]  ;;  %v7882_v35 = vld [vmem:[#allocation60_spill] sm:$0xff]  ;;  %v7894_v18 = vld [vmem:[#allocation23_spill] sm:$0xff] }
 0x324   : > { %v5142_v49 = vpop.eup %5141  ;;  %5167 = vrcp.f32 %v2118_v33  ;;  %2837 = vmatprep.subr.mxu0 %v2574_v24  ;;  %2767 = vmatpush1.msra.mxu1 %v2571_v1  ;;  %v2558_v52 = vmul.f32 %v5140_v23, %v7865_v21  ;;  %v2532_v33 = vmul.f32 %v7879_v47, %v7878_v29  ;;  %v7883_v38 = vld [vmem:[#allocation38_spill] sm:$0xff]  ;;  %v7884_v24 = vld [vmem:[#allocation49_spill] sm:$0xff] }
 0x325   : > { %v5144_v15 = vpop.eup %5143  ;;  %5169 = vrcp.f32 %v2117_v43  ;;  %2838 = vmatpush1.msra.mxu0 %v2573_v22  ;;  %2768 = vmatprep.subr.mxu1 %v2564_v54  ;;  %v2557_v28 = vmul.f32 %v5142_v49, %v7868_v53  ;;  %v7881_v43 = vld [vmem:[#allocation53_spill] sm:$0xff]  ;;  %v7885_v23 = vld [vmem:[#allocation22_spill] sm:$0xff]  ;;  %v7886_v54 = vld [vmem:[#allocation75_spill] sm:$0xff] }
 0x326   : > { %v5146_v0 = vpop.eup %5145  ;;  %5171 = vrcp.f32 %v2110_v37  ;;  %2839 = vmatprep.subr.mxu0 %v2566_v61  ;;  %2769 = vmatpush1.msra.mxu1 %v2563_v13  ;;  %v2550_v55 = vmul.f32 %v5144_v15, %v7871_v58  ;;  %v2531_v42 = vmul.f32 %v7882_v35, %v7881_v43  ;;  %v7887_v49 = vld [vmem:[#allocation57_spill] sm:$0xff]  ;;  %v7890_v61 = vld [vmem:[#allocation51_spill] sm:$0xff]  ;;  %v7897_v21 = vld [vmem:[#allocation58_spill] sm:$0xff] }
 0x327   : > { %v5148_v39 = vpop.eup %5147  ;;  %5173 = vrcp.f32 %v2109_v7  ;;  %2840 = vmatpush1.msra.mxu0 %v2565_v56  ;;  %2770 = vmatprep.subr.mxu1 %v2556_v30  ;;  %v2549_v8 = vmul.f32 %v5146_v0, %v7874_v25  ;;  %v2524_v7 = vmul.f32 %v7885_v23, %v7884_v24  ;;  %v7891_v15 = vld [vmem:[#allocation31_spill] sm:$0xff]  ;;  %v7893_v30 = vld [vmem:[#allocation54_spill] sm:$0xff]  ;;  %v7895_v0 = vld [vmem:[#allocation48_spill] sm:$0xff] }
 0x328   : > { %v5150_v62 = vpop.eup %5149  ;;  %5175 = vrcp.f32 %v2102_v36  ;;  %2841 = vmatprep.subr.mxu0 %v2558_v52  ;;  %2771 = vmatpush1.msra.mxu1 %v2555_v51  ;;  %v2542_v31 = vmul.f32 %v5148_v39, %v7877_v48  ;;  %v2523_v36 = vmul.f32 %v7888_v10, %v7887_v49  ;;  %v2516_v41 = vmul.f32 %v7891_v15, %v7890_v61  ;;  %v7896_v51 = vld [vmem:[#allocation59_spill] sm:$0xff]  ;;  %v7898_v39 = vld [vmem:[#allocation77_spill] sm:$0xff]  ;;  %v7900_v53 = vld [vmem:[#allocation36_spill] sm:$0xff] }
 0x329   : > { %v5152_v14 = vpop.eup %5151  ;;  %5177 = vrcp.f32 %v2101_v40  ;;  %2842 = vmatpush1.msra.mxu0 %v2557_v28  ;;  %2772 = vmatprep.subr.mxu1 %v2548_v16  ;;  %v2541_v60 = vmul.f32 %v5150_v62, %v7880_v17  ;;  %v7892_v40 = vld [vmem:[#allocation84_spill] sm:$0xff]  ;;  %v2515_v56 = vmul.f32 %v7894_v18, %v7893_v30  ;;  %v2508_v52 = vmul.f32 %v7897_v21, %v7896_v51  ;;  %v7901_v62 = vld [vmem:[#allocation61_spill] sm:$0xff]  ;;  %v7903_v58 = vld [vmem:[#allocation27_spill] sm:$0xff] }
 0x32a   : > { %v5154_v50 = vpop.eup %5153  ;;  %2843 = vmatprep.subr.mxu0 %v2550_v55  ;;  %2773 = vmatpush1.msra.mxu1 %v2547_v57  ;;  %v2534_v37 = vmul.f32 %v5152_v14, %v7883_v38  ;;  %v7899_v16 = vld [vmem:[#allocation80_spill] sm:$0xff]  ;;  %v7902_v57 = vld [vmem:[#allocation67_spill] sm:$0xff]  ;;  %v7909_v48 = vld [vmem:[#allocation45_spill] sm:$0xff]  ;;  %v7921_v10 = vmov 1.0  }
 0x32b   : > { %v5156_v26 = vpop.eup %5155  ;;  %2844 = vmatpush1.msra.mxu0 %v2549_v8  ;;  %2774 = vmatprep.subr.mxu1 %v2540_v2  ;;  %v2533_v63 = vmul.f32 %v5154_v50, %v7886_v54  ;;  %v2507_v28 = vmul.f32 %v7900_v53, %v7899_v16  ;;  %v2500_v55 = vmul.f32 %v7903_v58, %v7902_v57  ;;  %v7904_v14 = vld [vmem:[#allocation55_spill] sm:$0xff]  ;;  %v7906_v25 = vld [vmem:[#allocation20_spill] sm:$0xff]  ;;  %v7914_v35 = vld [vmem:[#allocation73_spill] sm:$0xff] }
 0x32c   : > { %v5158_v27 = vpop.eup %5157  ;;  %2845 = vmatprep.subr.mxu0 %v2542_v31  ;;  %2775 = vmatpush1.msra.mxu1 %v2539_v59  ;;  %v2526_v13 = vmul.f32 %v5156_v26, %v7889_v6  ;;  %v7905_v2 = vld [vmem:[#allocation63_spill] sm:$0xff]  ;;  %v7907_v50 = vld [vmem:[#allocation52_spill] sm:$0xff]  ;;  %v7908_v59 = vld [vmem:[#allocation70_spill] sm:$0xff]  ;;  %v5447_v6 = vmov 1966171168  }
 0x32d   : > { %v5160_v1 = vpop.eup %5159  ;;  %2846 = vmatpush1.msra.mxu0 %v2541_v60  ;;  %2776 = vmatprep.subr.mxu1 %v2532_v33  ;;  %v2525_v12 = vmul.f32 %v5158_v27, %v7892_v40  ;;  %v2499_v8 = vmul.f32 %v7906_v25, %v7905_v2  ;;  %v2492_v31 = vmul.f32 %v7909_v48, %v7908_v59  ;;  %v7910_v26 = vld [vmem:[#allocation18_spill] sm:$0xff]  ;;  %v7911_v33 = vld [vmem:[#allocation65_spill] sm:$0xff]  ;;  %v7912_v17 = vld [vmem:[#allocation28_spill] sm:$0xff] }
 0x32e   : > { %v5162_v22 = vpop.eup %5161  ;;  %2847 = vmatprep.subr.mxu0 %v2534_v37  ;;  %2777 = vmatpush1.msra.mxu1 %v2531_v42  ;;  %v2518_v11 = vmul.f32 %v5160_v1, %v7895_v0  ;;  %v2491_v60 = vmul.f32 %v7912_v17, %v7911_v33  ;;  %v7913_v27 = vld [vmem:[#allocation82_spill] sm:$0xff]  ;;  %v7916_v37 = vld [vmem:[#allocation72_spill] sm:$0xff]  ;;  %v7918_v23 = vld [vmem:[#allocation47_spill] sm:$0xff] }
 0x32f   : > { %v5164_v45 = vpop.eup %5163  ;;  %2848 = vmatpush1.msra.mxu0 %v2533_v63  ;;  %2778 = vmatprep.subr.mxu1 %v2524_v7  ;;  %v2517_v34 = vmul.f32 %v5162_v22, %v7898_v39  ;;  %v7915_v42 = vld [vmem:[#allocation74_spill] sm:$0xff]  ;;  %v7919_v54 = vld [vmem:[#allocation76_spill] sm:$0xff]  ;;  %v7920_v22 = vld [vmem:[#allocation71_spill] sm:$0xff] }
 0x330   : > { %v5166_v3 = vpop.eup %5165  ;;  %2849 = vmatprep.subr.mxu0 %v2526_v13  ;;  %2779 = vmatpush1.msra.mxu1 %v2523_v36  ;;  %v2510_v46 = vmul.f32 %v5164_v45, %v7901_v62  ;;  %v2484_v38 = vmul.f32 %v7915_v42, %v7914_v35  ;;  %v7917_v24 = vld [vmem:[#allocation90_spill] sm:$0xff]  ;;  %v2913_v13 = vunpack.c.l.s4 %v5447_v6 }
 0x331   : > { %v5168_v19 = vpop.eup %5167  ;;  %2850 = vmatpush1.msra.mxu0 %v2525_v12  ;;  %2780 = vmatprep.subr.mxu1 %v2516_v41  ;;  %v2509_v20 = vmul.f32 %v5166_v3, %v7904_v14  ;;  %v2483_v7 = vmul.f32 %v7918_v23, %v7917_v24  ;;  %v7923_v3 = vld [vmem:[#allocation8_spill] sm:$0xff] }
 0x332   : > { %v5170_v9 = vpop.eup %5169  ;;  %2851 = vmatprep.subr.mxu0 %v2518_v11  ;;  %2781 = vmatpush1.msra.mxu1 %v2515_v56  ;;  %v2502_v4 = vmul.f32 %v5168_v19, %v7907_v50  ;;  %v2914_v15 = vunpack.c.0.s8 %v2913_v13 }
 0x333   : > { %v5172_v32 = vpop.eup %5171  ;;  %2852 = vmatpush1.msra.mxu0 %v2517_v34  ;;  %2782 = vmatprep.subr.mxu1 %v2508_v52  ;;  %v2501_v29 = vmul.f32 %v5170_v9, %v7910_v26 }
 0x334   : > { %v5174_v44 = vpop.eup %5173  ;;  %2853 = vmatprep.subr.mxu0 %v2510_v46  ;;  %2783 = vmatpush1.msra.mxu1 %v2507_v28  ;;  %v2494_v43 = vmul.f32 %v5172_v32, %v7913_v27  ;;  %v7300_v30 = vsub.s32 %v2914_v15, %v7923_v3  ;;  %v2615_v46 = vld [vmem:[#allocation2] sm:$0xff] }
 0x335   : > { %v5176_v5 = vpop.eup %5175  ;;  %2854 = vmatpush1.msra.mxu0 %v2509_v20  ;;  %2784 = vmatprep.subr.mxu1 %v2500_v55  ;;  %v2493_v1 = vmul.f32 %v5174_v44, %v7916_v37 }
 0x336   : > { %v5178_v47 = vpop.eup %5177  ;;  %2855 = vmatprep.subr.mxu0 %v2502_v4  ;;  %2785 = vmatpush1.msra.mxu1 %v2499_v8  ;;  %v2486_v63 = vmul.f32 %v5176_v5, %v7919_v54 }
 0x337   : > { %2856 = vmatpush1.msra.mxu0 %v2501_v29  ;;  %2786 = vmatprep.subr.mxu1 %v2492_v31  ;;  %v2485_v49 = vmul.f32 %v5178_v47, %v7920_v22 }
 0x338   : > { %2857 = vmatprep.subr.mxu0 %v2494_v43  ;;  %2787 = vmatpush1.msra.mxu1 %v2491_v60 }
 0x339   : > { %2858 = vmatpush1.msra.mxu0 %v2493_v1  ;;  %2788 = vmatprep.subr.mxu1 %v2484_v38 }
 0x33a   : > { %2859 = vmatprep.subr.mxu0 %v2486_v63  ;;  %2789 = vmatpush1.msra.mxu1 %v2483_v7 }
 0x33b   : > { %2860 = vmatpush1.msra.mxu0 %v2485_v49  ;;  %4350 = vmatmul.mubr.msk.f32.vlgmr.msra.gmra.mxu1 %vm2612_vm1, %v7921_v10 }
 0x33c   : > { %4351 = vmatmul.mubr.msk.f32.vlgmr.msra.gmra.mxu0 %vm2612_vm1, %v7921_v10 }
 0x37d   : > { %v2682_v45 = vpop.f32.mrf.mxu1 }
 0x37e   : > { %v2753_v61 = vpop.f32.mrf.mxu0 }
 0x37f   : > { %v2684_v41 = vpop.f32.mrf.mxu1 }
 0x380   : > { %v2755_v40 = vpop.f32.mrf.mxu0  ;;  %v2908_v12 = vcombine.low %v2682_v45, %v2684_v41 }
 0x381   : > { %v2909_v18 = vcombine.low %v2753_v61, %v2755_v40 }
 0x382   : > { %v2918_v11 = vrot.slane %v2908_v12, %v7300_v30 }
 0x383   : > { %v2925_v19 = vrot.slane %v2909_v18, %v7300_v30 }
 0x385   : > { %v2940_v9 = vcombine.low %v2918_v11, %v2925_v19 }
 0x387   : > { %v2948_v28 = vrot.slane %v2940_v9, %v7300_v30 }
 0x3fb   : > { %v2824_v56 = vpop.f32.mrf.mxu1 }
 0x3fc   : > { %v2895_v0 = vpop.f32.mrf.mxu0 }
 0x3fd   : > { %v2826_v51 = vpop.f32.mrf.mxu1 }
 0x3fe   : > { %v2910_v21 = vcombine.low %v2824_v56, %v2826_v51  ;;  %v2897_v52 = vpop.f32.mrf.mxu0 }
 0x3ff   : > { %v2911_v39 = vcombine.low %v2895_v0, %v2897_v52 }
 0x400   : > { %v2932_v34 = vrot.slane %v2910_v21, %v7300_v30 }
 0x401   : > { %v2939_v16 = vrot.slane %v2911_v39, %v7300_v30 }
 0x403   : > { %v2941_v53 = vcombine.low %v2932_v34, %v2939_v16 }
 0x405   : > { %v2955_v62 = vrot.slane %v2941_v53, %v7300_v30 }
 0x407   : > { %v2956_v32 = vcombine.low %v2948_v28, %v2955_v62  ;;  %2963 = sbr.rel (%p4352_p3) target bundleno = 1371 (0x55b), region = 75 }
 0x409   : > { %v2958_v57 = vadd.f32 %v2956_v32, %v2615_v46 }
 0x40b   : > { %2959 = vst [vmem:[#allocation2] sm:$0xff] %v2958_v57 }
 0x40c   : > { %v5179_v58 = vld [vmem:[%s5709_s20 + $0x74] ss:$8 sps:$4 sm:$0xff]   ;;  %v5183_v14 = vld [vmem:[%s5709_s20 + $0x70] ss:$8 sps:$4 sm:$0xff]   ;;  %v5185_v44 = vld [vmem:[%s5709_s20 + $0x64] ss:$8 sps:$4 sm:$0xff]  }
 0x40d   : > { %v5181_v55 = vld [vmem:[%s5709_s20 + $0x174] ss:$8 sps:$4 sm:$0xff]   ;;  %3783 = vmatprep.subr.bf16.mxu0 %v5179_v58  ;;  %v5184_v20 = vld [vmem:[%s5709_s20 + $0x170] ss:$8 sps:$4 sm:$0xff]   ;;  %v5187_v2 = vld [vmem:[%s5709_s20 + $0x164] ss:$8 sps:$4 sm:$0xff]  }
 0x40e   : > { %3824 = vmatprep.subr.bf16.mxu1 %v5181_v55  ;;  %3784 = vmatpush1.bf16.msra.mxu0 %v5183_v14  ;;  %v5189_v25 = vld [vmem:[%s5709_s20 + $0x60] ss:$8 sps:$4 sm:$0xff]   ;;  %v5191_v50 = vld [vmem:[%s5709_s20 + $0x54] ss:$8 sps:$4 sm:$0xff]   ;;  %v5195_v5 = vld [vmem:[%s5709_s20 + $0x50] ss:$8 sps:$4 sm:$0xff]  }
 0x40f   : > { %3825 = vmatpush1.bf16.msra.mxu1 %v5184_v20  ;;  %3785 = vmatprep.subr.bf16.mxu0 %v5185_v44  ;;  %v5190_v8 = vld [vmem:[%s5709_s20 + $0x160] ss:$8 sps:$4 sm:$0xff]   ;;  %v5193_v4 = vld [vmem:[%s5709_s20 + $0x154] ss:$8 sps:$4 sm:$0xff]   ;;  %v5196_v59 = vld [vmem:[%s5709_s20 + $0x150] ss:$8 sps:$4 sm:$0xff]  }
 0x410   : > { %3826 = vmatprep.subr.bf16.mxu1 %v5187_v2  ;;  %v5197_v48 = vld [vmem:[%s5709_s20 + $0x44] ss:$8 sps:$4 sm:$0xff]   ;;  %v5201_v26 = vld [vmem:[%s5709_s20 + $0x40] ss:$8 sps:$4 sm:$0xff]   ;;  %v5203_v47 = vld [vmem:[%s5709_s20 + $0x34] ss:$8 sps:$4 sm:$0xff]  }
 0x411   : > { %v5199_v31 = vld [vmem:[%s5709_s20 + $0x144] ss:$8 sps:$4 sm:$0xff]   ;;  %v5202_v29 = vld [vmem:[%s5709_s20 + $0x140] ss:$8 sps:$4 sm:$0xff]   ;;  %v5205_v33 = vld [vmem:[%s5709_s20 + $0x134] ss:$8 sps:$4 sm:$0xff]  }
 0x412   : > { %3786 = vmatpush1.bf16.msra.mxu0 %v5189_v25  ;;  %v5207_v17 = vld [vmem:[%s5709_s20 + $0x30] ss:$8 sps:$4 sm:$0xff]   ;;  %v5209_v27 = vld [vmem:[%s5709_s20 + $0x24] ss:$8 sps:$4 sm:$0xff]   ;;  %v5213_v35 = vld [vmem:[%s5709_s20 + $0x20] ss:$8 sps:$4 sm:$0xff]  }
 0x413   : > { %3827 = vmatpush1.bf16.msra.mxu1 %v5190_v8  ;;  %3787 = vmatprep.subr.bf16.mxu0 %v5191_v50  ;;  %v5208_v60 = vld [vmem:[%s5709_s20 + $0x130] ss:$8 sps:$4 sm:$0xff]   ;;  %v5211_v43 = vld [vmem:[%s5709_s20 + $0x124] ss:$8 sps:$4 sm:$0xff]   ;;  %v5214_v42 = vld [vmem:[%s5709_s20 + $0x120] ss:$8 sps:$4 sm:$0xff]  }
 0x414   : > { %3828 = vmatprep.subr.bf16.mxu1 %v5193_v4  ;;  %v5215_v38 = vld [vmem:[%s5709_s20 + $0x14] ss:$8 sps:$4 sm:$0xff]   ;;  %v5219_v1 = vld [vmem:[%s5709_s20 + $0x10] ss:$8 sps:$4 sm:$0xff]   ;;  %v5221_v23 = vld [vmem:[%s5709_s20 + $0x4] ss:$8 sps:$4 sm:$0xff]  }
 0x415   : > { %v5217_v37 = vld [vmem:[%s5709_s20 + $0x114] ss:$8 sps:$4 sm:$0xff]   ;;  %v5220_v24 = vld [vmem:[%s5709_s20 + $0x110] ss:$8 sps:$4 sm:$0xff]   ;;  %v5223_v7 = vld [vmem:[%s5709_s20 + $0x104] ss:$8 sps:$4 sm:$0xff]  }
 0x416   : > { %3788 = vmatpush1.bf16.msra.mxu0 %v5195_v5  ;;  %v5225_v54 = vld [vmem:[%s5709_s20] ss:$8 sps:$4 sm:$0xff]   ;;  %v5227_v22 = vld [vmem:[%s5709_s20 + $0xf4] ss:$8 sps:$4 sm:$0xff]   ;;  %v5231_v10 = vld [vmem:[%s5709_s20 + $0xf0] ss:$8 sps:$4 sm:$0xff]  }
 0x417   : > { %3829 = vmatpush1.bf16.msra.mxu1 %v5196_v59  ;;  %3789 = vmatprep.subr.bf16.mxu0 %v5197_v48  ;;  %v5226_v63 = vld [vmem:[%s5709_s20 + $0x100] ss:$8 sps:$4 sm:$0xff]   ;;  %v5229_v49 = vld [vmem:[%s5709_s20 + $0x1f4] ss:$8 sps:$4 sm:$0xff]   ;;  %v5232_v36 = vld [vmem:[%s5709_s20 + $0x1f0] ss:$8 sps:$4 sm:$0xff]  }
 0x418   : > { %3830 = vmatprep.subr.bf16.mxu1 %v5199_v31  ;;  %v5233_v6 = vld [vmem:[%s5709_s20 + $0xe4] ss:$8 sps:$4 sm:$0xff]   ;;  %v5237_v45 = vld [vmem:[%s5709_s20 + $0xe0] ss:$8 sps:$4 sm:$0xff]   ;;  %v5239_v15 = vld [vmem:[%s5709_s20 + $0xd4] ss:$8 sps:$4 sm:$0xff]  }
 0x419   : > { %v5235_v13 = vld [vmem:[%s5709_s20 + $0x1e4] ss:$8 sps:$4 sm:$0xff]   ;;  %v5238_v61 = vld [vmem:[%s5709_s20 + $0x1e0] ss:$8 sps:$4 sm:$0xff]   ;;  %v5241_v41 = vld [vmem:[%s5709_s20 + $0x1d4] ss:$8 sps:$4 sm:$0xff]  }
 0x41a   : > { %3790 = vmatpush1.bf16.msra.mxu0 %v5201_v26  ;;  %v5243_v40 = vld [vmem:[%s5709_s20 + $0xd0] ss:$8 sps:$4 sm:$0xff]   ;;  %v5245_v3 = vld [vmem:[%s5709_s20 + $0xc4] ss:$8 sps:$4 sm:$0xff]   ;;  %v5249_v0 = vld [vmem:[%s5709_s20 + $0xc0] ss:$8 sps:$4 sm:$0xff]  }
 0x41b   : > { %3831 = vmatpush1.bf16.msra.mxu1 %v5202_v29  ;;  %3791 = vmatprep.subr.bf16.mxu0 %v5203_v47  ;;  %v5244_v12 = vld [vmem:[%s5709_s20 + $0x1d0] ss:$8 sps:$4 sm:$0xff]   ;;  %v5247_v18 = vld [vmem:[%s5709_s20 + $0x1c4] ss:$8 sps:$4 sm:$0xff]   ;;  %v5250_v19 = vld [vmem:[%s5709_s20 + $0x1c0] ss:$8 sps:$4 sm:$0xff]  }
 0x41c   : > { %3832 = vmatprep.subr.bf16.mxu1 %v5205_v33  ;;  %v2964_v56 = vld [vmem:[#allocation2] sm:$0xff]  ;;  %v5251_v51 = vld [vmem:[%s5709_s20 + $0xb4] ss:$8 sps:$4 sm:$0xff]   ;;  %v7924_v52 = vld [vmem:[#allocation8_spill] sm:$0xff] }
 0x41d   : > { %v7356_v11 = vmul.f32 0.0017361111, %v2964_v56  ;;  %v5253_v21 = vld [vmem:[%s5709_s20 + $0x1b4] ss:$8 sps:$4 sm:$0xff]   ;;  %v7925_v39 = vsub.s32 1, %v7924_v52  ;;  %v7926_v9 = vsub.s32 3, %v7924_v52 }
 0x41e   : > { %3792 = vmatpush1.bf16.msra.mxu0 %v5207_v17  ;;  %v5255_v53 = vld [vmem:[%s5709_s20 + $0xb0] ss:$8 sps:$4 sm:$0xff]   ;;  %v5257_v32 = vld [vmem:[%s5709_s20 + $0xa4] ss:$8 sps:$4 sm:$0xff]   ;;  %v5261_v58 = vld [vmem:[%s5709_s20 + $0xa0] ss:$8 sps:$4 sm:$0xff]  }
 0x41f   : > { %3833 = vmatpush1.bf16.msra.mxu1 %v5208_v60  ;;  %3793 = vmatprep.subr.bf16.mxu0 %v5209_v27  ;;  %v2974_v34 = vrot.slane %v7356_v11, %v7925_v39  ;;  %v2982_v16 = vrot.slane %v7356_v11, %v7926_v9  ;;  %v5256_v46 = vld [vmem:[%s5709_s20 + $0x1b0] ss:$8 sps:$4 sm:$0xff]   ;;  %v5259_v57 = vld [vmem:[%s5709_s20 + $0x1a4] ss:$8 sps:$4 sm:$0xff]   ;;  %v5262_v55 = vld [vmem:[%s5709_s20 + $0x1a0] ss:$8 sps:$4 sm:$0xff]  }
 0x420   : > { %3834 = vmatprep.subr.bf16.mxu1 %v5211_v43  ;;  %v5263_v14 = vld [vmem:[%s5709_s20 + $0x94] ss:$8 sps:$4 sm:$0xff]   ;;  %v5267_v44 = vld [vmem:[%s5709_s20 + $0x90] ss:$8 sps:$4 sm:$0xff]   ;;  %v5269_v25 = vld [vmem:[%s5709_s20 + $0x84] ss:$8 sps:$4 sm:$0xff]  }
 0x421   : > { %v3008_v28 = vpack.c.bf16 %v2974_v34, %v2974_v34  ;;  %v3010_v62 = vpack.c.bf16 %v2982_v16, %v2982_v16  ;;  %v5265_v20 = vld [vmem:[%s5709_s20 + $0x194] ss:$8 sps:$4 sm:$0xff]   ;;  %v5268_v2 = vld [vmem:[%s5709_s20 + $0x190] ss:$8 sps:$4 sm:$0xff]   ;;  %v5271_v8 = vld [vmem:[%s5709_s20 + $0x184] ss:$8 sps:$4 sm:$0xff]  }
 0x422   : > { %3794 = vmatpush1.bf16.msra.mxu0 %v5213_v35  ;;  %v5273_v50 = vld [vmem:[%s5709_s20 + $0x80] ss:$8 sps:$4 sm:$0xff]   ;;  %v7927_v4 = vsub.s32 0, %v7924_v52  ;;  %v7928_v59 = vsub.s32 2, %v7924_v52  ;;  %v5277_v26 = vld [vmem:[%s5709_s20 + $0x274] ss:$8 sps:$4 sm:$0xff]  }
 0x423   : > { %3835 = vmatpush1.bf16.msra.mxu1 %v5214_v42  ;;  %3795 = vmatprep.subr.bf16.mxu0 %v5215_v38  ;;  %v5274_v31 = vld [vmem:[%s5709_s20 + $0x180] ss:$8 sps:$4 sm:$0xff]   ;;  %v5280_v29 = vld [vmem:[%s5709_s20 + $0x374] ss:$8 sps:$4 sm:$0xff]   ;;  %v7929_v47 = vsub.s32 5, %v7924_v52  ;;  %v7930_v17 = vsub.s32 7, %v7924_v52 }
 0x424   : > { %3836 = vmatprep.subr.bf16.mxu1 %v5217_v37  ;;  %3815 = vmatprep.mubr.bf16.mxu0 %v3008_v28  ;;  %v2970_v5 = vrot.slane %v7356_v11, %v7927_v4  ;;  %v2978_v48 = vrot.slane %v7356_v11, %v7928_v59  ;;  %v5275_v35 = vld [vmem:[%s5709_s20 + $0x270] ss:$8 sps:$4 sm:$0xff]   ;;  %v5283_v38 = vld [vmem:[%s5709_s20 + $0x264] ss:$8 sps:$4 sm:$0xff]   ;;  %v5313_v56 = vld [vmem:[%s5709_s20 + $0x214] ss:$8 sps:$4 sm:$0xff]  }
 0x425   : > { %3856 = vmatprep.mubr.bf16.mxu1 %v3010_v62  ;;  %v2990_v33 = vrot.slane %v7356_v11, %v7929_v47  ;;  %v2998_v60 = vrot.slane %v7356_v11, %v7930_v17  ;;  %v5278_v42 = vld [vmem:[%s5709_s20 + $0x370] ss:$8 sps:$4 sm:$0xff]   ;;  %v5286_v37 = vld [vmem:[%s5709_s20 + $0x364] ss:$8 sps:$4 sm:$0xff]   ;;  %v5317_v34 = vld [vmem:[%s5709_s20 + $0x200] ss:$8 sps:$4 sm:$0xff]  }
 0x426   : > { %3796 = vmatpush1.bf16.msra.mxu0 %v5219_v1  ;;  %v3007_v27 = vpack.c.bf16 %v2970_v5, %v2970_v5  ;;  %v3009_v43 = vpack.c.bf16 %v2978_v48, %v2978_v48  ;;  %v5322_v39 = vld [vmem:[%s5709_s20 + $0x304] ss:$8 sps:$4 sm:$0xff]   ;;  %v5320_v9 = vld [vmem:[%s5709_s20 + $0x300] ss:$8 sps:$4 sm:$0xff]   ;;  %v5325_v16 = vld [vmem:[%s5709_s20 + $0x2f4] ss:$8 sps:$4 sm:$0xff]  }
 0x427   : > { %3837 = vmatpush1.bf16.msra.mxu1 %v5220_v24  ;;  %3797 = vmatprep.subr.bf16.mxu0 %v5221_v23  ;;  %v3012_v1 = vpack.c.bf16 %v2990_v33, %v2990_v33  ;;  %v3014_v24 = vpack.c.bf16 %v2998_v60, %v2998_v60  ;;  %v5281_v23 = vld [vmem:[%s5709_s20 + $0x260] ss:$8 sps:$4 sm:$0xff]   ;;  %v5323_v28 = vld [vmem:[%s5709_s20 + $0x2f0] ss:$8 sps:$4 sm:$0xff]   ;;  %v5349_v4 = vld [vmem:[%s5709_s20 + $0x2b4] ss:$8 sps:$4 sm:$0xff]  }
 0x428   : > { %3838 = vmatprep.subr.bf16.mxu1 %v5223_v7  ;;  %v5284_v7 = vld [vmem:[%s5709_s20 + $0x360] ss:$8 sps:$4 sm:$0xff]   ;;  %v5326_v62 = vld [vmem:[%s5709_s20 + $0x3f0] ss:$8 sps:$4 sm:$0xff]   ;;  %v5352_v5 = vld [vmem:[%s5709_s20 + $0x3b4] ss:$8 sps:$4 sm:$0xff]  }
 0x429   : > { %v5347_v59 = vld [vmem:[%s5709_s20 + $0x2b0] ss:$8 sps:$4 sm:$0xff]   ;;  %v5356_v47 = vld [vmem:[%s5709_s20 + $0x3a0] ss:$8 sps:$4 sm:$0xff]   ;;  %v5361_v33 = vld [vmem:[%s5709_s20 + $0x294] ss:$8 sps:$4 sm:$0xff]  }
 0x42a   : > { %3798 = vmatpush1.bf16.msra.mxu0 %v5225_v54  ;;  %v5289_v54 = vld [vmem:[%s5709_s20 + $0x254] ss:$8 sps:$4 sm:$0xff]   ;;  %v5350_v48 = vld [vmem:[%s5709_s20 + $0x3b0] ss:$8 sps:$4 sm:$0xff]  }
 0x42b   : > { %3839 = vmatpush1.bf16.msra.mxu1 %v5226_v63  ;;  %3799 = vmatprep.subr.bf16.mxu0 %v5227_v22  ;;  %v5292_v63 = vld [vmem:[%s5709_s20 + $0x354] ss:$8 sps:$4 sm:$0xff]   ;;  %v5287_v22 = vld [vmem:[%s5709_s20 + $0x250] ss:$8 sps:$4 sm:$0xff]  }
 0x42c   : > { %3840 = vmatprep.subr.bf16.mxu1 %v5229_v49  ;;  %v5290_v49 = vld [vmem:[%s5709_s20 + $0x350] ss:$8 sps:$4 sm:$0xff]   ;;  %v5364_v17 = vld [vmem:[%s5709_s20 + $0x394] ss:$8 sps:$4 sm:$0xff]  }
 0x42d   : > { %v5359_v60 = vld [vmem:[%s5709_s20 + $0x290] ss:$8 sps:$4 sm:$0xff]  }
 0x42e   : > { %3800 = vmatpush2.bf16.msra.mxu0 %v5231_v10  ;;  %v5295_v10 = vld [vmem:[%s5709_s20 + $0x244] ss:$8 sps:$4 sm:$0xff]  }
 0x42f   : > { %3841 = vmatpush2.bf16.msra.mxu1 %v5232_v36  ;;  %3801 = vmatprep.subr.bf16.mxu0 %v5233_v6  ;;  %v5298_v36 = vld [vmem:[%s5709_s20 + $0x344] ss:$8 sps:$4 sm:$0xff]   ;;  %v5293_v6 = vld [vmem:[%s5709_s20 + $0x240] ss:$8 sps:$4 sm:$0xff]  }
 0x430   : > { %3842 = vmatprep.subr.bf16.mxu1 %v5235_v13  ;;  %v5296_v13 = vld [vmem:[%s5709_s20 + $0x340] ss:$8 sps:$4 sm:$0xff]  }
 0x432   : > { %3802 = vmatpush2.bf16.msra.mxu0 %v5237_v45  ;;  %v5301_v45 = vld [vmem:[%s5709_s20 + $0x234] ss:$8 sps:$4 sm:$0xff]  }
 0x433   : > { %3843 = vmatpush2.bf16.msra.mxu1 %v5238_v61  ;;  %3803 = vmatprep.subr.bf16.mxu0 %v5239_v15  ;;  %v5304_v61 = vld [vmem:[%s5709_s20 + $0x334] ss:$8 sps:$4 sm:$0xff]   ;;  %v5299_v15 = vld [vmem:[%s5709_s20 + $0x230] ss:$8 sps:$4 sm:$0xff]  }
 0x434   : > { %3844 = vmatprep.subr.bf16.mxu1 %v5241_v41  ;;  %v5302_v41 = vld [vmem:[%s5709_s20 + $0x330] ss:$8 sps:$4 sm:$0xff]  }
 0x436   : > { %3804 = vmatpush2.bf16.msra.mxu0 %v5243_v40  ;;  %v5307_v40 = vld [vmem:[%s5709_s20 + $0x224] ss:$8 sps:$4 sm:$0xff]  }
 0x437   : > { %3845 = vmatpush2.bf16.msra.mxu1 %v5244_v12  ;;  %3805 = vmatprep.subr.bf16.mxu0 %v5245_v3  ;;  %v5310_v12 = vld [vmem:[%s5709_s20 + $0x324] ss:$8 sps:$4 sm:$0xff]   ;;  %v5305_v3 = vld [vmem:[%s5709_s20 + $0x220] ss:$8 sps:$4 sm:$0xff]  }
 0x438   : > { %3846 = vmatprep.subr.bf16.mxu1 %v5247_v18  ;;  %v5308_v18 = vld [vmem:[%s5709_s20 + $0x320] ss:$8 sps:$4 sm:$0xff]  }
 0x43a   : > { %3806 = vmatpush2.bf16.msra.mxu0 %v5249_v0  ;;  %v5316_v0 = vld [vmem:[%s5709_s20 + $0x314] ss:$8 sps:$4 sm:$0xff]  }
 0x43b   : > { %3847 = vmatpush2.bf16.msra.mxu1 %v5250_v19  ;;  %3807 = vmatprep.subr.bf16.mxu0 %v5251_v51  ;;  %v5311_v19 = vld [vmem:[%s5709_s20 + $0x210] ss:$8 sps:$4 sm:$0xff]  }
 0x43c   : > { %3848 = vmatprep.subr.bf16.mxu1 %v5253_v21  ;;  %v5314_v51 = vld [vmem:[%s5709_s20 + $0x310] ss:$8 sps:$4 sm:$0xff]   ;;  %v5319_v21 = vld [vmem:[%s5709_s20 + $0x204] ss:$8 sps:$4 sm:$0xff]  }
 0x43e   : > { %3808 = vmatpush2.bf16.msra.mxu0 %v5255_v53  ;;  %v5328_v53 = vld [vmem:[%s5709_s20 + $0x3f4] ss:$8 sps:$4 sm:$0xff]  }
 0x43f   : > { %3849 = vmatpush2.bf16.msra.mxu1 %v5256_v46  ;;  %3809 = vmatprep.subr.bf16.mxu0 %v5257_v32  ;;  %v5331_v46 = vld [vmem:[%s5709_s20 + $0x2e4] ss:$8 sps:$4 sm:$0xff]  }
 0x440   : > { %3850 = vmatprep.subr.bf16.mxu1 %v5259_v57  ;;  %v5334_v32 = vld [vmem:[%s5709_s20 + $0x3e4] ss:$8 sps:$4 sm:$0xff]   ;;  %v5329_v57 = vld [vmem:[%s5709_s20 + $0x2e0] ss:$8 sps:$4 sm:$0xff]  }
 0x442   : > { %3810 = vmatpush2.bf16.msra.mxu0 %v5261_v58  ;;  %v5332_v58 = vld [vmem:[%s5709_s20 + $0x3e0] ss:$8 sps:$4 sm:$0xff]  }
 0x443   : > { %3851 = vmatpush2.bf16.msra.mxu1 %v5262_v55  ;;  %3811 = vmatprep.subr.bf16.mxu0 %v5263_v14  ;;  %v5337_v55 = vld [vmem:[%s5709_s20 + $0x2d4] ss:$8 sps:$4 sm:$0xff]  }
 0x444   : > { %3852 = vmatprep.subr.bf16.mxu1 %v5265_v20  ;;  %v5340_v14 = vld [vmem:[%s5709_s20 + $0x3d4] ss:$8 sps:$4 sm:$0xff]   ;;  %v5335_v20 = vld [vmem:[%s5709_s20 + $0x2d0] ss:$8 sps:$4 sm:$0xff]  }
 0x446   : > { %3812 = vmatpush2.bf16.msra.mxu0 %v5267_v44  ;;  %v5338_v44 = vld [vmem:[%s5709_s20 + $0x3d0] ss:$8 sps:$4 sm:$0xff]  }
 0x447   : > { %3853 = vmatpush2.bf16.msra.mxu1 %v5268_v2  ;;  %3813 = vmatprep.subr.bf16.mxu0 %v5269_v25  ;;  %v5343_v2 = vld [vmem:[%s5709_s20 + $0x2c4] ss:$8 sps:$4 sm:$0xff]  }
 0x448   : > { %3854 = vmatprep.subr.bf16.mxu1 %v5271_v8  ;;  %v5346_v25 = vld [vmem:[%s5709_s20 + $0x3c4] ss:$8 sps:$4 sm:$0xff]   ;;  %v5341_v8 = vld [vmem:[%s5709_s20 + $0x2c0] ss:$8 sps:$4 sm:$0xff]  }
 0x44a   : > { %3814 = vmatpush2.bf16.msra.mxu0 %v5273_v50  ;;  %v5344_v50 = vld [vmem:[%s5709_s20 + $0x3c0] ss:$8 sps:$4 sm:$0xff]  }
 0x44b   : > { %3855 = vmatpush2.bf16.msra.mxu1 %v5274_v31  ;;  %3865 = vmatprep.subr.bf16.mxu0 %v5277_v26  ;;  %v5355_v31 = vld [vmem:[%s5709_s20 + $0x2a4] ss:$8 sps:$4 sm:$0xff]  }
 0x44c   : > { %3906 = vmatprep.subr.bf16.mxu1 %v5280_v29  ;;  %v5358_v26 = vld [vmem:[%s5709_s20 + $0x3a4] ss:$8 sps:$4 sm:$0xff]   ;;  %v5353_v29 = vld [vmem:[%s5709_s20 + $0x2a0] ss:$8 sps:$4 sm:$0xff]  }
 0x44d   : > { %3816 = vmatmul.mubr.bf16.vlgmr.msra.gmra.mxu0 %v3007_v27  ;;  %v5362_v27 = vld [vmem:[%s5709_s20 + $0x390] ss:$8 sps:$4 sm:$0xff]  }
 0x44e   : > { %3857 = vmatmul.mubr.bf16.vlgmr.msra.gmra.mxu1 %v3009_v43  ;;  %3866 = vmatpush1.bf16.msra.mxu0 %v5275_v35  ;;  %v5367_v43 = vld [vmem:[%s5709_s20 + $0x284] ss:$8 sps:$4 sm:$0xff]  }
 0x44f   : > { %3907 = vmatpush1.bf16.msra.mxu1 %v5278_v42  ;;  %3867 = vmatprep.subr.bf16.mxu0 %v5283_v38  ;;  %v5370_v35 = vld [vmem:[%s5709_s20 + $0x384] ss:$8 sps:$4 sm:$0xff]   ;;  %v7931_v42 = vsub.s32 4, %v7924_v52 }
 0x450   : > { %3908 = vmatprep.subr.bf16.mxu1 %v5286_v37  ;;  %3897 = vmatprep.mubr.bf16.mxu0 %v3012_v1  ;;  %v7932_v37 = vsub.s32 6, %v7924_v52 }
 0x451   : > { %3938 = vmatprep.mubr.bf16.mxu1 %v3014_v24  ;;  %v2986_v38 = vrot.slane %v7356_v11, %v7931_v42  ;;  %v5365_v24 = vld [vmem:[%s5709_s20 + $0x280] ss:$8 sps:$4 sm:$0xff]  }
 0x452   : > { %3868 = vmatpush1.bf16.msra.mxu0 %v5281_v23  ;;  %v2994_v1 = vrot.slane %v7356_v11, %v7932_v37  ;;  %v5368_v23 = vld [vmem:[%s5709_s20 + $0x380] ss:$8 sps:$4 sm:$0xff]  }
 0x453   : > { %3909 = vmatpush1.bf16.msra.mxu1 %v5284_v7  ;;  %3869 = vmatprep.subr.bf16.mxu0 %v5289_v54  ;;  %v3011_v7 = vpack.c.bf16 %v2986_v38, %v2986_v38 }
 0x454   : > { %3910 = vmatprep.subr.bf16.mxu1 %v5292_v63  ;;  %v3013_v54 = vpack.c.bf16 %v2994_v1, %v2994_v1 }
 0x456   : > { %3870 = vmatpush1.bf16.msra.mxu0 %v5287_v22 }
 0x457   : > { %3911 = vmatpush1.bf16.msra.mxu1 %v5290_v49  ;;  %3871 = vmatprep.subr.bf16.mxu0 %v5295_v10 }
 0x458   : > { %3912 = vmatprep.subr.bf16.mxu1 %v5298_v36 }
 0x45a   : > { %3872 = vmatpush1.bf16.msra.mxu0 %v5293_v6 }
 0x45b   : > { %3913 = vmatpush1.bf16.msra.mxu1 %v5296_v13  ;;  %3873 = vmatprep.subr.bf16.mxu0 %v5301_v45 }
 0x45c   : > { %3914 = vmatprep.subr.bf16.mxu1 %v5304_v61 }
 0x45e   : > { %3874 = vmatpush1.bf16.msra.mxu0 %v5299_v15 }
 0x45f   : > { %3915 = vmatpush1.bf16.msra.mxu1 %v5302_v41  ;;  %3875 = vmatprep.subr.bf16.mxu0 %v5307_v40 }
 0x460   : > { %3916 = vmatprep.subr.bf16.mxu1 %v5310_v12 }
 0x462   : > { %3876 = vmatpush1.bf16.msra.mxu0 %v5305_v3 }
 0x463   : > { %3917 = vmatpush1.bf16.msra.mxu1 %v5308_v18  ;;  %3877 = vmatprep.subr.bf16.mxu0 %v5313_v56 }
 0x464   : > { %3918 = vmatprep.subr.bf16.mxu1 %v5316_v0 }
 0x466   : > { %3878 = vmatpush1.bf16.msra.mxu0 %v5311_v19 }
 0x467   : > { %3919 = vmatpush1.bf16.msra.mxu1 %v5314_v51  ;;  %3879 = vmatprep.subr.bf16.mxu0 %v5319_v21 }
 0x468   : > { %3920 = vmatprep.subr.bf16.mxu1 %v5322_v39 }
 0x46a   : > { %3880 = vmatpush1.bf16.msra.mxu0 %v5317_v34 }
 0x46b   : > { %3921 = vmatpush1.bf16.msra.mxu1 %v5320_v9  ;;  %3881 = vmatprep.subr.bf16.mxu0 %v5325_v16  ;;  %v7933_v9 = vlaneseq }
 0x46c   : > { %3922 = vmatprep.subr.bf16.mxu1 %v5328_v53 }
 0x46d   : > { %vm3967_vm2 = vcmp.lt.s32.totalorder %v7933_v9, 256 }
 0x46e   : > { %3882 = vmatpush2.bf16.msra.mxu0 %v5323_v28 }
 0x46f   : > { %3923 = vmatpush2.bf16.msra.mxu1 %v5326_v62  ;;  %3883 = vmatprep.subr.bf16.mxu0 %v5331_v46 }
 0x470   : > { %3924 = vmatprep.subr.bf16.mxu1 %v5334_v32 }
 0x472   : > { %3884 = vmatpush2.bf16.msra.mxu0 %v5329_v57 }
 0x473   : > { %3925 = vmatpush2.bf16.msra.mxu1 %v5332_v58  ;;  %3885 = vmatprep.subr.bf16.mxu0 %v5337_v55 }
 0x474   : > { %3926 = vmatprep.subr.bf16.mxu1 %v5340_v14 }
 0x476   : > { %3886 = vmatpush2.bf16.msra.mxu0 %v5335_v20 }
 0x477   : > { %3927 = vmatpush2.bf16.msra.mxu1 %v5338_v44  ;;  %3887 = vmatprep.subr.bf16.mxu0 %v5343_v2 }
 0x478   : > { %3928 = vmatprep.subr.bf16.mxu1 %v5346_v25 }
 0x47a   : > { %3888 = vmatpush2.bf16.msra.mxu0 %v5341_v8 }
 0x47b   : > { %3929 = vmatpush2.bf16.msra.mxu1 %v5344_v50  ;;  %3889 = vmatprep.subr.bf16.mxu0 %v5349_v4 }
 0x47c   : > { %3930 = vmatprep.subr.bf16.mxu1 %v5352_v5 }
 0x47e   : > { %3890 = vmatpush2.bf16.msra.mxu0 %v5347_v59 }
 0x47f   : > { %3931 = vmatpush2.bf16.msra.mxu1 %v5350_v48  ;;  %3891 = vmatprep.subr.bf16.mxu0 %v5355_v31 }
 0x480   : > { %3932 = vmatprep.subr.bf16.mxu1 %v5358_v26 }
 0x482   : > { %3892 = vmatpush2.bf16.msra.mxu0 %v5353_v29 }
 0x483   : > { %3933 = vmatpush2.bf16.msra.mxu1 %v5356_v47  ;;  %3893 = vmatprep.subr.bf16.mxu0 %v5361_v33 }
 0x484   : > { %3934 = vmatprep.subr.bf16.mxu1 %v5364_v17 }
 0x486   : > { %3894 = vmatpush2.bf16.msra.mxu0 %v5359_v60 }
 0x487   : > { %3935 = vmatpush2.bf16.msra.mxu1 %v5362_v27  ;;  %3895 = vmatprep.subr.bf16.mxu0 %v5367_v43 }
 0x488   : > { %3936 = vmatprep.subr.bf16.mxu1 %v5370_v35 }
 0x48a   : > { %3896 = vmatpush2.bf16.msra.mxu0 %v5365_v24 }
 0x48b   : > { %3937 = vmatpush2.bf16.msra.mxu1 %v5368_v23 }
 0x48d   : > { %3898 = vmatmul.mubr.bf16.vlgmr.msra.gmra.mxu0 %v3011_v7 }
 0x48e   : > { %3939 = vmatmul.mubr.bf16.vlgmr.msra.gmra.mxu1 %v3013_v54 }
 0x50d   : > { %v3817_v63 = vpop.f32.mrf.mxu0 }
 0x50e   : > { %v3858_v22 = vpop.f32.mrf.mxu1 }
 0x50f   : > { %v3859_v49 = vadd.f32 %v3858_v22, %v3817_v63  ;;  %v3819_v10 = vpop.f32.mrf.mxu0 }
 0x510   : > { %v3860_v36 = vpop.f32.mrf.mxu1 }
 0x511   : > { %v3821_v52 = vpop.f32.mrf.mxu0  ;;  %v3861_v15 = vadd.f32 %v3860_v36, %v3819_v10 }
 0x512   : > { %v3862_v6 = vpop.f32.mrf.mxu1 }
 0x513   : > { %v3822_v11 = vpop.f32.mrf.mxu0 }
 0x514   : > { %v3863_v13 = vpop.f32.mrf.mxu1 }
 0x54d   : > { %v3899_v45 = vpop.f32.mrf.mxu0 }
 0x54e   : > { %v3940_v61 = vpop.f32.mrf.mxu1  ;;  %v3900_v41 = vadd.f32 %v3899_v45, %v3859_v49 }
 0x54f   : > { %v3901_v40 = vpop.f32.mrf.mxu0 }
 0x550   : > { %v3942_v12 = vpop.f32.mrf.mxu1  ;;  %v3902_v3 = vadd.f32 %v3901_v40, %v3861_v15  ;;  %v3941_v0 = vadd.f32 %v3940_v61, %v3900_v41 }
 0x551   : > { %v3903_v18 = vpop.f32.mrf.mxu0 }
 0x552   : > { %v3944_v56 = vpop.f32.mrf.mxu1  ;;  %v3943_v19 = vadd.f32 %v3942_v12, %v3902_v3 }
 0x553   : > { %v3904_v51 = vpop.f32.mrf.mxu0 }
 0x554   : > { %v3945_v21 = vpop.f32.mrf.mxu1  ;;  %v3949_v39 = vcombine.low %v3941_v0, %v3943_v19 }
 0x556   : > { %v3956_v34 = vrot.slane %v3949_v39, %v7300_v30 }
 0x558   : > { %v3963_v16 = vrot.slane %v3956_v34, %v7300_v30 }
 0x55a   : > { %3969 = vst.msk [vmem:[%s505_s0] sm:$0x3] %vm3967_vm2, %v3963_v16 }
 0x55b PF: > { %s16_s29 = sadd.s32 1, %s5441_s29   ;;  %s7934_s25 = sld [smem:[#allocation4_spill]] }
 0x55c   : > { %p13_p4 = scmp.ge.s32.totalorder %s16_s29, 22   ;;  %s7935_s18 = sld [smem:[#allocation5_spill]] }
 0x55d   : > { %s7936_s19 = sld [smem:[#allocation6_spill]]  ;;  %s7938_s21 = smov %s5413_s22 }
 0x55e   : > { %s7937_s28 = sld [smem:[#allocation7_spill]]  ;;  %s7939_s22 = smov %s5546_s11 }
 0x55f   : > { %s7940_s23 = smov %s5429_s26  ;;  %s7941_s24 = smov %s5433_s27 }
 0x560   :  { %15 = sbr.rel (!%p13_p4) target bundleno = 8 (0x8), region = 119 }
 0x562   : > { %s7942_s26 = smov %s7935_s18 }
 0x563   : > { %s7943_s27 = smov %s7936_s19 }

</bundles_post_ra>
